<compile_context>
chip_gen: v7x
topology: tpu7x:2x2x1
jax: 0.10.0
libtpu: 0.0.40
codegen_flags: <defaults>
</compile_context>

<pallas_src>
import jax
import jax.numpy as jnp
from jax.experimental import pallas as pl
from jax.experimental.pallas import tpu as pltpu


# --------------------------- fused encoder kernel ---------------------------

def _make_encoder_kernel(seq_len, batch_p, hidden_size, n_layers):
    S, B, H = seq_len, batch_p, hidden_size

    def cell_step(gates, c_prev):
        # Two full-vreg EUP passes over (B, 4H), then static lane slices
        # (PyTorch gate order: i, f, g, o).
        sig = jax.nn.sigmoid(gates)
        tnh = jnp.tanh(gates)
        i_g = sig[:, 0 * H:1 * H]
        f_g = sig[:, 1 * H:2 * H]
        o_g = sig[:, 3 * H:4 * H]
        g_g = tnh[:, 2 * H:3 * H]
        c_new = f_g * c_prev + i_g * g_g
        h_new = o_g * jnp.tanh(c_new)
        return h_new, c_new

    def kernel(x_ref, wlin_ref, blin_ref, wih0_ref, whh0_ref, wf_ref, b_ref,
               hN_ref, cN_ref):
        # ---------------- Linear + ReLU (Dropout is identity in eval) --------
        emb = jnp.maximum(
            jnp.dot(x_ref[...], wlin_ref[...],
                    preferred_element_type=jnp.float32) + blin_ref[...],
            0.0)                                                  # (S*B, E)

        # Layer-0 input projection hoisted out of the recurrence.
        gx0 = jnp.dot(emb, wih0_ref[...],
                      preferred_element_type=jnp.float32) + b_ref[0]  # (S*B, 4H)
        whh0 = whh0_ref[...]                                          # (H, 4H)

        h = [jnp.zeros((B, H), jnp.float32) for _ in range(n_layers)]
        c = [jnp.zeros((B, H), jnp.float32) for _ in range(n_layers)]

        # ---- Wavefront over (layer, time), fully unrolled --------------------
        # Slot tau runs step t = tau - l of layer l.  Layers are visited in
        # DECREASING l so that layer l reads layer l-1's output from the
        # previous slot (i.e. exactly step t).
        for tau in range(S + n_layers - 1):
            for l in range(n_layers - 1, -1, -1):
                t = tau - l
                if t < 0 or t >= S:
                    continue
                if l == 0:
                    gates = gx0[t * B:(t + 1) * B, :] + jnp.dot(
                        h[0], whh0, preferred_element_type=jnp.float32)
                else:
                    # Fused input + recurrent matmul: (B,2H)@(2H,4H), one MXU
                    # issue per step instead of two.
                    zin = jnp.concatenate([h[l - 1], h[l]], axis=1)   # (B, 2H)
                    gates = jnp.dot(
                        zin, wf_ref[l - 1],
                        preferred_element_type=jnp.float32) + b_ref[l]
                h[l], c[l] = cell_step(gates, c[l])

        # Lane-dense (Bp, n_layers*H) = (8,128) slabs: one unmasked store each.
        hN_ref[...] = jnp.concatenate(h, axis=1)
        cN_ref[...] = jnp.concatenate(c, axis=1)

    return kernel


def encoder_forward(params, x):
    """x: (seq, batch, input_size) -> (hidden, cell), each (n_layers, batch, H)."""
    S, B, Din = x.shape
    n_layers, H = params["whh_t"].shape[0], params["whh_t"].shape[1]
    E = params["w_lin_t"].shape[1]

    # Pad batch to a full f32 sublane group (8): unmasked matmul rows/stores.
    # Padded rows only ever see zero inputs + biases (finite) and are trimmed.
    Bp = ((B + 7) // 8) * 8
    if Bp != B:
        x = jnp.pad(x, ((0, 0), (0, Bp - B), (0, 0)))
    x2d = x.reshape(S * Bp, Din)

    # Stacked [Wih; Whh] per layer >= 1 for the fused per-step matmul.
    w_fused = jnp.concatenate(
        [params["wih_rest_t"], params["whh_t"][1:]], axis=1)   # (L-1, 2H, 4H)

    kernel = _make_encoder_kernel(S, Bp, H, n_layers)
    h_slab, c_slab = pl.pallas_call(
        kernel,
        out_shape=(jax.ShapeDtypeStruct((Bp, n_layers * H), jnp.float32),
                   jax.ShapeDtypeStruct((Bp, n_layers * H), jnp.float32)),
        in_specs=[pl.BlockSpec(memory_space=pltpu.MemorySpace.VMEM)] * 7,
        out_specs=(pl.BlockSpec(memory_space=pltpu.MemorySpace.VMEM),) * 2,
    )(x2d,
      params["w_lin_t"], params["b_lin"].reshape(1, E),
      params["wih0_t"], params["whh_t"][0], w_fused, params["b"])

    # TODO(synk): at production sizes (H=256+, long S, big B) add a grid over
    # batch with dimension_semantics=("parallel",) (2 TCs on v7x), tile S, set
    # vmem_limit_bytes for the 64 MiB v7x VMEM budget, and optionally cast
    # weights to bf16 (MXU-native, f32 accumulate) to halve weight footprint.
    hidden = h_slab.reshape(Bp, n_layers, H).transpose(1, 0, 2)[:, :B, :]
    cell = c_slab.reshape(Bp, n_layers, H).transpose(1, 0, 2)[:, :B, :]
    return hidden, cell


# ------------------------- parameter initialization -------------------------

def init_encoder_params(key, input_size, embedding_size, hidden_size, n_layers):
    """PyTorch-style uniform(-k, k) init. Weights stored transposed (in, out)."""
    k_lin = 1.0 / jnp.sqrt(input_size)
    key, k0, k1 = jax.random.split(key, 3)
    w_lin_t = jax.random.uniform(
        k0, (input_size, embedding_size), jnp.float32, -k_lin, k_lin)
    b_lin = jax.random.uniform(
        k1, (embedding_size,), jnp.float32, -k_lin, k_lin)

    k_lstm = 1.0 / jnp.sqrt(hidden_size)
    wih, whh, bs = [], [], []
    din = embedding_size
    for _ in range(n_layers):
        key, ka, kb, kc, kd = jax.random.split(key, 5)
        wih.append(jax.random.uniform(
            ka, (din, 4 * hidden_size), jnp.float32, -k_lstm, k_lstm))
        whh.append(jax.random.uniform(
            kb, (hidden_size, 4 * hidden_size), jnp.float32, -k_lstm, k_lstm))
        b_ih = jax.random.uniform(
            kc, (4 * hidden_size,), jnp.float32, -k_lstm, k_lstm)
        b_hh = jax.random.uniform(
            kd, (4 * hidden_size,), jnp.float32, -k_lstm, k_lstm)
        bs.append((b_ih + b_hh).reshape(1, 4 * hidden_size))
        din = hidden_size
    return {
        "w_lin_t": w_lin_t,
        "b_lin": b_lin,
        "wih0_t": wih[0],                          # (E, 4H)
        "wih_rest_t": jnp.stack(wih[1:], axis=0),  # (n_layers-1, H, 4H)
        "whh_t": jnp.stack(whh, axis=0),           # (n_layers,   H, 4H)
        "b": jnp.stack(bs, axis=0),                # (n_layers,   1, 4H)
    }


# ----------------------------- pure-JAX reference ---------------------------

def encoder_reference(params, x):
    S, B, _ = x.shape
    n_layers, H = params["whh_t"].shape[0], params["whh_t"].shape[1]
    y = jnp.maximum(x @ params["w_lin_t"] + params["b_lin"], 0.0)  # (S, B, E)
    hs, cs = [], []
    for l in range(n_layers):
        wih = params["wih0_t"] if l == 0 else params["wih_rest_t"][l - 1]
        whh = params["whh_t"][l]
        b = params["b"][l]
        h = jnp.zeros((B, H), jnp.float32)
        c = jnp.zeros((B, H), jnp.float32)
        outs = []
        for t in range(S):
            gates = y[t] @ wih + h @ whh + b
            i = jax.nn.sigmoid(gates[:, 0 * H:1 * H])
            f = jax.nn.sigmoid(gates[:, 1 * H:2 * H])
            g = jnp.tanh(gates[:, 2 * H:3 * H])
            o = jax.nn.sigmoid(gates[:, 3 * H:4 * H])
            c = f * c + i * g
            h = o * jnp.tanh(c)
            outs.append(h)
        y = jnp.stack(outs, axis=0)
        hs.append(h)
        cs.append(c)
    return jnp.stack(hs, axis=0), jnp.stack(cs, axis=0)


# ----------------------------------- main ------------------------------------

if __name__ == "__main__":
    SEQ, BATCH = 8, 2
    INPUT_SIZE = 6          # matches module-level `input_size = 6`
    EMBEDDING_SIZE = 32     # scaled-down embedding_size
    HIDDEN_SIZE = 32        # scaled-down hidden_size (4H = 128 lanes)
    N_LAYERS = 4

    key = jax.random.PRNGKey(0)
    key, kx, kp = jax.random.split(key, 3)
    x = jax.random.normal(kx, (SEQ, BATCH, INPUT_SIZE), jnp.float32)
    params = init_encoder_params(kp, INPUT_SIZE, EMBEDDING_SIZE,
                                 HIDDEN_SIZE, N_LAYERS)

    hidden, cell = encoder_forward(params, x)
    jax.block_until_ready((hidden, cell))

    assert hidden.shape == (N_LAYERS, BATCH, HIDDEN_SIZE)
    assert cell.shape == (N_LAYERS, BATCH, HIDDEN_SIZE)

    # Correctness check against a pure-JAX reference (tolerance covers MXU f32
    # pass decomposition and the fused-matmul accumulation-order difference).
    h_ref, c_ref = encoder_reference(params, x)
    assert jnp.allclose(hidden, h_ref, atol=2e-3, rtol=2e-3)
    assert jnp.allclose(cell, c_ref, atol=2e-3, rtol=2e-3)

    print("KERNEL_OK")
</pallas_src>

<mosaic_0001>
module attributes {stable_mosaic.version = 11 : i64} {
  func.func @kernel(%arg0: memref<64x6xf32, #tpu.memory_space<vmem>>, %arg1: memref<6x32xf32, #tpu.memory_space<vmem>>, %arg2: memref<1x32xf32, #tpu.memory_space<vmem>>, %arg3: memref<32x128xf32, #tpu.memory_space<vmem>>, %arg4: memref<32x128xf32, #tpu.memory_space<vmem>>, %arg5: memref<3x64x128xf32, #tpu.memory_space<vmem>>, %arg6: memref<4x1x128xf32, #tpu.memory_space<vmem>>, %arg7: memref<8x128xf32, #tpu.memory_space<vmem>>, %arg8: memref<8x128xf32, #tpu.memory_space<vmem>>) attributes {dimension_semantics = [], scalar_prefetch = 0 : i64, scratch_operands = 0 : i64, tpu.core_type = #tpu.core_type<tc>} {
    %c0 = arith.constant 0 : index
    %c0_0 = arith.constant 0 : index
    %0 = vector.load %arg0[%c0, %c0_0] : memref<64x6xf32, #tpu.memory_space<vmem>>, vector<64x6xf32>
    %c0_1 = arith.constant 0 : index
    %c0_2 = arith.constant 0 : index
    %1 = vector.load %arg1[%c0_1, %c0_2] : memref<6x32xf32, #tpu.memory_space<vmem>>, vector<6x32xf32>
    %cst = arith.constant dense<0.000000e+00> : vector<64x32xf32>
    %2 = tpu.matmul %0, %1, %cst {dimension_numbers = #tpu.dot_dimension_numbers<[1], [0], [0], [1], [0, 0, 1, 1], [], []>} : vector<64x6xf32>, vector<6x32xf32>, vector<64x32xf32> -> vector<64x32xf32>
    %c0_3 = arith.constant 0 : index
    %c0_4 = arith.constant 0 : index
    %3 = vector.load %arg2[%c0_3, %c0_4] : memref<1x32xf32, #tpu.memory_space<vmem>>, vector<1x32xf32>
    %4 = vector.broadcast %3 : vector<1x32xf32> to vector<64x32xf32>
    %5 = arith.addf %2, %4 : vector<64x32xf32>
    %cst_5 = arith.constant 0.000000e+00 : f32
    %6 = vector.broadcast %cst_5 : f32 to vector<64x32xf32>
    %7 = arith.maximumf %5, %6 : vector<64x32xf32>
    %c0_6 = arith.constant 0 : index
    %c0_7 = arith.constant 0 : index
    %8 = vector.load %arg3[%c0_6, %c0_7] : memref<32x128xf32, #tpu.memory_space<vmem>>, vector<32x128xf32>
    %cst_8 = arith.constant dense<0.000000e+00> : vector<64x128xf32>
    %9 = tpu.matmul %7, %8, %cst_8 {dimension_numbers = #tpu.dot_dimension_numbers<[1], [0], [0], [1], [0, 0, 1, 1], [], []>} : vector<64x32xf32>, vector<32x128xf32>, vector<64x128xf32> -> vector<64x128xf32>
    %c0_9 = arith.constant 0 : index
    %c0_10 = arith.constant 0 : index
    %c0_11 = arith.constant 0 : index
    %10 = vector.load %arg6[%c0_9, %c0_10, %c0_11] : memref<4x1x128xf32, #tpu.memory_space<vmem>>, vector<1x1x128xf32>
    %11 = vector.shape_cast %10 : vector<1x1x128xf32> to vector<1x128xf32>
    %12 = vector.broadcast %11 : vector<1x128xf32> to vector<64x128xf32>
    %13 = arith.addf %9, %12 : vector<64x128xf32>
    %c0_12 = arith.constant 0 : index
    %c0_13 = arith.constant 0 : index
    %14 = vector.load %arg4[%c0_12, %c0_13] : memref<32x128xf32, #tpu.memory_space<vmem>>, vector<32x128xf32>
    %cst_14 = arith.constant 0.000000e+00 : f32
    %15 = vector.broadcast %cst_14 : f32 to vector<8x32xf32>
    %cst_15 = arith.constant 0.000000e+00 : f32
    %16 = vector.broadcast %cst_15 : f32 to vector<8x32xf32>
    %cst_16 = arith.constant 0.000000e+00 : f32
    %17 = vector.broadcast %cst_16 : f32 to vector<8x32xf32>
    %cst_17 = arith.constant 0.000000e+00 : f32
    %18 = vector.broadcast %cst_17 : f32 to vector<8x32xf32>
    %cst_18 = arith.constant 0.000000e+00 : f32
    %19 = vector.broadcast %cst_18 : f32 to vector<8x32xf32>
    %cst_19 = arith.constant 0.000000e+00 : f32
    %20 = vector.broadcast %cst_19 : f32 to vector<8x32xf32>
    %cst_20 = arith.constant 0.000000e+00 : f32
    %21 = vector.broadcast %cst_20 : f32 to vector<8x32xf32>
    %cst_21 = arith.constant 0.000000e+00 : f32
    %22 = vector.broadcast %cst_21 : f32 to vector<8x32xf32>
    %23 = vector.extract_strided_slice %13 {offsets = [0, 0], sizes = [8, 128], strides = [1, 1]} : vector<64x128xf32> to vector<8x128xf32>
    %cst_22 = arith.constant dense<0.000000e+00> : vector<8x128xf32>
    %24 = tpu.matmul %15, %14, %cst_22 {dimension_numbers = #tpu.dot_dimension_numbers<[1], [0], [0], [1], [0, 0, 1, 1], [], []>} : vector<8x32xf32>, vector<32x128xf32>, vector<8x128xf32> -> vector<8x128xf32>
    %25 = arith.addf %23, %24 : vector<8x128xf32>
    %26 = arith.negf %25 : vector<8x128xf32>
    %27 = math.exp %26 : vector<8x128xf32>
    %cst_23 = arith.constant 1.000000e+00 : f32
    %28 = vector.broadcast %cst_23 : f32 to vector<8x128xf32>
    %29 = arith.addf %28, %27 : vector<8x128xf32>
    %30 = arith.divf %28, %29 : vector<8x128xf32>
    %31 = math.tanh %25 : vector<8x128xf32>
    %32 = vector.extract_strided_slice %30 {offsets = [0, 0], sizes = [8, 32], strides = [1, 1]} : vector<8x128xf32> to vector<8x32xf32>
    %33 = vector.extract_strided_slice %30 {offsets = [0, 32], sizes = [8, 32], strides = [1, 1]} : vector<8x128xf32> to vector<8x32xf32>
    %34 = vector.extract_strided_slice %30 {offsets = [0, 96], sizes = [8, 32], strides = [1, 1]} : vector<8x128xf32> to vector<8x32xf32>
    %35 = vector.extract_strided_slice %31 {offsets = [0, 64], sizes = [8, 32], strides = [1, 1]} : vector<8x128xf32> to vector<8x32xf32>
    %36 = arith.mulf %33, %19 : vector<8x32xf32>
    %37 = arith.mulf %32, %35 : vector<8x32xf32>
    %38 = arith.addf %36, %37 : vector<8x32xf32>
    %39 = math.tanh %38 : vector<8x32xf32>
    %40 = arith.mulf %34, %39 : vector<8x32xf32>
    %41 = tpu.concatenate %40, %16 in 1 : vector<8x32xf32>, vector<8x32xf32> -> vector<8x64xf32>
    %c0_24 = arith.constant 0 : index
    %c0_25 = arith.constant 0 : index
    %c0_26 = arith.constant 0 : index
    %42 = vector.load %arg5[%c0_24, %c0_25, %c0_26] : memref<3x64x128xf32, #tpu.memory_space<vmem>>, vector<1x64x128xf32>
    %43 = vector.shape_cast %42 : vector<1x64x128xf32> to vector<64x128xf32>
    %cst_27 = arith.constant dense<0.000000e+00> : vector<8x128xf32>
    %44 = tpu.matmul %41, %43, %cst_27 {dimension_numbers = #tpu.dot_dimension_numbers<[1], [0], [0], [1], [0, 0, 1, 1], [], []>} : vector<8x64xf32>, vector<64x128xf32>, vector<8x128xf32> -> vector<8x128xf32>
    %c1 = arith.constant 1 : index
    %c0_28 = arith.constant 0 : index
    %c0_29 = arith.constant 0 : index
    %45 = vector.load %arg6[%c1, %c0_28, %c0_29] : memref<4x1x128xf32, #tpu.memory_space<vmem>>, vector<1x1x128xf32>
    %46 = vector.shape_cast %45 : vector<1x1x128xf32> to vector<1x128xf32>
    %47 = vector.broadcast %46 : vector<1x128xf32> to vector<8x128xf32>
    %48 = arith.addf %44, %47 : vector<8x128xf32>
    %49 = arith.negf %48 : vector<8x128xf32>
    %50 = math.exp %49 : vector<8x128xf32>
    %cst_30 = arith.constant 1.000000e+00 : f32
    %51 = vector.broadcast %cst_30 : f32 to vector<8x128xf32>
    %52 = arith.addf %51, %50 : vector<8x128xf32>
    %53 = arith.divf %51, %52 : vector<8x128xf32>
    %54 = math.tanh %48 : vector<8x128xf32>
    %55 = vector.extract_strided_slice %53 {offsets = [0, 0], sizes = [8, 32], strides = [1, 1]} : vector<8x128xf32> to vector<8x32xf32>
    %56 = vector.extract_strided_slice %53 {offsets = [0, 32], sizes = [8, 32], strides = [1, 1]} : vector<8x128xf32> to vector<8x32xf32>
    %57 = vector.extract_strided_slice %53 {offsets = [0, 96], sizes = [8, 32], strides = [1, 1]} : vector<8x128xf32> to vector<8x32xf32>
    %58 = vector.extract_strided_slice %54 {offsets = [0, 64], sizes = [8, 32], strides = [1, 1]} : vector<8x128xf32> to vector<8x32xf32>
    %59 = arith.mulf %56, %20 : vector<8x32xf32>
    %60 = arith.mulf %55, %58 : vector<8x32xf32>
    %61 = arith.addf %59, %60 : vector<8x32xf32>
    %62 = math.tanh %61 : vector<8x32xf32>
    %63 = arith.mulf %57, %62 : vector<8x32xf32>
    %64 = vector.extract_strided_slice %13 {offsets = [8, 0], sizes = [8, 128], strides = [1, 1]} : vector<64x128xf32> to vector<8x128xf32>
    %cst_31 = arith.constant dense<0.000000e+00> : vector<8x128xf32>
    %65 = tpu.matmul %40, %14, %cst_31 {dimension_numbers = #tpu.dot_dimension_numbers<[1], [0], [0], [1], [0, 0, 1, 1], [], []>} : vector<8x32xf32>, vector<32x128xf32>, vector<8x128xf32> -> vector<8x128xf32>
    %66 = arith.addf %64, %65 : vector<8x128xf32>
    %67 = arith.negf %66 : vector<8x128xf32>
    %68 = math.exp %67 : vector<8x128xf32>
    %cst_32 = arith.constant 1.000000e+00 : f32
    %69 = vector.broadcast %cst_32 : f32 to vector<8x128xf32>
    %70 = arith.addf %69, %68 : vector<8x128xf32>
    %71 = arith.divf %69, %70 : vector<8x128xf32>
    %72 = math.tanh %66 : vector<8x128xf32>
    %73 = vector.extract_strided_slice %71 {offsets = [0, 0], sizes = [8, 32], strides = [1, 1]} : vector<8x128xf32> to vector<8x32xf32>
    %74 = vector.extract_strided_slice %71 {offsets = [0, 32], sizes = [8, 32], strides = [1, 1]} : vector<8x128xf32> to vector<8x32xf32>
    %75 = vector.extract_strided_slice %71 {offsets = [0, 96], sizes = [8, 32], strides = [1, 1]} : vector<8x128xf32> to vector<8x32xf32>
    %76 = vector.extract_strided_slice %72 {offsets = [0, 64], sizes = [8, 32], strides = [1, 1]} : vector<8x128xf32> to vector<8x32xf32>
    %77 = arith.mulf %74, %38 : vector<8x32xf32>
    %78 = arith.mulf %73, %76 : vector<8x32xf32>
    %79 = arith.addf %77, %78 : vector<8x32xf32>
    %80 = math.tanh %79 : vector<8x32xf32>
    %81 = arith.mulf %75, %80 : vector<8x32xf32>
    %82 = tpu.concatenate %63, %17 in 1 : vector<8x32xf32>, vector<8x32xf32> -> vector<8x64xf32>
    %c1_33 = arith.constant 1 : index
    %c0_34 = arith.constant 0 : index
    %c0_35 = arith.constant 0 : index
    %83 = vector.load %arg5[%c1_33, %c0_34, %c0_35] : memref<3x64x128xf32, #tpu.memory_space<vmem>>, vector<1x64x128xf32>
    %84 = vector.shape_cast %83 : vector<1x64x128xf32> to vector<64x128xf32>
    %cst_36 = arith.constant dense<0.000000e+00> : vector<8x128xf32>
    %85 = tpu.matmul %82, %84, %cst_36 {dimension_numbers = #tpu.dot_dimension_numbers<[1], [0], [0], [1], [0, 0, 1, 1], [], []>} : vector<8x64xf32>, vector<64x128xf32>, vector<8x128xf32> -> vector<8x128xf32>
    %c2 = arith.constant 2 : index
    %c0_37 = arith.constant 0 : index
    %c0_38 = arith.constant 0 : index
    %86 = vector.load %arg6[%c2, %c0_37, %c0_38] : memref<4x1x128xf32, #tpu.memory_space<vmem>>, vector<1x1x128xf32>
    %87 = vector.shape_cast %86 : vector<1x1x128xf32> to vector<1x128xf32>
    %88 = vector.broadcast %87 : vector<1x128xf32> to vector<8x128xf32>
    %89 = arith.addf %85, %88 : vector<8x128xf32>
    %90 = arith.negf %89 : vector<8x128xf32>
    %91 = math.exp %90 : vector<8x128xf32>
    %cst_39 = arith.constant 1.000000e+00 : f32
    %92 = vector.broadcast %cst_39 : f32 to vector<8x128xf32>
    %93 = arith.addf %92, %91 : vector<8x128xf32>
    %94 = arith.divf %92, %93 : vector<8x128xf32>
    %95 = math.tanh %89 : vector<8x128xf32>
    %96 = vector.extract_strided_slice %94 {offsets = [0, 0], sizes = [8, 32], strides = [1, 1]} : vector<8x128xf32> to vector<8x32xf32>
    %97 = vector.extract_strided_slice %94 {offsets = [0, 32], sizes = [8, 32], strides = [1, 1]} : vector<8x128xf32> to vector<8x32xf32>
    %98 = vector.extract_strided_slice %94 {offsets = [0, 96], sizes = [8, 32], strides = [1, 1]} : vector<8x128xf32> to vector<8x32xf32>
    %99 = vector.extract_strided_slice %95 {offsets = [0, 64], sizes = [8, 32], strides = [1, 1]} : vector<8x128xf32> to vector<8x32xf32>
    %100 = arith.mulf %97, %21 : vector<8x32xf32>
    %101 = arith.mulf %96, %99 : vector<8x32xf32>
    %102 = arith.addf %100, %101 : vector<8x32xf32>
    %103 = math.tanh %102 : vector<8x32xf32>
    %104 = arith.mulf %98, %103 : vector<8x32xf32>
    %105 = tpu.concatenate %81, %63 in 1 : vector<8x32xf32>, vector<8x32xf32> -> vector<8x64xf32>
    %c0_40 = arith.constant 0 : index
    %c0_41 = arith.constant 0 : index
    %c0_42 = arith.constant 0 : index
    %106 = vector.load %arg5[%c0_40, %c0_41, %c0_42] : memref<3x64x128xf32, #tpu.memory_space<vmem>>, vector<1x64x128xf32>
    %107 = vector.shape_cast %106 : vector<1x64x128xf32> to vector<64x128xf32>
    %cst_43 = arith.constant dense<0.000000e+00> : vector<8x128xf32>
    %108 = tpu.matmul %105, %107, %cst_43 {dimension_numbers = #tpu.dot_dimension_numbers<[1], [0], [0], [1], [0, 0, 1, 1], [], []>} : vector<8x64xf32>, vector<64x128xf32>, vector<8x128xf32> -> vector<8x128xf32>
    %c1_44 = arith.constant 1 : index
    %c0_45 = arith.constant 0 : index
    %c0_46 = arith.constant 0 : index
    %109 = vector.load %arg6[%c1_44, %c0_45, %c0_46] : memref<4x1x128xf32, #tpu.memory_space<vmem>>, vector<1x1x128xf32>
    %110 = vector.shape_cast %109 : vector<1x1x128xf32> to vector<1x128xf32>
    %111 = vector.broadcast %110 : vector<1x128xf32> to vector<8x128xf32>
    %112 = arith.addf %108, %111 : vector<8x128xf32>
    %113 = arith.negf %112 : vector<8x128xf32>
    %114 = math.exp %113 : vector<8x128xf32>
    %cst_47 = arith.constant 1.000000e+00 : f32
    %115 = vector.broadcast %cst_47 : f32 to vector<8x128xf32>
    %116 = arith.addf %115, %114 : vector<8x128xf32>
    %117 = arith.divf %115, %116 : vector<8x128xf32>
    %118 = math.tanh %112 : vector<8x128xf32>
    %119 = vector.extract_strided_slice %117 {offsets = [0, 0], sizes = [8, 32], strides = [1, 1]} : vector<8x128xf32> to vector<8x32xf32>
    %120 = vector.extract_strided_slice %117 {offsets = [0, 32], sizes = [8, 32], strides = [1, 1]} : vector<8x128xf32> to vector<8x32xf32>
    %121 = vector.extract_strided_slice %117 {offsets = [0, 96], sizes = [8, 32], strides = [1, 1]} : vector<8x128xf32> to vector<8x32xf32>
    %122 = vector.extract_strided_slice %118 {offsets = [0, 64], sizes = [8, 32], strides = [1, 1]} : vector<8x128xf32> to vector<8x32xf32>
    %123 = arith.mulf %120, %61 : vector<8x32xf32>
    %124 = arith.mulf %119, %122 : vector<8x32xf32>
    %125 = arith.addf %123, %124 : vector<8x32xf32>
    %126 = math.tanh %125 : vector<8x32xf32>
    %127 = arith.mulf %121, %126 : vector<8x32xf32>
    %128 = vector.extract_strided_slice %13 {offsets = [16, 0], sizes = [8, 128], strides = [1, 1]} : vector<64x128xf32> to vector<8x128xf32>
    %cst_48 = arith.constant dense<0.000000e+00> : vector<8x128xf32>
    %129 = tpu.matmul %81, %14, %cst_48 {dimension_numbers = #tpu.dot_dimension_numbers<[1], [0], [0], [1], [0, 0, 1, 1], [], []>} : vector<8x32xf32>, vector<32x128xf32>, vector<8x128xf32> -> vector<8x128xf32>
    %130 = arith.addf %128, %129 : vector<8x128xf32>
    %131 = arith.negf %130 : vector<8x128xf32>
    %132 = math.exp %131 : vector<8x128xf32>
    %cst_49 = arith.constant 1.000000e+00 : f32
    %133 = vector.broadcast %cst_49 : f32 to vector<8x128xf32>
    %134 = arith.addf %133, %132 : vector<8x128xf32>
    %135 = arith.divf %133, %134 : vector<8x128xf32>
    %136 = math.tanh %130 : vector<8x128xf32>
    %137 = vector.extract_strided_slice %135 {offsets = [0, 0], sizes = [8, 32], strides = [1, 1]} : vector<8x128xf32> to vector<8x32xf32>
    %138 = vector.extract_strided_slice %135 {offsets = [0, 32], sizes = [8, 32], strides = [1, 1]} : vector<8x128xf32> to vector<8x32xf32>
    %139 = vector.extract_strided_slice %135 {offsets = [0, 96], sizes = [8, 32], strides = [1, 1]} : vector<8x128xf32> to vector<8x32xf32>
    %140 = vector.extract_strided_slice %136 {offsets = [0, 64], sizes = [8, 32], strides = [1, 1]} : vector<8x128xf32> to vector<8x32xf32>
    %141 = arith.mulf %138, %79 : vector<8x32xf32>
    %142 = arith.mulf %137, %140 : vector<8x32xf32>
    %143 = arith.addf %141, %142 : vector<8x32xf32>
    %144 = math.tanh %143 : vector<8x32xf32>
    %145 = arith.mulf %139, %144 : vector<8x32xf32>
    %146 = tpu.concatenate %104, %18 in 1 : vector<8x32xf32>, vector<8x32xf32> -> vector<8x64xf32>
    %c2_50 = arith.constant 2 : index
    %c0_51 = arith.constant 0 : index
    %c0_52 = arith.constant 0 : index
    %147 = vector.load %arg5[%c2_50, %c0_51, %c0_52] : memref<3x64x128xf32, #tpu.memory_space<vmem>>, vector<1x64x128xf32>
    %148 = vector.shape_cast %147 : vector<1x64x128xf32> to vector<64x128xf32>
    %cst_53 = arith.constant dense<0.000000e+00> : vector<8x128xf32>
    %149 = tpu.matmul %146, %148, %cst_53 {dimension_numbers = #tpu.dot_dimension_numbers<[1], [0], [0], [1], [0, 0, 1, 1], [], []>} : vector<8x64xf32>, vector<64x128xf32>, vector<8x128xf32> -> vector<8x128xf32>
    %c3 = arith.constant 3 : index
    %c0_54 = arith.constant 0 : index
    %c0_55 = arith.constant 0 : index
    %150 = vector.load %arg6[%c3, %c0_54, %c0_55] : memref<4x1x128xf32, #tpu.memory_space<vmem>>, vector<1x1x128xf32>
    %151 = vector.shape_cast %150 : vector<1x1x128xf32> to vector<1x128xf32>
    %152 = vector.broadcast %151 : vector<1x128xf32> to vector<8x128xf32>
    %153 = arith.addf %149, %152 : vector<8x128xf32>
    %154 = arith.negf %153 : vector<8x128xf32>
    %155 = math.exp %154 : vector<8x128xf32>
    %cst_56 = arith.constant 1.000000e+00 : f32
    %156 = vector.broadcast %cst_56 : f32 to vector<8x128xf32>
    %157 = arith.addf %156, %155 : vector<8x128xf32>
    %158 = arith.divf %156, %157 : vector<8x128xf32>
    %159 = math.tanh %153 : vector<8x128xf32>
    %160 = vector.extract_strided_slice %158 {offsets = [0, 0], sizes = [8, 32], strides = [1, 1]} : vector<8x128xf32> to vector<8x32xf32>
    %161 = vector.extract_strided_slice %158 {offsets = [0, 32], sizes = [8, 32], strides = [1, 1]} : vector<8x128xf32> to vector<8x32xf32>
    %162 = vector.extract_strided_slice %158 {offsets = [0, 96], sizes = [8, 32], strides = [1, 1]} : vector<8x128xf32> to vector<8x32xf32>
    %163 = vector.extract_strided_slice %159 {offsets = [0, 64], sizes = [8, 32], strides = [1, 1]} : vector<8x128xf32> to vector<8x32xf32>
    %164 = arith.mulf %161, %22 : vector<8x32xf32>
    %165 = arith.mulf %160, %163 : vector<8x32xf32>
    %166 = arith.addf %164, %165 : vector<8x32xf32>
    %167 = math.tanh %166 : vector<8x32xf32>
    %168 = arith.mulf %162, %167 : vector<8x32xf32>
    %169 = tpu.concatenate %127, %104 in 1 : vector<8x32xf32>, vector<8x32xf32> -> vector<8x64xf32>
    %c1_57 = arith.constant 1 : index
    %c0_58 = arith.constant 0 : index
    %c0_59 = arith.constant 0 : index
    %170 = vector.load %arg5[%c1_57, %c0_58, %c0_59] : memref<3x64x128xf32, #tpu.memory_space<vmem>>, vector<1x64x128xf32>
    %171 = vector.shape_cast %170 : vector<1x64x128xf32> to vector<64x128xf32>
    %cst_60 = arith.constant dense<0.000000e+00> : vector<8x128xf32>
    %172 = tpu.matmul %169, %171, %cst_60 {dimension_numbers = #tpu.dot_dimension_numbers<[1], [0], [0], [1], [0, 0, 1, 1], [], []>} : vector<8x64xf32>, vector<64x128xf32>, vector<8x128xf32> -> vector<8x128xf32>
    %c2_61 = arith.constant 2 : index
    %c0_62 = arith.constant 0 : index
    %c0_63 = arith.constant 0 : index
    %173 = vector.load %arg6[%c2_61, %c0_62, %c0_63] : memref<4x1x128xf32, #tpu.memory_space<vmem>>, vector<1x1x128xf32>
    %174 = vector.shape_cast %173 : vector<1x1x128xf32> to vector<1x128xf32>
    %175 = vector.broadcast %174 : vector<1x128xf32> to vector<8x128xf32>
    %176 = arith.addf %172, %175 : vector<8x128xf32>
    %177 = arith.negf %176 : vector<8x128xf32>
    %178 = math.exp %177 : vector<8x128xf32>
    %cst_64 = arith.constant 1.000000e+00 : f32
    %179 = vector.broadcast %cst_64 : f32 to vector<8x128xf32>
    %180 = arith.addf %179, %178 : vector<8x128xf32>
    %181 = arith.divf %179, %180 : vector<8x128xf32>
    %182 = math.tanh %176 : vector<8x128xf32>
    %183 = vector.extract_strided_slice %181 {offsets = [0, 0], sizes = [8, 32], strides = [1, 1]} : vector<8x128xf32> to vector<8x32xf32>
    %184 = vector.extract_strided_slice %181 {offsets = [0, 32], sizes = [8, 32], strides = [1, 1]} : vector<8x128xf32> to vector<8x32xf32>
    %185 = vector.extract_strided_slice %181 {offsets = [0, 96], sizes = [8, 32], strides = [1, 1]} : vector<8x128xf32> to vector<8x32xf32>
    %186 = vector.extract_strided_slice %182 {offsets = [0, 64], sizes = [8, 32], strides = [1, 1]} : vector<8x128xf32> to vector<8x32xf32>
    %187 = arith.mulf %184, %102 : vector<8x32xf32>
    %188 = arith.mulf %183, %186 : vector<8x32xf32>
    %189 = arith.addf %187, %188 : vector<8x32xf32>
    %190 = math.tanh %189 : vector<8x32xf32>
    %191 = arith.mulf %185, %190 : vector<8x32xf32>
    %192 = tpu.concatenate %145, %127 in 1 : vector<8x32xf32>, vector<8x32xf32> -> vector<8x64xf32>
    %c0_65 = arith.constant 0 : index
    %c0_66 = arith.constant 0 : index
    %c0_67 = arith.constant 0 : index
    %193 = vector.load %arg5[%c0_65, %c0_66, %c0_67] : memref<3x64x128xf32, #tpu.memory_space<vmem>>, vector<1x64x128xf32>
    %194 = vector.shape_cast %193 : vector<1x64x128xf32> to vector<64x128xf32>
    %cst_68 = arith.constant dense<0.000000e+00> : vector<8x128xf32>
    %195 = tpu.matmul %192, %194, %cst_68 {dimension_numbers = #tpu.dot_dimension_numbers<[1], [0], [0], [1], [0, 0, 1, 1], [], []>} : vector<8x64xf32>, vector<64x128xf32>, vector<8x128xf32> -> vector<8x128xf32>
    %c1_69 = arith.constant 1 : index
    %c0_70 = arith.constant 0 : index
    %c0_71 = arith.constant 0 : index
    %196 = vector.load %arg6[%c1_69, %c0_70, %c0_71] : memref<4x1x128xf32, #tpu.memory_space<vmem>>, vector<1x1x128xf32>
    %197 = vector.shape_cast %196 : vector<1x1x128xf32> to vector<1x128xf32>
    %198 = vector.broadcast %197 : vector<1x128xf32> to vector<8x128xf32>
    %199 = arith.addf %195, %198 : vector<8x128xf32>
    %200 = arith.negf %199 : vector<8x128xf32>
    %201 = math.exp %200 : vector<8x128xf32>
    %cst_72 = arith.constant 1.000000e+00 : f32
    %202 = vector.broadcast %cst_72 : f32 to vector<8x128xf32>
    %203 = arith.addf %202, %201 : vector<8x128xf32>
    %204 = arith.divf %202, %203 : vector<8x128xf32>
    %205 = math.tanh %199 : vector<8x128xf32>
    %206 = vector.extract_strided_slice %204 {offsets = [0, 0], sizes = [8, 32], strides = [1, 1]} : vector<8x128xf32> to vector<8x32xf32>
    %207 = vector.extract_strided_slice %204 {offsets = [0, 32], sizes = [8, 32], strides = [1, 1]} : vector<8x128xf32> to vector<8x32xf32>
    %208 = vector.extract_strided_slice %204 {offsets = [0, 96], sizes = [8, 32], strides = [1, 1]} : vector<8x128xf32> to vector<8x32xf32>
    %209 = vector.extract_strided_slice %205 {offsets = [0, 64], sizes = [8, 32], strides = [1, 1]} : vector<8x128xf32> to vector<8x32xf32>
    %210 = arith.mulf %207, %125 : vector<8x32xf32>
    %211 = arith.mulf %206, %209 : vector<8x32xf32>
    %212 = arith.addf %210, %211 : vector<8x32xf32>
    %213 = math.tanh %212 : vector<8x32xf32>
    %214 = arith.mulf %208, %213 : vector<8x32xf32>
    %215 = vector.extract_strided_slice %13 {offsets = [24, 0], sizes = [8, 128], strides = [1, 1]} : vector<64x128xf32> to vector<8x128xf32>
    %cst_73 = arith.constant dense<0.000000e+00> : vector<8x128xf32>
    %216 = tpu.matmul %145, %14, %cst_73 {dimension_numbers = #tpu.dot_dimension_numbers<[1], [0], [0], [1], [0, 0, 1, 1], [], []>} : vector<8x32xf32>, vector<32x128xf32>, vector<8x128xf32> -> vector<8x128xf32>
    %217 = arith.addf %215, %216 : vector<8x128xf32>
    %218 = arith.negf %217 : vector<8x128xf32>
    %219 = math.exp %218 : vector<8x128xf32>
    %cst_74 = arith.constant 1.000000e+00 : f32
    %220 = vector.broadcast %cst_74 : f32 to vector<8x128xf32>
    %221 = arith.addf %220, %219 : vector<8x128xf32>
    %222 = arith.divf %220, %221 : vector<8x128xf32>
    %223 = math.tanh %217 : vector<8x128xf32>
    %224 = vector.extract_strided_slice %222 {offsets = [0, 0], sizes = [8, 32], strides = [1, 1]} : vector<8x128xf32> to vector<8x32xf32>
    %225 = vector.extract_strided_slice %222 {offsets = [0, 32], sizes = [8, 32], strides = [1, 1]} : vector<8x128xf32> to vector<8x32xf32>
    %226 = vector.extract_strided_slice %222 {offsets = [0, 96], sizes = [8, 32], strides = [1, 1]} : vector<8x128xf32> to vector<8x32xf32>
    %227 = vector.extract_strided_slice %223 {offsets = [0, 64], sizes = [8, 32], strides = [1, 1]} : vector<8x128xf32> to vector<8x32xf32>
    %228 = arith.mulf %225, %143 : vector<8x32xf32>
    %229 = arith.mulf %224, %227 : vector<8x32xf32>
    %230 = arith.addf %228, %229 : vector<8x32xf32>
    %231 = math.tanh %230 : vector<8x32xf32>
    %232 = arith.mulf %226, %231 : vector<8x32xf32>
    %233 = tpu.concatenate %191, %168 in 1 : vector<8x32xf32>, vector<8x32xf32> -> vector<8x64xf32>
    %c2_75 = arith.constant 2 : index
    %c0_76 = arith.constant 0 : index
    %c0_77 = arith.constant 0 : index
    %234 = vector.load %arg5[%c2_75, %c0_76, %c0_77] : memref<3x64x128xf32, #tpu.memory_space<vmem>>, vector<1x64x128xf32>
    %235 = vector.shape_cast %234 : vector<1x64x128xf32> to vector<64x128xf32>
    %cst_78 = arith.constant dense<0.000000e+00> : vector<8x128xf32>
    %236 = tpu.matmul %233, %235, %cst_78 {dimension_numbers = #tpu.dot_dimension_numbers<[1], [0], [0], [1], [0, 0, 1, 1], [], []>} : vector<8x64xf32>, vector<64x128xf32>, vector<8x128xf32> -> vector<8x128xf32>
    %c3_79 = arith.constant 3 : index
    %c0_80 = arith.constant 0 : index
    %c0_81 = arith.constant 0 : index
    %237 = vector.load %arg6[%c3_79, %c0_80, %c0_81] : memref<4x1x128xf32, #tpu.memory_space<vmem>>, vector<1x1x128xf32>
    %238 = vector.shape_cast %237 : vector<1x1x128xf32> to vector<1x128xf32>
    %239 = vector.broadcast %238 : vector<1x128xf32> to vector<8x128xf32>
    %240 = arith.addf %236, %239 : vector<8x128xf32>
    %241 = arith.negf %240 : vector<8x128xf32>
    %242 = math.exp %241 : vector<8x128xf32>
    %cst_82 = arith.constant 1.000000e+00 : f32
    %243 = vector.broadcast %cst_82 : f32 to vector<8x128xf32>
    %244 = arith.addf %243, %242 : vector<8x128xf32>
    %245 = arith.divf %243, %244 : vector<8x128xf32>
    %246 = math.tanh %240 : vector<8x128xf32>
    %247 = vector.extract_strided_slice %245 {offsets = [0, 0], sizes = [8, 32], strides = [1, 1]} : vector<8x128xf32> to vector<8x32xf32>
    %248 = vector.extract_strided_slice %245 {offsets = [0, 32], sizes = [8, 32], strides = [1, 1]} : vector<8x128xf32> to vector<8x32xf32>
    %249 = vector.extract_strided_slice %245 {offsets = [0, 96], sizes = [8, 32], strides = [1, 1]} : vector<8x128xf32> to vector<8x32xf32>
    %250 = vector.extract_strided_slice %246 {offsets = [0, 64], sizes = [8, 32], strides = [1, 1]} : vector<8x128xf32> to vector<8x32xf32>
    %251 = arith.mulf %248, %166 : vector<8x32xf32>
    %252 = arith.mulf %247, %250 : vector<8x32xf32>
    %253 = arith.addf %251, %252 : vector<8x32xf32>
    %254 = math.tanh %253 : vector<8x32xf32>
    %255 = arith.mulf %249, %254 : vector<8x32xf32>
    %256 = tpu.concatenate %214, %191 in 1 : vector<8x32xf32>, vector<8x32xf32> -> vector<8x64xf32>
    %c1_83 = arith.constant 1 : index
    %c0_84 = arith.constant 0 : index
    %c0_85 = arith.constant 0 : index
    %257 = vector.load %arg5[%c1_83, %c0_84, %c0_85] : memref<3x64x128xf32, #tpu.memory_space<vmem>>, vector<1x64x128xf32>
    %258 = vector.shape_cast %257 : vector<1x64x128xf32> to vector<64x128xf32>
    %cst_86 = arith.constant dense<0.000000e+00> : vector<8x128xf32>
    %259 = tpu.matmul %256, %258, %cst_86 {dimension_numbers = #tpu.dot_dimension_numbers<[1], [0], [0], [1], [0, 0, 1, 1], [], []>} : vector<8x64xf32>, vector<64x128xf32>, vector<8x128xf32> -> vector<8x128xf32>
    %c2_87 = arith.constant 2 : index
    %c0_88 = arith.constant 0 : index
    %c0_89 = arith.constant 0 : index
    %260 = vector.load %arg6[%c2_87, %c0_88, %c0_89] : memref<4x1x128xf32, #tpu.memory_space<vmem>>, vector<1x1x128xf32>
    %261 = vector.shape_cast %260 : vector<1x1x128xf32> to vector<1x128xf32>
    %262 = vector.broadcast %261 : vector<1x128xf32> to vector<8x128xf32>
    %263 = arith.addf %259, %262 : vector<8x128xf32>
    %264 = arith.negf %263 : vector<8x128xf32>
    %265 = math.exp %264 : vector<8x128xf32>
    %cst_90 = arith.constant 1.000000e+00 : f32
    %266 = vector.broadcast %cst_90 : f32 to vector<8x128xf32>
    %267 = arith.addf %266, %265 : vector<8x128xf32>
    %268 = arith.divf %266, %267 : vector<8x128xf32>
    %269 = math.tanh %263 : vector<8x128xf32>
    %270 = vector.extract_strided_slice %268 {offsets = [0, 0], sizes = [8, 32], strides = [1, 1]} : vector<8x128xf32> to vector<8x32xf32>
    %271 = vector.extract_strided_slice %268 {offsets = [0, 32], sizes = [8, 32], strides = [1, 1]} : vector<8x128xf32> to vector<8x32xf32>
    %272 = vector.extract_strided_slice %268 {offsets = [0, 96], sizes = [8, 32], strides = [1, 1]} : vector<8x128xf32> to vector<8x32xf32>
    %273 = vector.extract_strided_slice %269 {offsets = [0, 64], sizes = [8, 32], strides = [1, 1]} : vector<8x128xf32> to vector<8x32xf32>
    %274 = arith.mulf %271, %189 : vector<8x32xf32>
    %275 = arith.mulf %270, %273 : vector<8x32xf32>
    %276 = arith.addf %274, %275 : vector<8x32xf32>
    %277 = math.tanh %276 : vector<8x32xf32>
    %278 = arith.mulf %272, %277 : vector<8x32xf32>
    %279 = tpu.concatenate %232, %214 in 1 : vector<8x32xf32>, vector<8x32xf32> -> vector<8x64xf32>
    %c0_91 = arith.constant 0 : index
    %c0_92 = arith.constant 0 : index
    %c0_93 = arith.constant 0 : index
    %280 = vector.load %arg5[%c0_91, %c0_92, %c0_93] : memref<3x64x128xf32, #tpu.memory_space<vmem>>, vector<1x64x128xf32>
    %281 = vector.shape_cast %280 : vector<1x64x128xf32> to vector<64x128xf32>
    %cst_94 = arith.constant dense<0.000000e+00> : vector<8x128xf32>
    %282 = tpu.matmul %279, %281, %cst_94 {dimension_numbers = #tpu.dot_dimension_numbers<[1], [0], [0], [1], [0, 0, 1, 1], [], []>} : vector<8x64xf32>, vector<64x128xf32>, vector<8x128xf32> -> vector<8x128xf32>
    %c1_95 = arith.constant 1 : index
    %c0_96 = arith.constant 0 : index
    %c0_97 = arith.constant 0 : index
    %283 = vector.load %arg6[%c1_95, %c0_96, %c0_97] : memref<4x1x128xf32, #tpu.memory_space<vmem>>, vector<1x1x128xf32>
    %284 = vector.shape_cast %283 : vector<1x1x128xf32> to vector<1x128xf32>
    %285 = vector.broadcast %284 : vector<1x128xf32> to vector<8x128xf32>
    %286 = arith.addf %282, %285 : vector<8x128xf32>
    %287 = arith.negf %286 : vector<8x128xf32>
    %288 = math.exp %287 : vector<8x128xf32>
    %cst_98 = arith.constant 1.000000e+00 : f32
    %289 = vector.broadcast %cst_98 : f32 to vector<8x128xf32>
    %290 = arith.addf %289, %288 : vector<8x128xf32>
    %291 = arith.divf %289, %290 : vector<8x128xf32>
    %292 = math.tanh %286 : vector<8x128xf32>
    %293 = vector.extract_strided_slice %291 {offsets = [0, 0], sizes = [8, 32], strides = [1, 1]} : vector<8x128xf32> to vector<8x32xf32>
    %294 = vector.extract_strided_slice %291 {offsets = [0, 32], sizes = [8, 32], strides = [1, 1]} : vector<8x128xf32> to vector<8x32xf32>
    %295 = vector.extract_strided_slice %291 {offsets = [0, 96], sizes = [8, 32], strides = [1, 1]} : vector<8x128xf32> to vector<8x32xf32>
    %296 = vector.extract_strided_slice %292 {offsets = [0, 64], sizes = [8, 32], strides = [1, 1]} : vector<8x128xf32> to vector<8x32xf32>
    %297 = arith.mulf %294, %212 : vector<8x32xf32>
    %298 = arith.mulf %293, %296 : vector<8x32xf32>
    %299 = arith.addf %297, %298 : vector<8x32xf32>
    %300 = math.tanh %299 : vector<8x32xf32>
    %301 = arith.mulf %295, %300 : vector<8x32xf32>
    %302 = vector.extract_strided_slice %13 {offsets = [32, 0], sizes = [8, 128], strides = [1, 1]} : vector<64x128xf32> to vector<8x128xf32>
    %cst_99 = arith.constant dense<0.000000e+00> : vector<8x128xf32>
    %303 = tpu.matmul %232, %14, %cst_99 {dimension_numbers = #tpu.dot_dimension_numbers<[1], [0], [0], [1], [0, 0, 1, 1], [], []>} : vector<8x32xf32>, vector<32x128xf32>, vector<8x128xf32> -> vector<8x128xf32>
    %304 = arith.addf %302, %303 : vector<8x128xf32>
    %305 = arith.negf %304 : vector<8x128xf32>
    %306 = math.exp %305 : vector<8x128xf32>
    %cst_100 = arith.constant 1.000000e+00 : f32
    %307 = vector.broadcast %cst_100 : f32 to vector<8x128xf32>
    %308 = arith.addf %307, %306 : vector<8x128xf32>
    %309 = arith.divf %307, %308 : vector<8x128xf32>
    %310 = math.tanh %304 : vector<8x128xf32>
    %311 = vector.extract_strided_slice %309 {offsets = [0, 0], sizes = [8, 32], strides = [1, 1]} : vector<8x128xf32> to vector<8x32xf32>
    %312 = vector.extract_strided_slice %309 {offsets = [0, 32], sizes = [8, 32], strides = [1, 1]} : vector<8x128xf32> to vector<8x32xf32>
    %313 = vector.extract_strided_slice %309 {offsets = [0, 96], sizes = [8, 32], strides = [1, 1]} : vector<8x128xf32> to vector<8x32xf32>
    %314 = vector.extract_strided_slice %310 {offsets = [0, 64], sizes = [8, 32], strides = [1, 1]} : vector<8x128xf32> to vector<8x32xf32>
    %315 = arith.mulf %312, %230 : vector<8x32xf32>
    %316 = arith.mulf %311, %314 : vector<8x32xf32>
    %317 = arith.addf %315, %316 : vector<8x32xf32>
    %318 = math.tanh %317 : vector<8x32xf32>
    %319 = arith.mulf %313, %318 : vector<8x32xf32>
    %320 = tpu.concatenate %278, %255 in 1 : vector<8x32xf32>, vector<8x32xf32> -> vector<8x64xf32>
    %c2_101 = arith.constant 2 : index
    %c0_102 = arith.constant 0 : index
    %c0_103 = arith.constant 0 : index
    %321 = vector.load %arg5[%c2_101, %c0_102, %c0_103] : memref<3x64x128xf32, #tpu.memory_space<vmem>>, vector<1x64x128xf32>
    %322 = vector.shape_cast %321 : vector<1x64x128xf32> to vector<64x128xf32>
    %cst_104 = arith.constant dense<0.000000e+00> : vector<8x128xf32>
    %323 = tpu.matmul %320, %322, %cst_104 {dimension_numbers = #tpu.dot_dimension_numbers<[1], [0], [0], [1], [0, 0, 1, 1], [], []>} : vector<8x64xf32>, vector<64x128xf32>, vector<8x128xf32> -> vector<8x128xf32>
    %c3_105 = arith.constant 3 : index
    %c0_106 = arith.constant 0 : index
    %c0_107 = arith.constant 0 : index
    %324 = vector.load %arg6[%c3_105, %c0_106, %c0_107] : memref<4x1x128xf32, #tpu.memory_space<vmem>>, vector<1x1x128xf32>
    %325 = vector.shape_cast %324 : vector<1x1x128xf32> to vector<1x128xf32>
    %326 = vector.broadcast %325 : vector<1x128xf32> to vector<8x128xf32>
    %327 = arith.addf %323, %326 : vector<8x128xf32>
    %328 = arith.negf %327 : vector<8x128xf32>
    %329 = math.exp %328 : vector<8x128xf32>
    %cst_108 = arith.constant 1.000000e+00 : f32
    %330 = vector.broadcast %cst_108 : f32 to vector<8x128xf32>
    %331 = arith.addf %330, %329 : vector<8x128xf32>
    %332 = arith.divf %330, %331 : vector<8x128xf32>
    %333 = math.tanh %327 : vector<8x128xf32>
    %334 = vector.extract_strided_slice %332 {offsets = [0, 0], sizes = [8, 32], strides = [1, 1]} : vector<8x128xf32> to vector<8x32xf32>
    %335 = vector.extract_strided_slice %332 {offsets = [0, 32], sizes = [8, 32], strides = [1, 1]} : vector<8x128xf32> to vector<8x32xf32>
    %336 = vector.extract_strided_slice %332 {offsets = [0, 96], sizes = [8, 32], strides = [1, 1]} : vector<8x128xf32> to vector<8x32xf32>
    %337 = vector.extract_strided_slice %333 {offsets = [0, 64], sizes = [8, 32], strides = [1, 1]} : vector<8x128xf32> to vector<8x32xf32>
    %338 = arith.mulf %335, %253 : vector<8x32xf32>
    %339 = arith.mulf %334, %337 : vector<8x32xf32>
    %340 = arith.addf %338, %339 : vector<8x32xf32>
    %341 = math.tanh %340 : vector<8x32xf32>
    %342 = arith.mulf %336, %341 : vector<8x32xf32>
    %343 = tpu.concatenate %301, %278 in 1 : vector<8x32xf32>, vector<8x32xf32> -> vector<8x64xf32>
    %c1_109 = arith.constant 1 : index
    %c0_110 = arith.constant 0 : index
    %c0_111 = arith.constant 0 : index
    %344 = vector.load %arg5[%c1_109, %c0_110, %c0_111] : memref<3x64x128xf32, #tpu.memory_space<vmem>>, vector<1x64x128xf32>
    %345 = vector.shape_cast %344 : vector<1x64x128xf32> to vector<64x128xf32>
    %cst_112 = arith.constant dense<0.000000e+00> : vector<8x128xf32>
    %346 = tpu.matmul %343, %345, %cst_112 {dimension_numbers = #tpu.dot_dimension_numbers<[1], [0], [0], [1], [0, 0, 1, 1], [], []>} : vector<8x64xf32>, vector<64x128xf32>, vector<8x128xf32> -> vector<8x128xf32>
    %c2_113 = arith.constant 2 : index
    %c0_114 = arith.constant 0 : index
    %c0_115 = arith.constant 0 : index
    %347 = vector.load %arg6[%c2_113, %c0_114, %c0_115] : memref<4x1x128xf32, #tpu.memory_space<vmem>>, vector<1x1x128xf32>
    %348 = vector.shape_cast %347 : vector<1x1x128xf32> to vector<1x128xf32>
    %349 = vector.broadcast %348 : vector<1x128xf32> to vector<8x128xf32>
    %350 = arith.addf %346, %349 : vector<8x128xf32>
    %351 = arith.negf %350 : vector<8x128xf32>
    %352 = math.exp %351 : vector<8x128xf32>
    %cst_116 = arith.constant 1.000000e+00 : f32
    %353 = vector.broadcast %cst_116 : f32 to vector<8x128xf32>
    %354 = arith.addf %353, %352 : vector<8x128xf32>
    %355 = arith.divf %353, %354 : vector<8x128xf32>
    %356 = math.tanh %350 : vector<8x128xf32>
    %357 = vector.extract_strided_slice %355 {offsets = [0, 0], sizes = [8, 32], strides = [1, 1]} : vector<8x128xf32> to vector<8x32xf32>
    %358 = vector.extract_strided_slice %355 {offsets = [0, 32], sizes = [8, 32], strides = [1, 1]} : vector<8x128xf32> to vector<8x32xf32>
    %359 = vector.extract_strided_slice %355 {offsets = [0, 96], sizes = [8, 32], strides = [1, 1]} : vector<8x128xf32> to vector<8x32xf32>
    %360 = vector.extract_strided_slice %356 {offsets = [0, 64], sizes = [8, 32], strides = [1, 1]} : vector<8x128xf32> to vector<8x32xf32>
    %361 = arith.mulf %358, %276 : vector<8x32xf32>
    %362 = arith.mulf %357, %360 : vector<8x32xf32>
    %363 = arith.addf %361, %362 : vector<8x32xf32>
    %364 = math.tanh %363 : vector<8x32xf32>
    %365 = arith.mulf %359, %364 : vector<8x32xf32>
    %366 = tpu.concatenate %319, %301 in 1 : vector<8x32xf32>, vector<8x32xf32> -> vector<8x64xf32>
    %c0_117 = arith.constant 0 : index
    %c0_118 = arith.constant 0 : index
    %c0_119 = arith.constant 0 : index
    %367 = vector.load %arg5[%c0_117, %c0_118, %c0_119] : memref<3x64x128xf32, #tpu.memory_space<vmem>>, vector<1x64x128xf32>
    %368 = vector.shape_cast %367 : vector<1x64x128xf32> to vector<64x128xf32>
    %cst_120 = arith.constant dense<0.000000e+00> : vector<8x128xf32>
    %369 = tpu.matmul %366, %368, %cst_120 {dimension_numbers = #tpu.dot_dimension_numbers<[1], [0], [0], [1], [0, 0, 1, 1], [], []>} : vector<8x64xf32>, vector<64x128xf32>, vector<8x128xf32> -> vector<8x128xf32>
    %c1_121 = arith.constant 1 : index
    %c0_122 = arith.constant 0 : index
    %c0_123 = arith.constant 0 : index
    %370 = vector.load %arg6[%c1_121, %c0_122, %c0_123] : memref<4x1x128xf32, #tpu.memory_space<vmem>>, vector<1x1x128xf32>
    %371 = vector.shape_cast %370 : vector<1x1x128xf32> to vector<1x128xf32>
    %372 = vector.broadcast %371 : vector<1x128xf32> to vector<8x128xf32>
    %373 = arith.addf %369, %372 : vector<8x128xf32>
    %374 = arith.negf %373 : vector<8x128xf32>
    %375 = math.exp %374 : vector<8x128xf32>
    %cst_124 = arith.constant 1.000000e+00 : f32
    %376 = vector.broadcast %cst_124 : f32 to vector<8x128xf32>
    %377 = arith.addf %376, %375 : vector<8x128xf32>
    %378 = arith.divf %376, %377 : vector<8x128xf32>
    %379 = math.tanh %373 : vector<8x128xf32>
    %380 = vector.extract_strided_slice %378 {offsets = [0, 0], sizes = [8, 32], strides = [1, 1]} : vector<8x128xf32> to vector<8x32xf32>
    %381 = vector.extract_strided_slice %378 {offsets = [0, 32], sizes = [8, 32], strides = [1, 1]} : vector<8x128xf32> to vector<8x32xf32>
    %382 = vector.extract_strided_slice %378 {offsets = [0, 96], sizes = [8, 32], strides = [1, 1]} : vector<8x128xf32> to vector<8x32xf32>
    %383 = vector.extract_strided_slice %379 {offsets = [0, 64], sizes = [8, 32], strides = [1, 1]} : vector<8x128xf32> to vector<8x32xf32>
    %384 = arith.mulf %381, %299 : vector<8x32xf32>
    %385 = arith.mulf %380, %383 : vector<8x32xf32>
    %386 = arith.addf %384, %385 : vector<8x32xf32>
    %387 = math.tanh %386 : vector<8x32xf32>
    %388 = arith.mulf %382, %387 : vector<8x32xf32>
    %389 = vector.extract_strided_slice %13 {offsets = [40, 0], sizes = [8, 128], strides = [1, 1]} : vector<64x128xf32> to vector<8x128xf32>
    %cst_125 = arith.constant dense<0.000000e+00> : vector<8x128xf32>
    %390 = tpu.matmul %319, %14, %cst_125 {dimension_numbers = #tpu.dot_dimension_numbers<[1], [0], [0], [1], [0, 0, 1, 1], [], []>} : vector<8x32xf32>, vector<32x128xf32>, vector<8x128xf32> -> vector<8x128xf32>
    %391 = arith.addf %389, %390 : vector<8x128xf32>
    %392 = arith.negf %391 : vector<8x128xf32>
    %393 = math.exp %392 : vector<8x128xf32>
    %cst_126 = arith.constant 1.000000e+00 : f32
    %394 = vector.broadcast %cst_126 : f32 to vector<8x128xf32>
    %395 = arith.addf %394, %393 : vector<8x128xf32>
    %396 = arith.divf %394, %395 : vector<8x128xf32>
    %397 = math.tanh %391 : vector<8x128xf32>
    %398 = vector.extract_strided_slice %396 {offsets = [0, 0], sizes = [8, 32], strides = [1, 1]} : vector<8x128xf32> to vector<8x32xf32>
    %399 = vector.extract_strided_slice %396 {offsets = [0, 32], sizes = [8, 32], strides = [1, 1]} : vector<8x128xf32> to vector<8x32xf32>
    %400 = vector.extract_strided_slice %396 {offsets = [0, 96], sizes = [8, 32], strides = [1, 1]} : vector<8x128xf32> to vector<8x32xf32>
    %401 = vector.extract_strided_slice %397 {offsets = [0, 64], sizes = [8, 32], strides = [1, 1]} : vector<8x128xf32> to vector<8x32xf32>
    %402 = arith.mulf %399, %317 : vector<8x32xf32>
    %403 = arith.mulf %398, %401 : vector<8x32xf32>
    %404 = arith.addf %402, %403 : vector<8x32xf32>
    %405 = math.tanh %404 : vector<8x32xf32>
    %406 = arith.mulf %400, %405 : vector<8x32xf32>
    %407 = tpu.concatenate %365, %342 in 1 : vector<8x32xf32>, vector<8x32xf32> -> vector<8x64xf32>
    %c2_127 = arith.constant 2 : index
    %c0_128 = arith.constant 0 : index
    %c0_129 = arith.constant 0 : index
    %408 = vector.load %arg5[%c2_127, %c0_128, %c0_129] : memref<3x64x128xf32, #tpu.memory_space<vmem>>, vector<1x64x128xf32>
    %409 = vector.shape_cast %408 : vector<1x64x128xf32> to vector<64x128xf32>
    %cst_130 = arith.constant dense<0.000000e+00> : vector<8x128xf32>
    %410 = tpu.matmul %407, %409, %cst_130 {dimension_numbers = #tpu.dot_dimension_numbers<[1], [0], [0], [1], [0, 0, 1, 1], [], []>} : vector<8x64xf32>, vector<64x128xf32>, vector<8x128xf32> -> vector<8x128xf32>
    %c3_131 = arith.constant 3 : index
    %c0_132 = arith.constant 0 : index
    %c0_133 = arith.constant 0 : index
    %411 = vector.load %arg6[%c3_131, %c0_132, %c0_133] : memref<4x1x128xf32, #tpu.memory_space<vmem>>, vector<1x1x128xf32>
    %412 = vector.shape_cast %411 : vector<1x1x128xf32> to vector<1x128xf32>
    %413 = vector.broadcast %412 : vector<1x128xf32> to vector<8x128xf32>
    %414 = arith.addf %410, %413 : vector<8x128xf32>
    %415 = arith.negf %414 : vector<8x128xf32>
    %416 = math.exp %415 : vector<8x128xf32>
    %cst_134 = arith.constant 1.000000e+00 : f32
    %417 = vector.broadcast %cst_134 : f32 to vector<8x128xf32>
    %418 = arith.addf %417, %416 : vector<8x128xf32>
    %419 = arith.divf %417, %418 : vector<8x128xf32>
    %420 = math.tanh %414 : vector<8x128xf32>
    %421 = vector.extract_strided_slice %419 {offsets = [0, 0], sizes = [8, 32], strides = [1, 1]} : vector<8x128xf32> to vector<8x32xf32>
    %422 = vector.extract_strided_slice %419 {offsets = [0, 32], sizes = [8, 32], strides = [1, 1]} : vector<8x128xf32> to vector<8x32xf32>
    %423 = vector.extract_strided_slice %419 {offsets = [0, 96], sizes = [8, 32], strides = [1, 1]} : vector<8x128xf32> to vector<8x32xf32>
    %424 = vector.extract_strided_slice %420 {offsets = [0, 64], sizes = [8, 32], strides = [1, 1]} : vector<8x128xf32> to vector<8x32xf32>
    %425 = arith.mulf %422, %340 : vector<8x32xf32>
    %426 = arith.mulf %421, %424 : vector<8x32xf32>
    %427 = arith.addf %425, %426 : vector<8x32xf32>
    %428 = math.tanh %427 : vector<8x32xf32>
    %429 = arith.mulf %423, %428 : vector<8x32xf32>
    %430 = tpu.concatenate %388, %365 in 1 : vector<8x32xf32>, vector<8x32xf32> -> vector<8x64xf32>
    %c1_135 = arith.constant 1 : index
    %c0_136 = arith.constant 0 : index
    %c0_137 = arith.constant 0 : index
    %431 = vector.load %arg5[%c1_135, %c0_136, %c0_137] : memref<3x64x128xf32, #tpu.memory_space<vmem>>, vector<1x64x128xf32>
    %432 = vector.shape_cast %431 : vector<1x64x128xf32> to vector<64x128xf32>
    %cst_138 = arith.constant dense<0.000000e+00> : vector<8x128xf32>
    %433 = tpu.matmul %430, %432, %cst_138 {dimension_numbers = #tpu.dot_dimension_numbers<[1], [0], [0], [1], [0, 0, 1, 1], [], []>} : vector<8x64xf32>, vector<64x128xf32>, vector<8x128xf32> -> vector<8x128xf32>
    %c2_139 = arith.constant 2 : index
    %c0_140 = arith.constant 0 : index
    %c0_141 = arith.constant 0 : index
    %434 = vector.load %arg6[%c2_139, %c0_140, %c0_141] : memref<4x1x128xf32, #tpu.memory_space<vmem>>, vector<1x1x128xf32>
    %435 = vector.shape_cast %434 : vector<1x1x128xf32> to vector<1x128xf32>
    %436 = vector.broadcast %435 : vector<1x128xf32> to vector<8x128xf32>
    %437 = arith.addf %433, %436 : vector<8x128xf32>
    %438 = arith.negf %437 : vector<8x128xf32>
    %439 = math.exp %438 : vector<8x128xf32>
    %cst_142 = arith.constant 1.000000e+00 : f32
    %440 = vector.broadcast %cst_142 : f32 to vector<8x128xf32>
    %441 = arith.addf %440, %439 : vector<8x128xf32>
    %442 = arith.divf %440, %441 : vector<8x128xf32>
    %443 = math.tanh %437 : vector<8x128xf32>
    %444 = vector.extract_strided_slice %442 {offsets = [0, 0], sizes = [8, 32], strides = [1, 1]} : vector<8x128xf32> to vector<8x32xf32>
    %445 = vector.extract_strided_slice %442 {offsets = [0, 32], sizes = [8, 32], strides = [1, 1]} : vector<8x128xf32> to vector<8x32xf32>
    %446 = vector.extract_strided_slice %442 {offsets = [0, 96], sizes = [8, 32], strides = [1, 1]} : vector<8x128xf32> to vector<8x32xf32>
    %447 = vector.extract_strided_slice %443 {offsets = [0, 64], sizes = [8, 32], strides = [1, 1]} : vector<8x128xf32> to vector<8x32xf32>
    %448 = arith.mulf %445, %363 : vector<8x32xf32>
    %449 = arith.mulf %444, %447 : vector<8x32xf32>
    %450 = arith.addf %448, %449 : vector<8x32xf32>
    %451 = math.tanh %450 : vector<8x32xf32>
    %452 = arith.mulf %446, %451 : vector<8x32xf32>
    %453 = tpu.concatenate %406, %388 in 1 : vector<8x32xf32>, vector<8x32xf32> -> vector<8x64xf32>
    %c0_143 = arith.constant 0 : index
    %c0_144 = arith.constant 0 : index
    %c0_145 = arith.constant 0 : index
    %454 = vector.load %arg5[%c0_143, %c0_144, %c0_145] : memref<3x64x128xf32, #tpu.memory_space<vmem>>, vector<1x64x128xf32>
    %455 = vector.shape_cast %454 : vector<1x64x128xf32> to vector<64x128xf32>
    %cst_146 = arith.constant dense<0.000000e+00> : vector<8x128xf32>
    %456 = tpu.matmul %453, %455, %cst_146 {dimension_numbers = #tpu.dot_dimension_numbers<[1], [0], [0], [1], [0, 0, 1, 1], [], []>} : vector<8x64xf32>, vector<64x128xf32>, vector<8x128xf32> -> vector<8x128xf32>
    %c1_147 = arith.constant 1 : index
    %c0_148 = arith.constant 0 : index
    %c0_149 = arith.constant 0 : index
    %457 = vector.load %arg6[%c1_147, %c0_148, %c0_149] : memref<4x1x128xf32, #tpu.memory_space<vmem>>, vector<1x1x128xf32>
    %458 = vector.shape_cast %457 : vector<1x1x128xf32> to vector<1x128xf32>
    %459 = vector.broadcast %458 : vector<1x128xf32> to vector<8x128xf32>
    %460 = arith.addf %456, %459 : vector<8x128xf32>
    %461 = arith.negf %460 : vector<8x128xf32>
    %462 = math.exp %461 : vector<8x128xf32>
    %cst_150 = arith.constant 1.000000e+00 : f32
    %463 = vector.broadcast %cst_150 : f32 to vector<8x128xf32>
    %464 = arith.addf %463, %462 : vector<8x128xf32>
    %465 = arith.divf %463, %464 : vector<8x128xf32>
    %466 = math.tanh %460 : vector<8x128xf32>
    %467 = vector.extract_strided_slice %465 {offsets = [0, 0], sizes = [8, 32], strides = [1, 1]} : vector<8x128xf32> to vector<8x32xf32>
    %468 = vector.extract_strided_slice %465 {offsets = [0, 32], sizes = [8, 32], strides = [1, 1]} : vector<8x128xf32> to vector<8x32xf32>
    %469 = vector.extract_strided_slice %465 {offsets = [0, 96], sizes = [8, 32], strides = [1, 1]} : vector<8x128xf32> to vector<8x32xf32>
    %470 = vector.extract_strided_slice %466 {offsets = [0, 64], sizes = [8, 32], strides = [1, 1]} : vector<8x128xf32> to vector<8x32xf32>
    %471 = arith.mulf %468, %386 : vector<8x32xf32>
    %472 = arith.mulf %467, %470 : vector<8x32xf32>
    %473 = arith.addf %471, %472 : vector<8x32xf32>
    %474 = math.tanh %473 : vector<8x32xf32>
    %475 = arith.mulf %469, %474 : vector<8x32xf32>
    %476 = vector.extract_strided_slice %13 {offsets = [48, 0], sizes = [8, 128], strides = [1, 1]} : vector<64x128xf32> to vector<8x128xf32>
    %cst_151 = arith.constant dense<0.000000e+00> : vector<8x128xf32>
    %477 = tpu.matmul %406, %14, %cst_151 {dimension_numbers = #tpu.dot_dimension_numbers<[1], [0], [0], [1], [0, 0, 1, 1], [], []>} : vector<8x32xf32>, vector<32x128xf32>, vector<8x128xf32> -> vector<8x128xf32>
    %478 = arith.addf %476, %477 : vector<8x128xf32>
    %479 = arith.negf %478 : vector<8x128xf32>
    %480 = math.exp %479 : vector<8x128xf32>
    %cst_152 = arith.constant 1.000000e+00 : f32
    %481 = vector.broadcast %cst_152 : f32 to vector<8x128xf32>
    %482 = arith.addf %481, %480 : vector<8x128xf32>
    %483 = arith.divf %481, %482 : vector<8x128xf32>
    %484 = math.tanh %478 : vector<8x128xf32>
    %485 = vector.extract_strided_slice %483 {offsets = [0, 0], sizes = [8, 32], strides = [1, 1]} : vector<8x128xf32> to vector<8x32xf32>
    %486 = vector.extract_strided_slice %483 {offsets = [0, 32], sizes = [8, 32], strides = [1, 1]} : vector<8x128xf32> to vector<8x32xf32>
    %487 = vector.extract_strided_slice %483 {offsets = [0, 96], sizes = [8, 32], strides = [1, 1]} : vector<8x128xf32> to vector<8x32xf32>
    %488 = vector.extract_strided_slice %484 {offsets = [0, 64], sizes = [8, 32], strides = [1, 1]} : vector<8x128xf32> to vector<8x32xf32>
    %489 = arith.mulf %486, %404 : vector<8x32xf32>
    %490 = arith.mulf %485, %488 : vector<8x32xf32>
    %491 = arith.addf %489, %490 : vector<8x32xf32>
    %492 = math.tanh %491 : vector<8x32xf32>
    %493 = arith.mulf %487, %492 : vector<8x32xf32>
    %494 = tpu.concatenate %452, %429 in 1 : vector<8x32xf32>, vector<8x32xf32> -> vector<8x64xf32>
    %c2_153 = arith.constant 2 : index
    %c0_154 = arith.constant 0 : index
    %c0_155 = arith.constant 0 : index
    %495 = vector.load %arg5[%c2_153, %c0_154, %c0_155] : memref<3x64x128xf32, #tpu.memory_space<vmem>>, vector<1x64x128xf32>
    %496 = vector.shape_cast %495 : vector<1x64x128xf32> to vector<64x128xf32>
    %cst_156 = arith.constant dense<0.000000e+00> : vector<8x128xf32>
    %497 = tpu.matmul %494, %496, %cst_156 {dimension_numbers = #tpu.dot_dimension_numbers<[1], [0], [0], [1], [0, 0, 1, 1], [], []>} : vector<8x64xf32>, vector<64x128xf32>, vector<8x128xf32> -> vector<8x128xf32>
    %c3_157 = arith.constant 3 : index
    %c0_158 = arith.constant 0 : index
    %c0_159 = arith.constant 0 : index
    %498 = vector.load %arg6[%c3_157, %c0_158, %c0_159] : memref<4x1x128xf32, #tpu.memory_space<vmem>>, vector<1x1x128xf32>
    %499 = vector.shape_cast %498 : vector<1x1x128xf32> to vector<1x128xf32>
    %500 = vector.broadcast %499 : vector<1x128xf32> to vector<8x128xf32>
    %501 = arith.addf %497, %500 : vector<8x128xf32>
    %502 = arith.negf %501 : vector<8x128xf32>
    %503 = math.exp %502 : vector<8x128xf32>
    %cst_160 = arith.constant 1.000000e+00 : f32
    %504 = vector.broadcast %cst_160 : f32 to vector<8x128xf32>
    %505 = arith.addf %504, %503 : vector<8x128xf32>
    %506 = arith.divf %504, %505 : vector<8x128xf32>
    %507 = math.tanh %501 : vector<8x128xf32>
    %508 = vector.extract_strided_slice %506 {offsets = [0, 0], sizes = [8, 32], strides = [1, 1]} : vector<8x128xf32> to vector<8x32xf32>
    %509 = vector.extract_strided_slice %506 {offsets = [0, 32], sizes = [8, 32], strides = [1, 1]} : vector<8x128xf32> to vector<8x32xf32>
    %510 = vector.extract_strided_slice %506 {offsets = [0, 96], sizes = [8, 32], strides = [1, 1]} : vector<8x128xf32> to vector<8x32xf32>
    %511 = vector.extract_strided_slice %507 {offsets = [0, 64], sizes = [8, 32], strides = [1, 1]} : vector<8x128xf32> to vector<8x32xf32>
    %512 = arith.mulf %509, %427 : vector<8x32xf32>
    %513 = arith.mulf %508, %511 : vector<8x32xf32>
    %514 = arith.addf %512, %513 : vector<8x32xf32>
    %515 = math.tanh %514 : vector<8x32xf32>
    %516 = arith.mulf %510, %515 : vector<8x32xf32>
    %517 = tpu.concatenate %475, %452 in 1 : vector<8x32xf32>, vector<8x32xf32> -> vector<8x64xf32>
    %c1_161 = arith.constant 1 : index
    %c0_162 = arith.constant 0 : index
    %c0_163 = arith.constant 0 : index
    %518 = vector.load %arg5[%c1_161, %c0_162, %c0_163] : memref<3x64x128xf32, #tpu.memory_space<vmem>>, vector<1x64x128xf32>
    %519 = vector.shape_cast %518 : vector<1x64x128xf32> to vector<64x128xf32>
    %cst_164 = arith.constant dense<0.000000e+00> : vector<8x128xf32>
    %520 = tpu.matmul %517, %519, %cst_164 {dimension_numbers = #tpu.dot_dimension_numbers<[1], [0], [0], [1], [0, 0, 1, 1], [], []>} : vector<8x64xf32>, vector<64x128xf32>, vector<8x128xf32> -> vector<8x128xf32>
    %c2_165 = arith.constant 2 : index
    %c0_166 = arith.constant 0 : index
    %c0_167 = arith.constant 0 : index
    %521 = vector.load %arg6[%c2_165, %c0_166, %c0_167] : memref<4x1x128xf32, #tpu.memory_space<vmem>>, vector<1x1x128xf32>
    %522 = vector.shape_cast %521 : vector<1x1x128xf32> to vector<1x128xf32>
    %523 = vector.broadcast %522 : vector<1x128xf32> to vector<8x128xf32>
    %524 = arith.addf %520, %523 : vector<8x128xf32>
    %525 = arith.negf %524 : vector<8x128xf32>
    %526 = math.exp %525 : vector<8x128xf32>
    %cst_168 = arith.constant 1.000000e+00 : f32
    %527 = vector.broadcast %cst_168 : f32 to vector<8x128xf32>
    %528 = arith.addf %527, %526 : vector<8x128xf32>
    %529 = arith.divf %527, %528 : vector<8x128xf32>
    %530 = math.tanh %524 : vector<8x128xf32>
    %531 = vector.extract_strided_slice %529 {offsets = [0, 0], sizes = [8, 32], strides = [1, 1]} : vector<8x128xf32> to vector<8x32xf32>
    %532 = vector.extract_strided_slice %529 {offsets = [0, 32], sizes = [8, 32], strides = [1, 1]} : vector<8x128xf32> to vector<8x32xf32>
    %533 = vector.extract_strided_slice %529 {offsets = [0, 96], sizes = [8, 32], strides = [1, 1]} : vector<8x128xf32> to vector<8x32xf32>
    %534 = vector.extract_strided_slice %530 {offsets = [0, 64], sizes = [8, 32], strides = [1, 1]} : vector<8x128xf32> to vector<8x32xf32>
    %535 = arith.mulf %532, %450 : vector<8x32xf32>
    %536 = arith.mulf %531, %534 : vector<8x32xf32>
    %537 = arith.addf %535, %536 : vector<8x32xf32>
    %538 = math.tanh %537 : vector<8x32xf32>
    %539 = arith.mulf %533, %538 : vector<8x32xf32>
    %540 = tpu.concatenate %493, %475 in 1 : vector<8x32xf32>, vector<8x32xf32> -> vector<8x64xf32>
    %c0_169 = arith.constant 0 : index
    %c0_170 = arith.constant 0 : index
    %c0_171 = arith.constant 0 : index
    %541 = vector.load %arg5[%c0_169, %c0_170, %c0_171] : memref<3x64x128xf32, #tpu.memory_space<vmem>>, vector<1x64x128xf32>
    %542 = vector.shape_cast %541 : vector<1x64x128xf32> to vector<64x128xf32>
    %cst_172 = arith.constant dense<0.000000e+00> : vector<8x128xf32>
    %543 = tpu.matmul %540, %542, %cst_172 {dimension_numbers = #tpu.dot_dimension_numbers<[1], [0], [0], [1], [0, 0, 1, 1], [], []>} : vector<8x64xf32>, vector<64x128xf32>, vector<8x128xf32> -> vector<8x128xf32>
    %c1_173 = arith.constant 1 : index
    %c0_174 = arith.constant 0 : index
    %c0_175 = arith.constant 0 : index
    %544 = vector.load %arg6[%c1_173, %c0_174, %c0_175] : memref<4x1x128xf32, #tpu.memory_space<vmem>>, vector<1x1x128xf32>
    %545 = vector.shape_cast %544 : vector<1x1x128xf32> to vector<1x128xf32>
    %546 = vector.broadcast %545 : vector<1x128xf32> to vector<8x128xf32>
    %547 = arith.addf %543, %546 : vector<8x128xf32>
    %548 = arith.negf %547 : vector<8x128xf32>
    %549 = math.exp %548 : vector<8x128xf32>
    %cst_176 = arith.constant 1.000000e+00 : f32
    %550 = vector.broadcast %cst_176 : f32 to vector<8x128xf32>
    %551 = arith.addf %550, %549 : vector<8x128xf32>
    %552 = arith.divf %550, %551 : vector<8x128xf32>
    %553 = math.tanh %547 : vector<8x128xf32>
    %554 = vector.extract_strided_slice %552 {offsets = [0, 0], sizes = [8, 32], strides = [1, 1]} : vector<8x128xf32> to vector<8x32xf32>
    %555 = vector.extract_strided_slice %552 {offsets = [0, 32], sizes = [8, 32], strides = [1, 1]} : vector<8x128xf32> to vector<8x32xf32>
    %556 = vector.extract_strided_slice %552 {offsets = [0, 96], sizes = [8, 32], strides = [1, 1]} : vector<8x128xf32> to vector<8x32xf32>
    %557 = vector.extract_strided_slice %553 {offsets = [0, 64], sizes = [8, 32], strides = [1, 1]} : vector<8x128xf32> to vector<8x32xf32>
    %558 = arith.mulf %555, %473 : vector<8x32xf32>
    %559 = arith.mulf %554, %557 : vector<8x32xf32>
    %560 = arith.addf %558, %559 : vector<8x32xf32>
    %561 = math.tanh %560 : vector<8x32xf32>
    %562 = arith.mulf %556, %561 : vector<8x32xf32>
    %563 = vector.extract_strided_slice %13 {offsets = [56, 0], sizes = [8, 128], strides = [1, 1]} : vector<64x128xf32> to vector<8x128xf32>
    %cst_177 = arith.constant dense<0.000000e+00> : vector<8x128xf32>
    %564 = tpu.matmul %493, %14, %cst_177 {dimension_numbers = #tpu.dot_dimension_numbers<[1], [0], [0], [1], [0, 0, 1, 1], [], []>} : vector<8x32xf32>, vector<32x128xf32>, vector<8x128xf32> -> vector<8x128xf32>
    %565 = arith.addf %563, %564 : vector<8x128xf32>
    %566 = arith.negf %565 : vector<8x128xf32>
    %567 = math.exp %566 : vector<8x128xf32>
    %cst_178 = arith.constant 1.000000e+00 : f32
    %568 = vector.broadcast %cst_178 : f32 to vector<8x128xf32>
    %569 = arith.addf %568, %567 : vector<8x128xf32>
    %570 = arith.divf %568, %569 : vector<8x128xf32>
    %571 = math.tanh %565 : vector<8x128xf32>
    %572 = vector.extract_strided_slice %570 {offsets = [0, 0], sizes = [8, 32], strides = [1, 1]} : vector<8x128xf32> to vector<8x32xf32>
    %573 = vector.extract_strided_slice %570 {offsets = [0, 32], sizes = [8, 32], strides = [1, 1]} : vector<8x128xf32> to vector<8x32xf32>
    %574 = vector.extract_strided_slice %570 {offsets = [0, 96], sizes = [8, 32], strides = [1, 1]} : vector<8x128xf32> to vector<8x32xf32>
    %575 = vector.extract_strided_slice %571 {offsets = [0, 64], sizes = [8, 32], strides = [1, 1]} : vector<8x128xf32> to vector<8x32xf32>
    %576 = arith.mulf %573, %491 : vector<8x32xf32>
    %577 = arith.mulf %572, %575 : vector<8x32xf32>
    %578 = arith.addf %576, %577 : vector<8x32xf32>
    %579 = math.tanh %578 : vector<8x32xf32>
    %580 = arith.mulf %574, %579 : vector<8x32xf32>
    %581 = tpu.concatenate %539, %516 in 1 : vector<8x32xf32>, vector<8x32xf32> -> vector<8x64xf32>
    %c2_179 = arith.constant 2 : index
    %c0_180 = arith.constant 0 : index
    %c0_181 = arith.constant 0 : index
    %582 = vector.load %arg5[%c2_179, %c0_180, %c0_181] : memref<3x64x128xf32, #tpu.memory_space<vmem>>, vector<1x64x128xf32>
    %583 = vector.shape_cast %582 : vector<1x64x128xf32> to vector<64x128xf32>
    %cst_182 = arith.constant dense<0.000000e+00> : vector<8x128xf32>
    %584 = tpu.matmul %581, %583, %cst_182 {dimension_numbers = #tpu.dot_dimension_numbers<[1], [0], [0], [1], [0, 0, 1, 1], [], []>} : vector<8x64xf32>, vector<64x128xf32>, vector<8x128xf32> -> vector<8x128xf32>
    %c3_183 = arith.constant 3 : index
    %c0_184 = arith.constant 0 : index
    %c0_185 = arith.constant 0 : index
    %585 = vector.load %arg6[%c3_183, %c0_184, %c0_185] : memref<4x1x128xf32, #tpu.memory_space<vmem>>, vector<1x1x128xf32>
    %586 = vector.shape_cast %585 : vector<1x1x128xf32> to vector<1x128xf32>
    %587 = vector.broadcast %586 : vector<1x128xf32> to vector<8x128xf32>
    %588 = arith.addf %584, %587 : vector<8x128xf32>
    %589 = arith.negf %588 : vector<8x128xf32>
    %590 = math.exp %589 : vector<8x128xf32>
    %cst_186 = arith.constant 1.000000e+00 : f32
    %591 = vector.broadcast %cst_186 : f32 to vector<8x128xf32>
    %592 = arith.addf %591, %590 : vector<8x128xf32>
    %593 = arith.divf %591, %592 : vector<8x128xf32>
    %594 = math.tanh %588 : vector<8x128xf32>
    %595 = vector.extract_strided_slice %593 {offsets = [0, 0], sizes = [8, 32], strides = [1, 1]} : vector<8x128xf32> to vector<8x32xf32>
    %596 = vector.extract_strided_slice %593 {offsets = [0, 32], sizes = [8, 32], strides = [1, 1]} : vector<8x128xf32> to vector<8x32xf32>
    %597 = vector.extract_strided_slice %593 {offsets = [0, 96], sizes = [8, 32], strides = [1, 1]} : vector<8x128xf32> to vector<8x32xf32>
    %598 = vector.extract_strided_slice %594 {offsets = [0, 64], sizes = [8, 32], strides = [1, 1]} : vector<8x128xf32> to vector<8x32xf32>
    %599 = arith.mulf %596, %514 : vector<8x32xf32>
    %600 = arith.mulf %595, %598 : vector<8x32xf32>
    %601 = arith.addf %599, %600 : vector<8x32xf32>
    %602 = math.tanh %601 : vector<8x32xf32>
    %603 = arith.mulf %597, %602 : vector<8x32xf32>
    %604 = tpu.concatenate %562, %539 in 1 : vector<8x32xf32>, vector<8x32xf32> -> vector<8x64xf32>
    %c1_187 = arith.constant 1 : index
    %c0_188 = arith.constant 0 : index
    %c0_189 = arith.constant 0 : index
    %605 = vector.load %arg5[%c1_187, %c0_188, %c0_189] : memref<3x64x128xf32, #tpu.memory_space<vmem>>, vector<1x64x128xf32>
    %606 = vector.shape_cast %605 : vector<1x64x128xf32> to vector<64x128xf32>
    %cst_190 = arith.constant dense<0.000000e+00> : vector<8x128xf32>
    %607 = tpu.matmul %604, %606, %cst_190 {dimension_numbers = #tpu.dot_dimension_numbers<[1], [0], [0], [1], [0, 0, 1, 1], [], []>} : vector<8x64xf32>, vector<64x128xf32>, vector<8x128xf32> -> vector<8x128xf32>
    %c2_191 = arith.constant 2 : index
    %c0_192 = arith.constant 0 : index
    %c0_193 = arith.constant 0 : index
    %608 = vector.load %arg6[%c2_191, %c0_192, %c0_193] : memref<4x1x128xf32, #tpu.memory_space<vmem>>, vector<1x1x128xf32>
    %609 = vector.shape_cast %608 : vector<1x1x128xf32> to vector<1x128xf32>
    %610 = vector.broadcast %609 : vector<1x128xf32> to vector<8x128xf32>
    %611 = arith.addf %607, %610 : vector<8x128xf32>
    %612 = arith.negf %611 : vector<8x128xf32>
    %613 = math.exp %612 : vector<8x128xf32>
    %cst_194 = arith.constant 1.000000e+00 : f32
    %614 = vector.broadcast %cst_194 : f32 to vector<8x128xf32>
    %615 = arith.addf %614, %613 : vector<8x128xf32>
    %616 = arith.divf %614, %615 : vector<8x128xf32>
    %617 = math.tanh %611 : vector<8x128xf32>
    %618 = vector.extract_strided_slice %616 {offsets = [0, 0], sizes = [8, 32], strides = [1, 1]} : vector<8x128xf32> to vector<8x32xf32>
    %619 = vector.extract_strided_slice %616 {offsets = [0, 32], sizes = [8, 32], strides = [1, 1]} : vector<8x128xf32> to vector<8x32xf32>
    %620 = vector.extract_strided_slice %616 {offsets = [0, 96], sizes = [8, 32], strides = [1, 1]} : vector<8x128xf32> to vector<8x32xf32>
    %621 = vector.extract_strided_slice %617 {offsets = [0, 64], sizes = [8, 32], strides = [1, 1]} : vector<8x128xf32> to vector<8x32xf32>
    %622 = arith.mulf %619, %537 : vector<8x32xf32>
    %623 = arith.mulf %618, %621 : vector<8x32xf32>
    %624 = arith.addf %622, %623 : vector<8x32xf32>
    %625 = math.tanh %624 : vector<8x32xf32>
    %626 = arith.mulf %620, %625 : vector<8x32xf32>
    %627 = tpu.concatenate %580, %562 in 1 : vector<8x32xf32>, vector<8x32xf32> -> vector<8x64xf32>
    %c0_195 = arith.constant 0 : index
    %c0_196 = arith.constant 0 : index
    %c0_197 = arith.constant 0 : index
    %628 = vector.load %arg5[%c0_195, %c0_196, %c0_197] : memref<3x64x128xf32, #tpu.memory_space<vmem>>, vector<1x64x128xf32>
    %629 = vector.shape_cast %628 : vector<1x64x128xf32> to vector<64x128xf32>
    %cst_198 = arith.constant dense<0.000000e+00> : vector<8x128xf32>
    %630 = tpu.matmul %627, %629, %cst_198 {dimension_numbers = #tpu.dot_dimension_numbers<[1], [0], [0], [1], [0, 0, 1, 1], [], []>} : vector<8x64xf32>, vector<64x128xf32>, vector<8x128xf32> -> vector<8x128xf32>
    %c1_199 = arith.constant 1 : index
    %c0_200 = arith.constant 0 : index
    %c0_201 = arith.constant 0 : index
    %631 = vector.load %arg6[%c1_199, %c0_200, %c0_201] : memref<4x1x128xf32, #tpu.memory_space<vmem>>, vector<1x1x128xf32>
    %632 = vector.shape_cast %631 : vector<1x1x128xf32> to vector<1x128xf32>
    %633 = vector.broadcast %632 : vector<1x128xf32> to vector<8x128xf32>
    %634 = arith.addf %630, %633 : vector<8x128xf32>
    %635 = arith.negf %634 : vector<8x128xf32>
    %636 = math.exp %635 : vector<8x128xf32>
    %cst_202 = arith.constant 1.000000e+00 : f32
    %637 = vector.broadcast %cst_202 : f32 to vector<8x128xf32>
    %638 = arith.addf %637, %636 : vector<8x128xf32>
    %639 = arith.divf %637, %638 : vector<8x128xf32>
    %640 = math.tanh %634 : vector<8x128xf32>
    %641 = vector.extract_strided_slice %639 {offsets = [0, 0], sizes = [8, 32], strides = [1, 1]} : vector<8x128xf32> to vector<8x32xf32>
    %642 = vector.extract_strided_slice %639 {offsets = [0, 32], sizes = [8, 32], strides = [1, 1]} : vector<8x128xf32> to vector<8x32xf32>
    %643 = vector.extract_strided_slice %639 {offsets = [0, 96], sizes = [8, 32], strides = [1, 1]} : vector<8x128xf32> to vector<8x32xf32>
    %644 = vector.extract_strided_slice %640 {offsets = [0, 64], sizes = [8, 32], strides = [1, 1]} : vector<8x128xf32> to vector<8x32xf32>
    %645 = arith.mulf %642, %560 : vector<8x32xf32>
    %646 = arith.mulf %641, %644 : vector<8x32xf32>
    %647 = arith.addf %645, %646 : vector<8x32xf32>
    %648 = math.tanh %647 : vector<8x32xf32>
    %649 = arith.mulf %643, %648 : vector<8x32xf32>
    %650 = tpu.concatenate %626, %603 in 1 : vector<8x32xf32>, vector<8x32xf32> -> vector<8x64xf32>
    %c2_203 = arith.constant 2 : index
    %c0_204 = arith.constant 0 : index
    %c0_205 = arith.constant 0 : index
    %651 = vector.load %arg5[%c2_203, %c0_204, %c0_205] : memref<3x64x128xf32, #tpu.memory_space<vmem>>, vector<1x64x128xf32>
    %652 = vector.shape_cast %651 : vector<1x64x128xf32> to vector<64x128xf32>
    %cst_206 = arith.constant dense<0.000000e+00> : vector<8x128xf32>
    %653 = tpu.matmul %650, %652, %cst_206 {dimension_numbers = #tpu.dot_dimension_numbers<[1], [0], [0], [1], [0, 0, 1, 1], [], []>} : vector<8x64xf32>, vector<64x128xf32>, vector<8x128xf32> -> vector<8x128xf32>
    %c3_207 = arith.constant 3 : index
    %c0_208 = arith.constant 0 : index
    %c0_209 = arith.constant 0 : index
    %654 = vector.load %arg6[%c3_207, %c0_208, %c0_209] : memref<4x1x128xf32, #tpu.memory_space<vmem>>, vector<1x1x128xf32>
    %655 = vector.shape_cast %654 : vector<1x1x128xf32> to vector<1x128xf32>
    %656 = vector.broadcast %655 : vector<1x128xf32> to vector<8x128xf32>
    %657 = arith.addf %653, %656 : vector<8x128xf32>
    %658 = arith.negf %657 : vector<8x128xf32>
    %659 = math.exp %658 : vector<8x128xf32>
    %cst_210 = arith.constant 1.000000e+00 : f32
    %660 = vector.broadcast %cst_210 : f32 to vector<8x128xf32>
    %661 = arith.addf %660, %659 : vector<8x128xf32>
    %662 = arith.divf %660, %661 : vector<8x128xf32>
    %663 = math.tanh %657 : vector<8x128xf32>
    %664 = vector.extract_strided_slice %662 {offsets = [0, 0], sizes = [8, 32], strides = [1, 1]} : vector<8x128xf32> to vector<8x32xf32>
    %665 = vector.extract_strided_slice %662 {offsets = [0, 32], sizes = [8, 32], strides = [1, 1]} : vector<8x128xf32> to vector<8x32xf32>
    %666 = vector.extract_strided_slice %662 {offsets = [0, 96], sizes = [8, 32], strides = [1, 1]} : vector<8x128xf32> to vector<8x32xf32>
    %667 = vector.extract_strided_slice %663 {offsets = [0, 64], sizes = [8, 32], strides = [1, 1]} : vector<8x128xf32> to vector<8x32xf32>
    %668 = arith.mulf %665, %601 : vector<8x32xf32>
    %669 = arith.mulf %664, %667 : vector<8x32xf32>
    %670 = arith.addf %668, %669 : vector<8x32xf32>
    %671 = math.tanh %670 : vector<8x32xf32>
    %672 = arith.mulf %666, %671 : vector<8x32xf32>
    %673 = tpu.concatenate %649, %626 in 1 : vector<8x32xf32>, vector<8x32xf32> -> vector<8x64xf32>
    %c1_211 = arith.constant 1 : index
    %c0_212 = arith.constant 0 : index
    %c0_213 = arith.constant 0 : index
    %674 = vector.load %arg5[%c1_211, %c0_212, %c0_213] : memref<3x64x128xf32, #tpu.memory_space<vmem>>, vector<1x64x128xf32>
    %675 = vector.shape_cast %674 : vector<1x64x128xf32> to vector<64x128xf32>
    %cst_214 = arith.constant dense<0.000000e+00> : vector<8x128xf32>
    %676 = tpu.matmul %673, %675, %cst_214 {dimension_numbers = #tpu.dot_dimension_numbers<[1], [0], [0], [1], [0, 0, 1, 1], [], []>} : vector<8x64xf32>, vector<64x128xf32>, vector<8x128xf32> -> vector<8x128xf32>
    %c2_215 = arith.constant 2 : index
    %c0_216 = arith.constant 0 : index
    %c0_217 = arith.constant 0 : index
    %677 = vector.load %arg6[%c2_215, %c0_216, %c0_217] : memref<4x1x128xf32, #tpu.memory_space<vmem>>, vector<1x1x128xf32>
    %678 = vector.shape_cast %677 : vector<1x1x128xf32> to vector<1x128xf32>
    %679 = vector.broadcast %678 : vector<1x128xf32> to vector<8x128xf32>
    %680 = arith.addf %676, %679 : vector<8x128xf32>
    %681 = arith.negf %680 : vector<8x128xf32>
    %682 = math.exp %681 : vector<8x128xf32>
    %cst_218 = arith.constant 1.000000e+00 : f32
    %683 = vector.broadcast %cst_218 : f32 to vector<8x128xf32>
    %684 = arith.addf %683, %682 : vector<8x128xf32>
    %685 = arith.divf %683, %684 : vector<8x128xf32>
    %686 = math.tanh %680 : vector<8x128xf32>
    %687 = vector.extract_strided_slice %685 {offsets = [0, 0], sizes = [8, 32], strides = [1, 1]} : vector<8x128xf32> to vector<8x32xf32>
    %688 = vector.extract_strided_slice %685 {offsets = [0, 32], sizes = [8, 32], strides = [1, 1]} : vector<8x128xf32> to vector<8x32xf32>
    %689 = vector.extract_strided_slice %685 {offsets = [0, 96], sizes = [8, 32], strides = [1, 1]} : vector<8x128xf32> to vector<8x32xf32>
    %690 = vector.extract_strided_slice %686 {offsets = [0, 64], sizes = [8, 32], strides = [1, 1]} : vector<8x128xf32> to vector<8x32xf32>
    %691 = arith.mulf %688, %624 : vector<8x32xf32>
    %692 = arith.mulf %687, %690 : vector<8x32xf32>
    %693 = arith.addf %691, %692 : vector<8x32xf32>
    %694 = math.tanh %693 : vector<8x32xf32>
    %695 = arith.mulf %689, %694 : vector<8x32xf32>
    %696 = tpu.concatenate %695, %672 in 1 : vector<8x32xf32>, vector<8x32xf32> -> vector<8x64xf32>
    %c2_219 = arith.constant 2 : index
    %c0_220 = arith.constant 0 : index
    %c0_221 = arith.constant 0 : index
    %697 = vector.load %arg5[%c2_219, %c0_220, %c0_221] : memref<3x64x128xf32, #tpu.memory_space<vmem>>, vector<1x64x128xf32>
    %698 = vector.shape_cast %697 : vector<1x64x128xf32> to vector<64x128xf32>
    %cst_222 = arith.constant dense<0.000000e+00> : vector<8x128xf32>
    %699 = tpu.matmul %696, %698, %cst_222 {dimension_numbers = #tpu.dot_dimension_numbers<[1], [0], [0], [1], [0, 0, 1, 1], [], []>} : vector<8x64xf32>, vector<64x128xf32>, vector<8x128xf32> -> vector<8x128xf32>
    %c3_223 = arith.constant 3 : index
    %c0_224 = arith.constant 0 : index
    %c0_225 = arith.constant 0 : index
    %700 = vector.load %arg6[%c3_223, %c0_224, %c0_225] : memref<4x1x128xf32, #tpu.memory_space<vmem>>, vector<1x1x128xf32>
    %701 = vector.shape_cast %700 : vector<1x1x128xf32> to vector<1x128xf32>
    %702 = vector.broadcast %701 : vector<1x128xf32> to vector<8x128xf32>
    %703 = arith.addf %699, %702 : vector<8x128xf32>
    %704 = arith.negf %703 : vector<8x128xf32>
    %705 = math.exp %704 : vector<8x128xf32>
    %cst_226 = arith.constant 1.000000e+00 : f32
    %706 = vector.broadcast %cst_226 : f32 to vector<8x128xf32>
    %707 = arith.addf %706, %705 : vector<8x128xf32>
    %708 = arith.divf %706, %707 : vector<8x128xf32>
    %709 = math.tanh %703 : vector<8x128xf32>
    %710 = vector.extract_strided_slice %708 {offsets = [0, 0], sizes = [8, 32], strides = [1, 1]} : vector<8x128xf32> to vector<8x32xf32>
    %711 = vector.extract_strided_slice %708 {offsets = [0, 32], sizes = [8, 32], strides = [1, 1]} : vector<8x128xf32> to vector<8x32xf32>
    %712 = vector.extract_strided_slice %708 {offsets = [0, 96], sizes = [8, 32], strides = [1, 1]} : vector<8x128xf32> to vector<8x32xf32>
    %713 = vector.extract_strided_slice %709 {offsets = [0, 64], sizes = [8, 32], strides = [1, 1]} : vector<8x128xf32> to vector<8x32xf32>
    %714 = arith.mulf %711, %670 : vector<8x32xf32>
    %715 = arith.mulf %710, %713 : vector<8x32xf32>
    %716 = arith.addf %714, %715 : vector<8x32xf32>
    %717 = math.tanh %716 : vector<8x32xf32>
    %718 = arith.mulf %712, %717 : vector<8x32xf32>
    %719 = tpu.concatenate %580, %649, %695, %718 in 1 : vector<8x32xf32>, vector<8x32xf32>, vector<8x32xf32>, vector<8x32xf32> -> vector<8x128xf32>
    %c0_227 = arith.constant 0 : index
    %c0_228 = arith.constant 0 : index
    %720 = vector.load %arg7[%c0_227, %c0_228] : memref<8x128xf32, #tpu.memory_space<vmem>>, vector<8x128xf32>
    tpu.vector_store %arg7[%c0_227, %c0_228], %719 {strides = array<i32>} : memref<8x128xf32, #tpu.memory_space<vmem>>, vector<8x128xf32>,
    %721 = tpu.concatenate %578, %647, %693, %716 in 1 : vector<8x32xf32>, vector<8x32xf32>, vector<8x32xf32>, vector<8x32xf32> -> vector<8x128xf32>
    %c0_229 = arith.constant 0 : index
    %c0_230 = arith.constant 0 : index
    %722 = vector.load %arg8[%c0_229, %c0_230] : memref<8x128xf32, #tpu.memory_space<vmem>>, vector<8x128xf32>
    tpu.vector_store %arg8[%c0_229, %c0_230], %721 {strides = array<i32>} : memref<8x128xf32, #tpu.memory_space<vmem>>, vector<8x128xf32>,
    return
  }
}

</mosaic_0001>

<bundles_post_ra>
// kernel: tpu_custom_call.1
= control target key start
LH: loop header
LB: loop body
LE: loop exit
PB: predicated region body
PF: predicated region fallthrough
CT: control target
= control target key end

     0   :  { %14 = vsyncpa [#allocation3], 0  ;;  %s6287_s0 = inlined_call_operand.vmem [shape: f32[64,6], index: 0, kind: input, shape index: {}]   ;;  %s6288_s1 = inlined_call_operand.vmem [shape: f32[6,32], index: 1, kind: input, shape index: {}]   ;;  %s6289_s2 = inlined_call_operand.vmem [shape: f32[1,32], index: 2, kind: input, shape index: {}]   ;;  %s6290_s3 = inlined_call_operand.vmem [shape: f32[32,128], index: 3, kind: input, shape index: {}]   ;;  %s6291_s4 = inlined_call_operand.vmem [shape: f32[32,128], index: 4, kind: input, shape index: {}]   ;;  %s6292_s5 = inlined_call_operand.hbm [shape: f32[3,64,128], index: 5, kind: input, shape index: {}]   ;;  %s6293_s6 = inlined_call_operand.vmem [shape: f32[4,1,128], index: 6, kind: input, shape index: {}]   ;;  %s6294_s7 = inlined_call_operand.hbm [shape: f32[8,128], index: 7, kind: output, shape index: {0}]   ;;  %s6295_s8 = inlined_call_operand.hbm [shape: f32[8,128], index: 8, kind: output, shape index: {1}]  }
   0x1   :  { %15 = vsyncpa [#allocation4], 0 }
   0x2   :  { %16 = vsyncpa [#allocation7], 0  ;;  %s5379_s27 = smov [#allocation2]   ;;  %s5307_s9 = scalar_lea.hbm %s6292_s5, 3072 }
   0x3   :  { %s32_s28 = sshll.u32 %s5379_s27, 4  ;;  %p5308_p0 = scmp.ne.s32.totalorder %s6292_s5, %s5307_s9  ;;  %s33_s28 = int_to_ptr.vmem [resolvable:$true] %s32_s28 }
   0x4   :  { %p5311_p1 = scmp.lt.u32.totalorder %s5307_s9, %s6292_s5 }
   0x6   :  { %p5313_p2 = pnand %p5311_p1, %p5308_p0 }
   0x8   :  { %5316 = shalt.err (!%p5313_p2)
}
   0x9   :  { %s5317_s14 = scalar_lea.vmem %s33_s28, 3072  ;;  %p5322_p4 = scmp.lt.s32.totalorder %s33_s28, %s33_s28 }
   0xa   :  { %p5318_p3 = scmp.ne.s32.totalorder %s33_s28, %s5317_s14  ;;  %p5323_p5 = scmp.lt.s32.totalorder %s5317_s14, %s5317_s14 }
   0xc   :  { %p5324_p6 = por %p5323_p5, %p5322_p4 }
   0xe   :  { %p5325_p7 = pnand %p5324_p6, %p5318_p3 }
  0x10   :  { %5328 = shalt.err (!%p5325_p7)
}
  0x11   :  { %s5380_s15 = smov 128   ;;  %s5381_s16 = smov 8  }
  0x12   :  { %38 = dma.hbm_to_vmem [thread:$0]  %s6292_s5, 3072, %s33_s28, [#allocation3], %s5380_s15, %s5380_s15, %s5381_s16  }
  0x13   :  { %5373 = dma.done.wait [#allocation3], 3072  }
  0x14   :  { %5374 = vsyncadd [#allocation3], 4294964224  ;;  %vm85_vm0 = vcmask 1045504   ;;  %vm60_vm1 = vcmask 48128   ;;  %v52_v0 = vld [vmem:[%s6288_s1] sm:$0x3f] }
  0x15   :  { %v44_v1 = vld [vmem:[%s6287_s0] sm:$0xff]  ;;  %v45_v2 = vld [vmem:[%s6287_s0 + $0x8] sm:$0xff]  ;;  %4114 = vmatprep.subr.msk.mxu0 %vm85_vm0, %v52_v0  ;;  %v46_v3 = vld [vmem:[%s6287_s0 + $0x10] sm:$0xff]  ;;  %v5382_v7 = vmov 0.0|0.0   ;;  %vm5383_vm2 = vmmov 0   ;;  %v5384_v22 = vmov 0.0  }
  0x16   :  { %4116 = vmatprep.mubr.msk.f32.mxu0 %vm60_vm1, %v44_v1  ;;  %v343_v4 = vld [vmem:[%s6291_s4] sm:$0xff]  ;;  %v344_v5 = vld [vmem:[%s6291_s4 + $0x8] sm:$0xff]  ;;  %4115 = vmatpush3.msk.msra.mxu0 %vm85_vm0, %v52_v0  ;;  %v47_v10 = vld [vmem:[%s6287_s0 + $0x18] sm:$0xff]  ;;  %vm213_vm3 = vcmask 261120   ;;  %s5385_s1 = smov 64   ;;  %s5386_s28 = smov 32  }
  0x17   :  { %v5466_v6 = vpack.c.bf16 %v344_v5, %v343_v4  ;;  %4117 = vmatmul.mubr.msk.f32.vlgmr.msra.gmra.mrb[0].mxu0 %vm60_vm1, %v45_v2  ;;  %4700 = vmatprep.subr.bf16.mxu0 %v5382_v7  ;;  %v202_v8 = vld [vmem:[%s6290_s3] sm:$0xff]  ;;  %v203_v9 = vld [vmem:[%s6290_s3 + $0x8] sm:$0xff]  ;;  %v204_v14 = vld [vmem:[%s6290_s3 + $0x10] sm:$0xff]  ;;  %vm466_vm4 = vcmask 523264   ;;  %s5388_s21 = smov [#allocation5]   ;;  %vm3701_vm5 = vcmask 785408  }
  0x18   :  { %4119 = vmatprep.mubr.msk.f32.mxu0 %vm60_vm1, %v46_v3  ;;  %v4692_v11 = vpack.c.bf16 %v203_v9, %v202_v8  ;;  %v48_v12 = vld [vmem:[%s6287_s0 + $0x20] sm:$0xff]  ;;  %v49_v13 = vld [vmem:[%s6287_s0 + $0x28] sm:$0xff]  ;;  %v205_v15 = vld [vmem:[%s6290_s3 + $0x18] sm:$0xff]  ;;  %s3726_s22 = sshll.u32 %s5388_s21, 4  ;;  %s5389_s23 = smov [#allocation6]   ;;  %s3727_s22 = int_to_ptr.vmem [resolvable:$true] %s3726_s22 }
  0x19   :  { %4702 = vmatpush3.bf16.msra.mxu0 %v5466_v6  ;;  %v50_v16 = vld [vmem:[%s6287_s0 + $0x30] sm:$0xff]  ;;  %v4696_v17 = vpack.c.bf16 %v205_v15, %v204_v14  ;;  %v51_v18 = vld [vmem:[%s6287_s0 + $0x38] sm:$0xff]  ;;  %v3749_v23 = vld [vmem:[%s6289_s2] ss:$0 sm:$0xff]  ;;  %s3736_s24 = sshll.u32 %s5389_s23, 4  ;;  %s5329_s5 = scalar_lea.vmem %s3727_s22, 128  ;;  %s6254_s24 = int_to_ptr.vmem [resolvable:$true] %s3736_s24 }
  0x1a   :  { %4703 = vmatprep.subr.bf16.mxu0 %v5382_v7  ;;  %4693 = vmatprep.subr.bf16.mxu1 %v4692_v11  ;;  %v345_v19 = vld [vmem:[%s6291_s4 + $0x10] sm:$0xff]  ;;  %v346_v20 = vld [vmem:[%s6291_s4 + $0x18] sm:$0xff]  ;;  %v5541_v50 = vld [vmem:[%s6293_s6] ss:$0 sm:$0xff]  ;;  %p5330_p8 = scmp.ne.s32.totalorder %s3727_s22, %s5329_s5  ;;  %p5334_p9 = scmp.lt.s32.totalorder %s3727_s22, %s3727_s22 }
  0x1b   :  { %4120 = vmatmul.mubr.msk.f32.gmra.mrb[2].mxu0 %vm60_vm1, %v47_v10  ;;  %4695 = vmatpush3.bf16.msra.mxu1 %v4692_v11  ;;  %v5511_v21 = vpack.c.bf16 %v346_v20, %v345_v19  ;;  %v450_v9 = vld [vmem:[#allocation2] sm:$0xff]  ;;  %v451_v10 = vld [vmem:[#allocation2 + $0x8] sm:$0xff]  ;;  %v452_v11 = vld [vmem:[#allocation2 + $0x10] sm:$0xff]  ;;  %p5335_p10 = scmp.lt.s32.totalorder %s5329_s5, %s5329_s5 }
  0x1c   :  { %4122 = vmatprep.mubr.msk.f32.mxu0 %vm60_vm1, %v48_v12  ;;  %4697 = vmatprep.subr.bf16.mxu1 %v4696_v17  ;;  %v5563_v12 = vpack.c.bf16 %v451_v10, %v450_v9  ;;  %v454_v15 = vld [vmem:[#allocation2 + $0x20] sm:$0xff]  ;;  %v457_v19 = vld [vmem:[#allocation2 + $0x38] sm:$0xff] }
  0x1d   :  { %4705 = vmatpush3.bf16.msra.mxu0 %v5511_v21  ;;  %p5336_p11 = por %p5335_p10, %p5334_p9 }
  0x1e   :  { %4718 = vmatprep.subr.bf16.mxu0 %v5382_v7 }
  0x1f   :  { %4123 = vmatmul.mubr.msk.f32.gmra.mrb[4].mxu0 %vm60_vm1, %v49_v13  ;;  %4699 = vmatpush3.bf16.msra.mxu1 %v4696_v17  ;;  %v453_v13 = vld [vmem:[#allocation2 + $0x18] sm:$0xff]  ;;  %p5337_p12 = pnand %p5336_p11, %p5330_p8 }
  0x20   :  { %4125 = vmatprep.mubr.msk.f32.mxu0 %vm60_vm1, %v50_v16  ;;  %4706 = vmatprep.subr.bf16.mxu1 %v5382_v7  ;;  %v5566_v14 = vpack.c.bf16 %v453_v13, %v452_v11  ;;  %v455_v16 = vld [vmem:[#allocation2 + $0x28] sm:$0xff]  ;;  %v673_v13 = vld [vmem:[#allocation2 + $0x70] sm:$0xff] }
  0x21   :  { %v5570_v17 = vpack.c.bf16 %v455_v16, %v454_v15  ;;  %v674_v15 = vld [vmem:[#allocation2 + $0x78] sm:$0xff] }
  0x22   :  { %v5628_v16 = vpack.c.bf16 %v674_v15, %v673_v13 }
  0x23   :  { %4126 = vmatmul.mubr.msk.f32.gmra.mrb[6].mxu0 %vm60_vm1, %v51_v18  ;;  %v456_v18 = vld [vmem:[#allocation2 + $0x30] sm:$0xff] }
  0x24   :  { %4156 = vmatprep.mubr.msk.f32.mxu0 %vm5383_vm2, %v5384_v22 }
  0x27   :  { %4157 = vmatmul.mubr.f32.vlgmr.msra.gmra.mrb[8].mxu0 %v5384_v22 }
  0x28   :  { %4720 = vmatpush3.bf16.msra.mxu0 %v5466_v6  ;;  %4186 = vmatprep.mubr.msk.f32.mxu0 %vm5383_vm2, %v5384_v22 }
  0x29   :  { %4721 = vmatprep.subr.bf16.mxu0 %v5382_v7 }
  0x2c   :  { %4723 = vmatpush3.bf16.msra.mxu0 %v5511_v21 }
  0x2d   :  { %4736 = vmatprep.subr.bf16.mxu0 %v5382_v7 }
  0xea   :  { %v4118_v24 = vpop.f32.mrb[0].mxu0 }
  0xeb   :  { %v161_v25 = vadd.f32 %v4118_v24, %v3749_v23  ;;  %v155_v26 = vpop.f32.mrb[1].mxu0 }
  0xec   :  { %v156_v27 = vadd.f32 %v3749_v23, %v155_v26 }
  0xed   :  { %v195_v30 = vmax.f32 %v161_v25, 0.0 }
  0xee   :  { %v194_v28 = vmax.f32 %v156_v27, 0.0  ;;  %v4121_v29 = vpop.f32.mrb[2].mxu0 }
  0xef   :  { %v171_v31 = vadd.f32 %v4121_v29, %v3749_v23  ;;  %v165_v32 = vpop.f32.mrb[3].mxu0  ;;  %v5601_v29 = vld [vmem:[%s6293_s6 + $0x1] ss:$0 sm:$0xff] }
  0xf0   :  { %4136 = vmatprep.mubr.msk.f32.mxu1 %vm213_vm3, %v194_v28  ;;  %v166_v33 = vadd.f32 %v3749_v23, %v165_v32 }
  0xf1   :  { %4137 = vmatmul.mubr.msk.f32.vlgmr.msra.gmra.mrb[0].mxu1 %vm213_vm3, %v195_v30  ;;  %v197_v34 = vmax.f32 %v171_v31, 0.0 }
  0xf2   :  { %v196_v35 = vmax.f32 %v166_v33, 0.0  ;;  %v4124_v36 = vpop.f32.mrb[4].mxu0  ;;  %4708 = vmatpush3.bf16.msra.mxu1 %v5563_v12 }
  0xf3   :  { %v181_v37 = vadd.f32 %v4124_v36, %v3749_v23  ;;  %v175_v38 = vpop.f32.mrb[5].mxu0  ;;  %4709 = vmatprep.subr.bf16.mxu1 %v5382_v7 }
  0xf4   :  { %v176_v39 = vadd.f32 %v3749_v23, %v175_v38  ;;  %4139 = vmatprep.mubr.msk.f32.mxu1 %vm213_vm3, %v196_v35 }
  0xf5   :  { %v199_v40 = vmax.f32 %v181_v37, 0.0  ;;  %4140 = vmatmul.mubr.msk.f32.gmra.mrb[2].mxu1 %vm213_vm3, %v197_v34 }
  0xf6   :  { %v198_v41 = vmax.f32 %v176_v39, 0.0  ;;  %v4127_v42 = vpop.f32.mrb[6].mxu0  ;;  %4711 = vmatpush3.bf16.msra.mxu1 %v5566_v14 }
  0xf7   :  { %v191_v43 = vadd.f32 %v4127_v42, %v3749_v23  ;;  %v185_v44 = vpop.f32.mrb[7].mxu0  ;;  %4712 = vmatprep.subr.bf16.mxu1 %v5382_v7 }
  0xf8   :  { %4142 = vmatprep.mubr.msk.f32.mxu1 %vm213_vm3, %v198_v41  ;;  %v186_v45 = vadd.f32 %v3749_v23, %v185_v44  ;;  %v5575_v23 = vpack.c.bf16 %v457_v19, %v456_v18 }
  0xf9   :  { %4143 = vmatmul.mubr.msk.f32.gmra.mrb[4].mxu1 %vm213_vm3, %v199_v40  ;;  %v201_v46 = vmax.f32 %v191_v43, 0.0 }
  0xfa   :  { %v200_v47 = vmax.f32 %v186_v45, 0.0  ;;  %v416_v48 = vpop.f32.mrb[8].mxu0  ;;  %4714 = vmatpush3.bf16.msra.mxu1 %v5570_v17 }
  0xfb   :  { %v4158_v49 = vpop.f32.mrb[9].mxu0  ;;  %4715 = vmatprep.subr.bf16.mxu1 %v5382_v7 }
  0xfc   :  { %4145 = vmatprep.mubr.msk.f32.mxu1 %vm213_vm3, %v200_v47 }
  0xfd   :  { %4146 = vmatmul.mubr.msk.f32.gmra.mrb[6].mxu1 %vm213_vm3, %v201_v46 }
  0xfe   :  { %4175 = vmatprep.mubr.msk.f32.mxu1 %vm5383_vm2, %v5384_v22  ;;  %4717 = vmatpush3.bf16.msra.mxu1 %v5575_v23 }
  0xff   :  { %4724 = vmatprep.subr.bf16.mxu1 %v5382_v7 }
 0x1c4   :  { %v5543_v51 = vpop.f32.mrb[0].mxu1 }
 0x1c5   :  { %v304_v52 = vpop.f32.mrb[1].mxu1  ;;  %v310_v28 = vadd.f32 %v5543_v51, %v5541_v50 }
 0x1c6   :  { %v305_v53 = vadd.f32 %v5541_v50, %v304_v52 }
 0x1c8   :  { %v420_v54 = vadd.f32 %v416_v48, %v305_v53  ;;  %v5546_v55 = vpop.f32.mrb[2].mxu1 }
 0x1c9   :  { %v5548_v56 = vpop.f32.mrb[3].mxu1 }
 0x1ca   :  { %5047 = vtanh.f32 %v420_v54  ;;  %v3768_v62 = vmul.f32 -1.442695, %v420_v54 }
 0x1cc   :  { %v5550_v57 = vpop.f32.mrb[4].mxu1  ;;  %5049 = vpow2.f32 %v3768_v62 }
 0x1cd   :  { %v5552_v58 = vpop.f32.mrb[5].mxu1 }
 0x1d0   :  { %v5555_v60 = vpop.f32.mrb[6].mxu1 }
 0x1d1   :  { %v5557_v61 = vpop.f32.mrb[7].mxu1 }
 0x1d4   :  { %v5048_v59 = vpop.eup %5047 }
 0x1d5   :  { %430 = vrot.lane.b32.xlu0 %v5048_v59, %s5385_s1 }
 0x1d6   :  { %v5050_v63 = vpop.eup %5049 }
 0x1d7   :  { %v424_v0 = vadd.f32 1.0, %v5050_v63  ;;  %v667_v63 = vld [vmem:[#allocation2 + $0x40] sm:$0xff] }
 0x1d9   :  { %5051 = vrcp.f32 %v424_v0  ;;  %v668_v0 = vld [vmem:[#allocation2 + $0x48] sm:$0xff] }
 0x1e3   :  { %v5052_v1 = vpop.eup %5051 }
 0x1e4   :  { %v428_v4 = vmul.f32 0.0, %v5052_v1 }
 0x247   :  { %v431_v2 = vpop.permute.xlu0 %430 }
 0x248   :  { %v433_v3 = vmul.f32 %v5052_v1, %v431_v2  ;;  %v5615_v2 = vpack.c.bf16 %v668_v0, %v667_v63 }
 0x24a   :  { %435 = vrot.lane.b32.xlu0 %v433_v3, %s5386_s28  ;;  %v670_v3 = vld [vmem:[#allocation2 + $0x58] sm:$0xff] }
 0x2bc   :  { %v436_v5 = vpop.permute.xlu0 %435 }
 0x2bd   :  { %v5560_v8 = vadd.f32 %v436_v5, %v428_v4  ;;  %v671_v5 = vld [vmem:[#allocation2 + $0x60] sm:$0xff] }
 0x2bf   :  { %5053 = vtanh.f32 %v5560_v8 }
 0x2c9   :  { %v5054_v20 = vpop.eup %5053 }
 0x2ca   :  { %441 = vrot.lane.b32.xlu1 %v5054_v20, %s5385_s1 }
 0x33c   :  { %v442_v24 = vpop.permute.xlu1 %441 }
 0x33d   :  { %v444_v25 = vmul.f32 %v5052_v1, %v442_v24  ;;  %v669_v1 = vld [vmem:[#allocation2 + $0x50] sm:$0xff] }
 0x33e   :  { %v5618_v4 = vpack.c.bf16 %v670_v3, %v669_v1 }
 0x33f   :  { %446 = vrot.lane.b32.xlu1 %v444_v25, %s5386_s28 }
 0x3b1   :  { %v447_v26 = vpop.permute.xlu1 %446 }
 0x3b2   :  { %v449_v27 = vsel %vm213_vm3, %v447_v26, 0.0  ;;  %4187 = vmatmul.mubr.msk.f32.vlgmr.msra.gmra.mrb[10].mxu0 %vm213_vm3, %v447_v26 }
 0x3b3   :  { %4176 = vmatmul.mubr.msk.f32.vlgmr.msra.gmra.mrb[8].mxu1 %vm466_vm4, %v449_v27  ;;  %4738 = vmatpush3.bf16.msra.mxu0 %v5563_v12 }
 0x3b4   :  { %4739 = vmatprep.subr.bf16.mxu0 %v5382_v7  ;;  %4205 = vmatprep.mubr.msk.f32.mxu1 %vm5383_vm2, %v5384_v22 }
 0x3b5   :  { %4224 = vmatprep.mubr.msk.f32.mxu0 %vm5383_vm2, %v5384_v22  ;;  %4726 = vmatpush3.bf16.msra.mxu1 %v5615_v2 }
 0x3b6   :  { %4727 = vmatprep.subr.bf16.mxu1 %v5382_v7 }
 0x3b7   :  { %4741 = vmatpush3.bf16.msra.mxu0 %v5566_v14 }
 0x3b8   :  { %4742 = vmatprep.subr.bf16.mxu0 %v5382_v7 }
 0x3b9   :  { %4729 = vmatpush3.bf16.msra.mxu1 %v5618_v4 }
 0x3ba   :  { %4730 = vmatprep.subr.bf16.mxu1 %v5382_v7 }
 0x3bb   :  { %4744 = vmatpush3.bf16.msra.mxu0 %v5570_v17 }
 0x3bc   :  { %4745 = vmatprep.subr.bf16.mxu0 %v5382_v7 }
 0x3bf   :  { %4747 = vmatpush3.bf16.msra.mxu0 %v5575_v23 }
 0x3c0   :  { %4754 = vmatprep.subr.bf16.mxu0 %v5382_v7 }
 0x485   :  { %v632_v30 = vpop.f32.mrb[10].mxu0 }
 0x486   :  { %v636_v31 = vadd.f32 %v632_v30, %v310_v28  ;;  %v536_v32 = vpop.f32.mrb[8].mxu1  ;;  %v4188_v33 = vpop.f32.mrb[11].mxu0 }
 0x487   :  { %v537_v34 = vadd.f32 %v5601_v29, %v536_v32  ;;  %v4177_v35 = vpop.f32.mrb[9].mxu1 }
 0x488   :  { %5055 = vtanh.f32 %v636_v31  ;;  %v3774_v38 = vmul.f32 -1.442695, %v636_v31  ;;  %v5662_v31 = vld [vmem:[%s6293_s6 + $0x2] ss:$0 sm:$0xff] }
 0x489   :  { %5057 = vtanh.f32 %v537_v34  ;;  %v3772_v39 = vmul.f32 -1.442695, %v537_v34 }
 0x48a   :  { %5059 = vpow2.f32 %v3774_v38  ;;  %v315_v38 = vadd.f32 %v5541_v50, %v5548_v56 }
 0x48b   :  { %5061 = vpow2.f32 %v3772_v39 }
 0x492   :  { %v5056_v36 = vpop.eup %5055 }
 0x493   :  { %v5058_v37 = vpop.eup %5057  ;;  %646 = vrot.lane.b32.xlu1 %v5056_v36, %s5385_s1 }
 0x494   :  { %549 = vrot.lane.b32.xlu0 %v5058_v37, %s5385_s1  ;;  %v5060_v40 = vpop.eup %5059 }
 0x495   :  { %v5062_v41 = vpop.eup %5061  ;;  %v640_v42 = vadd.f32 1.0, %v5060_v40 }
 0x496   :  { %v543_v43 = vadd.f32 1.0, %v5062_v41 }
 0x497   :  { %5063 = vrcp.f32 %v640_v42 }
 0x498   :  { %5065 = vrcp.f32 %v543_v43 }
 0x4a1   :  { %v5064_v44 = vpop.eup %5063 }
 0x4a2   :  { %v5066_v46 = vpop.eup %5065  ;;  %v644_v51 = vmul.f32 %v5064_v44, %v5560_v8  ;;  %v672_v8 = vld [vmem:[#allocation2 + $0x68] sm:$0xff] }
 0x4a3   :  { %v547_v53 = vmul.f32 0.0, %v5066_v46  ;;  %v5624_v11 = vpack.c.bf16 %v672_v8, %v671_v5 }
 0x4a5   :  { %4732 = vmatpush3.bf16.msra.mxu1 %v5624_v11 }
 0x4a6   :  { %4733 = vmatprep.subr.bf16.mxu1 %v5382_v7 }
 0x4a9   :  { %4735 = vmatpush3.bf16.msra.mxu1 %v5628_v16 }
 0x4aa   :  { %4748 = vmatprep.subr.bf16.mxu1 %v5382_v7 }
 0x505   :  { %v647_v45 = vpop.permute.xlu1 %646 }
 0x506   :  { %v649_v47 = vmul.f32 %v5064_v44, %v647_v45  ;;  %v550_v48 = vpop.permute.xlu0 %549 }
 0x507   :  { %v552_v49 = vmul.f32 %v5066_v46, %v550_v48 }
 0x508   :  { %651 = vrot.lane.b32.xlu1 %v649_v47, %s5386_s28 }
 0x509   :  { %554 = vrot.lane.b32.xlu0 %v552_v49, %s5386_s28 }
 0x57a   :  { %v652_v52 = vpop.permute.xlu1 %651 }
 0x57b   :  { %v5609_v54 = vadd.f32 %v652_v52, %v644_v51  ;;  %v555_v59 = vpop.permute.xlu0 %554 }
 0x57c   :  { %v5611_v62 = vadd.f32 %v555_v59, %v547_v53 }
 0x57d   :  { %5067 = vtanh.f32 %v5609_v54 }
 0x57e   :  { %5069 = vtanh.f32 %v5611_v62 }
 0x587   :  { %v5068_v9 = vpop.eup %5067 }
 0x588   :  { %v5070_v10 = vpop.eup %5069  ;;  %657 = vrot.lane.b32.xlu1 %v5068_v9, %s5385_s1 }
 0x589   :  { %560 = vrot.lane.b32.xlu0 %v5070_v10, %s5385_s1 }
 0x5fa   :  { %v658_v18 = vpop.permute.xlu1 %657 }
 0x5fb   :  { %v660_v19 = vmul.f32 %v5064_v44, %v658_v18  ;;  %v561_v20 = vpop.permute.xlu0 %560 }
 0x5fc   :  { %v563_v24 = vmul.f32 %v5066_v46, %v561_v20 }
 0x5fd   :  { %781 = vrot.lane.b32.xlu1 %v660_v19, %s5386_s28 }
 0x5fe   :  { %662 = vrot.lane.b32.xlu0 %v563_v24, %s5386_s28 }
 0x602   :  { %784 = vrot.lane.b32.xlu0 %v563_v24, %s5385_s1 }
 0x66f   :  { %v782_v27 = vpop.permute.xlu1 %781 }
 0x670   :  { %v663_v25 = vpop.permute.xlu0 %662 }
 0x671   :  { %v665_v26 = vsel %vm213_vm3, %v663_v25, 0.0 }
 0x672   :  { %4206 = vmatmul.mubr.msk.f32.vlgmr.msra.gmra.mrb[10].mxu1 %vm466_vm4, %v665_v26 }
 0x673   :  { %4750 = vmatpush3.bf16.msra.mxu1 %v5466_v6  ;;  %4235 = vmatprep.mubr.msk.f32.mxu1 %vm5383_vm2, %v5384_v22 }
 0x674   :  { %v785_v28 = vpop.permute.xlu0 %784  ;;  %4751 = vmatprep.subr.bf16.mxu1 %v5382_v7 }
 0x675   :  { %v787_v30 = vsel %vm213_vm3, %v782_v27, %v785_v28  ;;  %v988_v28 = vld [vmem:[#allocation2 + $0x80] sm:$0xff] }
 0x676   :  { %4225 = vmatmul.mubr.msk.f32.vlgmr.msra.gmra.mrb[12].mxu0 %vm466_vm4, %v787_v30  ;;  %v989_v30 = vld [vmem:[#allocation2 + $0x88] sm:$0xff] }
 0x677   :  { %4753 = vmatpush3.bf16.msra.mxu1 %v5511_v21  ;;  %4254 = vmatprep.mubr.msk.f32.mxu0 %vm5383_vm2, %v5384_v22 }
 0x678   :  { %4766 = vmatprep.subr.bf16.mxu1 %v5382_v7 }
 0x67a   :  { %4236 = vmatmul.mubr.msk.f32.vlgmr.msra.gmra.mrb[12].mxu1 %vm213_vm3, %v782_v27 }
 0x67b   :  { %4768 = vmatpush3.bf16.msra.mxu1 %v5615_v2  ;;  %4273 = vmatprep.mubr.msk.f32.mxu1 %vm5383_vm2, %v5384_v22 }
 0x67c   :  { %4769 = vmatprep.subr.bf16.mxu1 %v5382_v7 }
 0x67f   :  { %4771 = vmatpush3.bf16.msra.mxu1 %v5618_v4 }
 0x680   :  { %4772 = vmatprep.subr.bf16.mxu1 %v5382_v7 }
 0x683   :  { %4774 = vmatpush3.bf16.msra.mxu1 %v5624_v11 }
 0x684   :  { %4775 = vmatprep.subr.bf16.mxu1 %v5382_v7 }
 0x687   :  { %4777 = vmatpush3.bf16.msra.mxu1 %v5628_v16 }
 0x688   :  { %4790 = vmatprep.subr.bf16.mxu1 %v5382_v7 }
 0x745   :  { %v752_v32 = vpop.f32.mrb[10].mxu1 }
 0x746   :  { %v753_v33 = vadd.f32 %v5662_v31, %v752_v32  ;;  %v4207_v34 = vpop.f32.mrb[11].mxu1  ;;  %v990_v32 = vld [vmem:[#allocation2 + $0x90] sm:$0xff] }
 0x747   :  { %v991_v34 = vld [vmem:[#allocation2 + $0x98] sm:$0xff] }
 0x748   :  { %5071 = vtanh.f32 %v753_v33  ;;  %v3778_v45 = vmul.f32 -1.442695, %v753_v33  ;;  %v5685_v33 = vpack.c.bf16 %v989_v30, %v988_v28 }
 0x749   :  { %v857_v35 = vpop.f32.mrb[12].mxu0 }
 0x74a   :  { %v858_v36 = vadd.f32 %v5601_v29, %v857_v35  ;;  %v4226_v37 = vpop.f32.mrb[13].mxu0  ;;  %4756 = vmatpush3.bf16.msra.mxu0 %v5685_v33 }
 0x74b   :  { %4757 = vmatprep.subr.bf16.mxu0 %v5382_v7 }
 0x74c   :  { %5073 = vtanh.f32 %v858_v36  ;;  %v3780_v46 = vmul.f32 -1.442695, %v858_v36  ;;  %v993_v36 = vld [vmem:[#allocation2 + $0xa8] sm:$0xff] }
 0x74d   :  { %v953_v39 = vpop.f32.mrb[12].mxu1 }
 0x74e   :  { %v957_v40 = vadd.f32 %v953_v39, %v315_v38  ;;  %v4237_v41 = vpop.f32.mrb[13].mxu1  ;;  %v994_v39 = vld [vmem:[#allocation2 + $0xb0] sm:$0xff] }
 0x750   :  { %5075 = vtanh.f32 %v957_v40  ;;  %v3782_v47 = vmul.f32 -1.442695, %v957_v40  ;;  %v995_v40 = vld [vmem:[#allocation2 + $0xb8] sm:$0xff] }
 0x751   :  { %5077 = vpow2.f32 %v3778_v45 }
 0x752   :  { %v5072_v42 = vpop.eup %5071  ;;  %5079 = vpow2.f32 %v3780_v46 }
 0x753   :  { %765 = vrot.lane.b32.xlu1 %v5072_v42, %s5385_s1  ;;  %5081 = vpow2.f32 %v3782_v47  ;;  %v5699_v42 = vpack.c.bf16 %v995_v40, %v994_v39 }
 0x756   :  { %v5074_v43 = vpop.eup %5073 }
 0x757   :  { %870 = vrot.lane.b32.xlu0 %v5074_v43, %s5385_s1 }
 0x75a   :  { %v5076_v44 = vpop.eup %5075 }
 0x75b   :  { %967 = vrot.lane.b32.xlu1 %v5076_v44, %s5385_s1  ;;  %v5078_v56 = vpop.eup %5077 }
 0x75c   :  { %v759_v48 = vadd.f32 1.0, %v5078_v56  ;;  %v5080_v49 = vpop.eup %5079 }
 0x75d   :  { %v864_v51 = vadd.f32 1.0, %v5080_v49  ;;  %v5082_v52 = vpop.eup %5081 }
 0x75e   :  { %5083 = vrcp.f32 %v759_v48  ;;  %v961_v53 = vadd.f32 1.0, %v5082_v52 }
 0x75f   :  { %5085 = vrcp.f32 %v864_v51 }
 0x760   :  { %5087 = vrcp.f32 %v961_v53 }
 0x768   :  { %v5084_v59 = vpop.eup %5083 }
 0x769   :  { %v5086_v1 = vpop.eup %5085  ;;  %v763_v13 = vmul.f32 0.0, %v5084_v59 }
 0x76a   :  { %v5088_v8 = vpop.eup %5087  ;;  %v868_v19 = vmul.f32 %v5086_v1, %v5611_v62  ;;  %v5689_v62 = vpack.c.bf16 %v991_v34, %v990_v32 }
 0x76b   :  { %v965_v25 = vmul.f32 %v5088_v8, %v5609_v54  ;;  %v992_v54 = vld [vmem:[#allocation2 + $0xa0] sm:$0xff] }
 0x76c   :  { %4759 = vmatpush3.bf16.msra.mxu0 %v5689_v62  ;;  %v5694_v38 = vpack.c.bf16 %v993_v36, %v992_v54 }
 0x76d   :  { %4760 = vmatprep.subr.bf16.mxu0 %v5382_v7 }
 0x770   :  { %4762 = vmatpush3.bf16.msra.mxu0 %v5694_v38 }
 0x771   :  { %4763 = vmatprep.subr.bf16.mxu0 %v5382_v7 }
 0x774   :  { %4765 = vmatpush3.bf16.msra.mxu0 %v5699_v42 }
 0x775   :  { %4778 = vmatprep.subr.bf16.mxu0 %v5382_v7 }
 0x7c5   :  { %v766_v63 = vpop.permute.xlu1 %765 }
 0x7c6   :  { %v768_v0 = vmul.f32 %v5084_v59, %v766_v63 }
 0x7c8   :  { %770 = vrot.lane.b32.xlu0 %v768_v0, %s5386_s28 }
 0x7c9   :  { %v871_v3 = vpop.permute.xlu0 %870 }
 0x7ca   :  { %v873_v5 = vmul.f32 %v5086_v1, %v871_v3 }
 0x7cc   :  { %875 = vrot.lane.b32.xlu1 %v873_v5, %s5386_s28 }
 0x7cd   :  { %v968_v9 = vpop.permute.xlu1 %967 }
 0x7ce   :  { %v970_v10 = vmul.f32 %v5088_v8, %v968_v9 }
 0x7d0   :  { %972 = vrot.lane.b32.xlu0 %v970_v10, %s5386_s28 }
 0x83a   :  { %v771_v15 = vpop.permute.xlu0 %770 }
 0x83b   :  { %v5674_v18 = vadd.f32 %v771_v15, %v763_v13  ;;  %v320_v15 = vadd.f32 %v5546_v55, %v5541_v50 }
 0x83d   :  { %5089 = vtanh.f32 %v5674_v18 }
 0x83e   :  { %v876_v20 = vpop.permute.xlu1 %875 }
 0x83f   :  { %v5678_v24 = vadd.f32 %v876_v20, %v868_v19 }
 0x841   :  { %5091 = vtanh.f32 %v5678_v24 }
 0x842   :  { %v973_v26 = vpop.permute.xlu0 %972 }
 0x843   :  { %v5682_v27 = vadd.f32 %v973_v26, %v965_v25 }
 0x845   :  { %5093 = vtanh.f32 %v5682_v27 }
 0x847   :  { %v5090_v35 = vpop.eup %5089 }
 0x848   :  { %776 = vrot.lane.b32.xlu1 %v5090_v35, %s5385_s1 }
 0x84b   :  { %v5092_v37 = vpop.eup %5091 }
 0x84c   :  { %881 = vrot.lane.b32.xlu0 %v5092_v37, %s5385_s1 }
 0x84f   :  { %v5094_v41 = vpop.eup %5093 }
 0x850   :  { %978 = vrot.lane.b32.xlu1 %v5094_v41, %s5385_s1 }
 0x8ba   :  { %v777_v43 = vpop.permute.xlu1 %776 }
 0x8bb   :  { %v779_v44 = vmul.f32 %v5084_v59, %v777_v43 }
 0x8bd   :  { %983 = vrot.lane.b32.xlu0 %v779_v44, %s5386_s28 }
 0x8be   :  { %v882_v45 = vpop.permute.xlu0 %881 }
 0x8bf   :  { %v884_v46 = vmul.f32 %v5086_v1, %v882_v45  ;;  %v5755_v1 = vld [vmem:[%s6293_s6 + $0x3] ss:$0 sm:$0xff] }
 0x8c1   :  { %1105 = vrot.lane.b32.xlu0 %v779_v44, %s5385_s1  ;;  %1102 = vrot.lane.b32.xlu1 %v884_v46, %s5386_s28 }
 0x8c2   :  { %v979_v47 = vpop.permute.xlu1 %978 }
 0x8c3   :  { %v981_v56 = vmul.f32 %v5088_v8, %v979_v47 }
 0x8c5   :  { %1210 = vrot.lane.b32.xlu0 %v884_v46, %s5385_s1  ;;  %1207 = vrot.lane.b32.xlu1 %v981_v56, %s5386_s28 }
 0x92f   :  { %v984_v48 = vpop.permute.xlu0 %983 }
 0x930   :  { %v986_v49 = vsel %vm213_vm3, %v984_v48, 0.0 }
 0x931   :  { %4255 = vmatmul.mubr.msk.f32.vlgmr.msra.gmra.mrb[14].mxu0 %vm466_vm4, %v986_v49 }
 0x932   :  { %4780 = vmatpush3.bf16.msra.mxu0 %v5563_v12  ;;  %4292 = vmatprep.mubr.msk.f32.mxu0 %vm5383_vm2, %v5384_v22 }
 0x933   :  { %v1106_v51 = vpop.permute.xlu0 %1105  ;;  %v1103_v52 = vpop.permute.xlu1 %1102  ;;  %4781 = vmatprep.subr.bf16.mxu0 %v5382_v7 }
 0x934   :  { %v1108_v53 = vsel %vm213_vm3, %v1103_v52, %v1106_v51 }
 0x935   :  { %4274 = vmatmul.mubr.msk.f32.vlgmr.msra.gmra.mrb[14].mxu1 %vm466_vm4, %v1108_v53 }
 0x936   :  { %4783 = vmatpush3.bf16.msra.mxu0 %v5566_v14  ;;  %4792 = vmatpush3.bf16.msra.mxu1 %v5466_v6 }
 0x937   :  { %4784 = vmatprep.subr.bf16.mxu0 %v5382_v7  ;;  %4793 = vmatprep.subr.bf16.mxu1 %v5382_v7  ;;  %v1208_v59 = vpop.permute.xlu1 %1207  ;;  %v1211_v63 = vpop.permute.xlu0 %1210 }
 0x938   :  { %4303 = vmatprep.mubr.msk.f32.mxu1 %vm5383_vm2, %v5384_v22  ;;  %v1213_v0 = vsel %vm213_vm3, %v1208_v59, %v1211_v63 }
 0x93a   :  { %4786 = vmatpush3.bf16.msra.mxu0 %v5570_v17  ;;  %4795 = vmatpush3.bf16.msra.mxu1 %v5511_v21 }
 0x93b   :  { %4787 = vmatprep.subr.bf16.mxu0 %v5382_v7  ;;  %4796 = vmatprep.subr.bf16.mxu1 %v5382_v7 }
 0x93d   :  { %4304 = vmatmul.mubr.msk.f32.vlgmr.msra.gmra.mrb[16].mxu1 %vm213_vm3, %v1208_v59 }
 0x93e   :  { %4789 = vmatpush3.bf16.msra.mxu0 %v5575_v23  ;;  %4798 = vmatpush3.bf16.msra.mxu1 %v5685_v33 }
 0x93f   :  { %4799 = vmatprep.subr.bf16.mxu1 %v5382_v7  ;;  %4808 = vmatprep.subr.bf16.mxu0 %v5382_v7 }
 0x940   :  { %4322 = vmatprep.mubr.msk.f32.mxu1 %vm5383_vm2, %v5384_v22 }
 0x941   :  { %4293 = vmatmul.mubr.msk.f32.vlgmr.msra.gmra.mrb[16].mxu0 %vm466_vm4, %v1213_v0 }
 0x942   :  { %4801 = vmatpush3.bf16.msra.mxu1 %v5689_v62  ;;  %4810 = vmatpush3.bf16.msra.mxu0 %v5615_v2 }
 0x943   :  { %4802 = vmatprep.subr.bf16.mxu1 %v5382_v7  ;;  %4811 = vmatprep.subr.bf16.mxu0 %v5382_v7 }
 0x944   :  { %4341 = vmatprep.mubr.msk.f32.mxu0 %vm5383_vm2, %v5384_v22 }
 0x946   :  { %4804 = vmatpush3.bf16.msra.mxu1 %v5694_v38  ;;  %4813 = vmatpush3.bf16.msra.mxu0 %v5618_v4 }
 0x947   :  { %4805 = vmatprep.subr.bf16.mxu1 %v5382_v7  ;;  %4814 = vmatprep.subr.bf16.mxu0 %v5382_v7 }
 0x94a   :  { %4807 = vmatpush3.bf16.msra.mxu1 %v5699_v42  ;;  %4816 = vmatpush3.bf16.msra.mxu0 %v5624_v11 }
 0x94b   :  { %4820 = vmatprep.subr.bf16.mxu1 %v5382_v7  ;;  %4817 = vmatprep.subr.bf16.mxu0 %v5382_v7 }
 0x94e   :  { %4819 = vmatpush3.bf16.msra.mxu0 %v5628_v16 }
 0x94f   :  { %4832 = vmatprep.subr.bf16.mxu0 %v5382_v7 }
 0xa04   :  { %v1073_v3 = vpop.f32.mrb[14].mxu0 }
 0xa05   :  { %v1074_v5 = vadd.f32 %v5755_v1, %v1073_v3  ;;  %v4256_v8 = vpop.f32.mrb[15].mxu0 }
 0xa07   :  { %5095 = vtanh.f32 %v1074_v5  ;;  %v3786_v55 = vmul.f32 -1.442695, %v1074_v5 }
 0xa08   :  { %v1178_v9 = vpop.f32.mrb[14].mxu1 }
 0xa09   :  { %v1179_v10 = vadd.f32 %v5662_v31, %v1178_v9  ;;  %v4275_v13 = vpop.f32.mrb[15].mxu1 }
 0xa0b   :  { %5097 = vtanh.f32 %v1179_v10  ;;  %v3788_v36 = vmul.f32 -1.442695, %v1179_v10 }
 0xa10   :  { %v1379_v19 = vpop.f32.mrb[16].mxu1 }
 0xa11   :  { %v5096_v20 = vpop.eup %5095  ;;  %v1383_v25 = vadd.f32 %v1379_v19, %v320_v15  ;;  %v4305_v26 = vpop.f32.mrb[17].mxu1 }
 0xa12   :  { %1086 = vrot.lane.b32.xlu1 %v5096_v20, %s5385_s1 }
 0xa13   :  { %5099 = vtanh.f32 %v1383_v25  ;;  %v3792_v37 = vmul.f32 -1.442695, %v1383_v25 }
 0xa14   :  { %v1283_v28 = vpop.f32.mrb[16].mxu0 }
 0xa15   :  { %v5098_v30 = vpop.eup %5097  ;;  %v1284_v32 = vadd.f32 %v5601_v29, %v1283_v28  ;;  %v4294_v34 = vpop.f32.mrb[17].mxu0 }
 0xa16   :  { %1191 = vrot.lane.b32.xlu0 %v5098_v30, %s5385_s1 }
 0xa17   :  { %5101 = vtanh.f32 %v1284_v32  ;;  %v3790_v40 = vmul.f32 -1.442695, %v1284_v32 }
 0xa18   :  { %5103 = vpow2.f32 %v3786_v55 }
 0xa19   :  { %5105 = vpow2.f32 %v3788_v36 }
 0xa1a   :  { %5107 = vpow2.f32 %v3792_v37 }
 0xa1b   :  { %5109 = vpow2.f32 %v3790_v40 }
 0xa1d   :  { %v5100_v35 = vpop.eup %5099 }
 0xa1e   :  { %1393 = vrot.lane.b32.xlu0 %v5100_v35, %s5385_s1 }
 0xa21   :  { %v5102_v54 = vpop.eup %5101 }
 0xa22   :  { %1296 = vrot.lane.b32.xlu1 %v5102_v54, %s5385_s1  ;;  %v5104_v39 = vpop.eup %5103 }
 0xa23   :  { %v1080_v41 = vadd.f32 1.0, %v5104_v39  ;;  %v5106_v43 = vpop.eup %5105 }
 0xa24   :  { %v1185_v44 = vadd.f32 1.0, %v5106_v43  ;;  %v5108_v45 = vpop.eup %5107 }
 0xa25   :  { %5111 = vrcp.f32 %v1080_v41  ;;  %v1387_v46 = vadd.f32 1.0, %v5108_v45  ;;  %v5110_v47 = vpop.eup %5109 }
 0xa26   :  { %5113 = vrcp.f32 %v1185_v44  ;;  %v1290_v51 = vadd.f32 1.0, %v5110_v47 }
 0xa27   :  { %5115 = vrcp.f32 %v1387_v46 }
 0xa28   :  { %5117 = vrcp.f32 %v1290_v51 }
 0xa2f   :  { %v5112_v56 = vpop.eup %5111 }
 0xa30   :  { %v5114_v52 = vpop.eup %5113  ;;  %v1084_v10 = vmul.f32 0.0, %v5112_v56 }
 0xa31   :  { %v5116_v63 = vpop.eup %5115  ;;  %v1189_v19 = vmul.f32 %v5114_v52, %v5674_v18 }
 0xa32   :  { %v5118_v5 = vpop.eup %5117  ;;  %v1391_v26 = vmul.f32 %v5116_v63, %v5682_v27 }
 0xa33   :  { %v1294_v34 = vmul.f32 %v5118_v5, %v5678_v24 }
 0xa84   :  { %v1087_v48 = vpop.permute.xlu1 %1086 }
 0xa85   :  { %v1089_v49 = vmul.f32 %v5112_v56, %v1087_v48 }
 0xa87   :  { %1091 = vrot.lane.b32.xlu1 %v1089_v49, %s5386_s28 }
 0xa88   :  { %v1192_v53 = vpop.permute.xlu0 %1191 }
 0xa89   :  { %v1194_v59 = vmul.f32 %v5114_v52, %v1192_v53 }
 0xa8b   :  { %1196 = vrot.lane.b32.xlu0 %v1194_v59, %s5386_s28 }
 0xa90   :  { %v1394_v0 = vpop.permute.xlu0 %1393 }
 0xa91   :  { %v1396_v3 = vmul.f32 %v5116_v63, %v1394_v0 }
 0xa93   :  { %1398 = vrot.lane.b32.xlu0 %v1396_v3, %s5386_s28 }
 0xa94   :  { %v1297_v8 = vpop.permute.xlu1 %1296 }
 0xa95   :  { %v1299_v9 = vmul.f32 %v5118_v5, %v1297_v8 }
 0xa97   :  { %1301 = vrot.lane.b32.xlu1 %v1299_v9, %s5386_s28 }
 0xaf9   :  { %v1092_v13 = vpop.permute.xlu1 %1091 }
 0xafa   :  { %v5770_v15 = vadd.f32 %v1092_v13, %v1084_v10 }
 0xafc   :  { %5119 = vtanh.f32 %v5770_v15 }
 0xafd   :  { %v1197_v20 = vpop.permute.xlu0 %1196 }
 0xafe   :  { %v5774_v25 = vadd.f32 %v1197_v20, %v1189_v19  ;;  %v325_v20 = vadd.f32 %v5541_v50, %v5552_v58 }
 0xb00   :  { %5121 = vtanh.f32 %v5774_v25 }
 0xb05   :  { %v1399_v28 = vpop.permute.xlu0 %1398 }
 0xb06   :  { %v5120_v30 = vpop.eup %5119  ;;  %v5778_v32 = vadd.f32 %v1399_v28, %v1391_v26 }
 0xb07   :  { %1097 = vrot.lane.b32.xlu1 %v5120_v30, %s5385_s1 }
 0xb08   :  { %5123 = vtanh.f32 %v5778_v32 }
 0xb09   :  { %v1302_v35 = vpop.permute.xlu1 %1301 }
 0xb0a   :  { %v5122_v54 = vpop.eup %5121  ;;  %v5783_v18 = vadd.f32 %v1302_v35, %v1294_v34 }
 0xb0b   :  { %1202 = vrot.lane.b32.xlu0 %v5122_v54, %s5385_s1 }
 0xb0c   :  { %5125 = vtanh.f32 %v5783_v18 }
 0xb12   :  { %v5124_v55 = vpop.eup %5123 }
 0xb13   :  { %1404 = vrot.lane.b32.xlu0 %v5124_v55, %s5385_s1 }
 0xb16   :  { %v5126_v27 = vpop.eup %5125 }
 0xb17   :  { %1307 = vrot.lane.b32.xlu1 %v5126_v27, %s5385_s1 }
 0xb79   :  { %v1098_v36 = vpop.permute.xlu1 %1097 }
 0xb7a   :  { %v1100_v37 = vmul.f32 %v5112_v56, %v1098_v36 }
 0xb7c   :  { %1413 = vrot.lane.b32.xlu0 %v1100_v37, %s5385_s1 }
 0xb7d   :  { %v1203_v39 = vpop.permute.xlu0 %1202 }
 0xb7e   :  { %v1205_v24 = vmul.f32 %v5114_v52, %v1203_v39 }
 0xb80   :  { %1409 = vrot.lane.b32.xlu1 %v1205_v24, %s5386_s28  ;;  %1518 = vrot.lane.b32.xlu0 %v1205_v24, %s5385_s1 }
 0xb85   :  { %v1405_v43 = vpop.permute.xlu0 %1404 }
 0xb86   :  { %v1407_v44 = vmul.f32 %v5116_v63, %v1405_v43 }
 0xb89   :  { %v1308_v40 = vpop.permute.xlu1 %1307 }
 0xb8a   :  { %v1310_v41 = vmul.f32 %v5118_v5, %v1308_v40 }
 0xb8c   :  { %1515 = vrot.lane.b32.xlu1 %v1310_v41, %s5386_s28  ;;  %1623 = vrot.lane.b32.xlu0 %v1310_v41, %s5385_s1 }
 0xb90   :  { %1620 = vrot.lane.b32.xlu1 %v1407_v44, %s5386_s28 }
 0xbee   :  { %v1414_v45 = vpop.permute.xlu0 %1413 }
 0xbf2   :  { %v1410_v46 = vpop.permute.xlu1 %1409  ;;  %v1519_v56 = vpop.permute.xlu0 %1518 }
 0xbf3   :  { %v1416_v47 = vsel %vm213_vm3, %v1410_v46, %v1414_v45 }
 0xbf4   :  { %4323 = vmatmul.mubr.msk.f32.vlgmr.msra.gmra.mrb[18].mxu1 %vm466_vm4, %v1416_v47 }
 0xbf5   :  { %4822 = vmatpush3.bf16.msra.mxu1 %v5563_v12  ;;  %4360 = vmatprep.mubr.msk.f32.mxu1 %vm5383_vm2, %v5384_v22 }
 0xbf6   :  { %4823 = vmatprep.subr.bf16.mxu1 %v5382_v7 }
 0xbf9   :  { %4825 = vmatpush3.bf16.msra.mxu1 %v5566_v14 }
 0xbfa   :  { %4826 = vmatprep.subr.bf16.mxu1 %v5382_v7 }
 0xbfd   :  { %4828 = vmatpush3.bf16.msra.mxu1 %v5570_v17 }
 0xbfe   :  { %v1516_v48 = vpop.permute.xlu1 %1515  ;;  %4829 = vmatprep.subr.bf16.mxu1 %v5382_v7  ;;  %v1624_v51 = vpop.permute.xlu0 %1623 }
 0xbff   :  { %v1521_v49 = vsel %vm213_vm3, %v1516_v48, %v1519_v56 }
 0xc00   :  { %4342 = vmatmul.mubr.msk.f32.vlgmr.msra.gmra.mrb[18].mxu0 %vm466_vm4, %v1521_v49 }
 0xc01   :  { %4834 = vmatpush3.bf16.msra.mxu0 %v5466_v6  ;;  %4831 = vmatpush3.bf16.msra.mxu1 %v5575_v23 }
 0xc02   :  { %v1621_v52 = vpop.permute.xlu1 %1620  ;;  %4835 = vmatprep.subr.bf16.mxu0 %v5382_v7  ;;  %4371 = vmatprep.mubr.msk.f32.mxu0 %vm5383_vm2, %v5384_v22 }
 0xc03   :  { %v1626_v53 = vsel %vm213_vm3, %v1621_v52, %v1624_v51  ;;  %4850 = vmatprep.subr.bf16.mxu1 %v5382_v7 }
 0xc04   :  { %4361 = vmatmul.mubr.msk.f32.vlgmr.msra.gmra.mrb[20].mxu1 %vm466_vm4, %v1626_v53 }
 0xc05   :  { %4837 = vmatpush3.bf16.msra.mxu0 %v5511_v21  ;;  %4852 = vmatpush3.bf16.msra.mxu1 %v5615_v2 }
 0xc06   :  { %4838 = vmatprep.subr.bf16.mxu0 %v5382_v7  ;;  %4853 = vmatprep.subr.bf16.mxu1 %v5382_v7 }
 0xc07   :  { %4409 = vmatprep.mubr.msk.f32.mxu1 %vm5383_vm2, %v5384_v22 }
 0xc08   :  { %4372 = vmatmul.mubr.msk.f32.vlgmr.msra.gmra.mrb[20].mxu0 %vm213_vm3, %v1621_v52 }
 0xc09   :  { %4840 = vmatpush3.bf16.msra.mxu0 %v5685_v33  ;;  %4855 = vmatpush3.bf16.msra.mxu1 %v5618_v4 }
 0xc0a   :  { %4841 = vmatprep.subr.bf16.mxu0 %v5382_v7  ;;  %4856 = vmatprep.subr.bf16.mxu1 %v5382_v7 }
 0xc0b   :  { %4390 = vmatprep.mubr.msk.f32.mxu0 %vm5383_vm2, %v5384_v22 }
 0xc0d   :  { %4843 = vmatpush3.bf16.msra.mxu0 %v5689_v62  ;;  %4858 = vmatpush3.bf16.msra.mxu1 %v5624_v11 }
 0xc0e   :  { %4844 = vmatprep.subr.bf16.mxu0 %v5382_v7  ;;  %4859 = vmatprep.subr.bf16.mxu1 %v5382_v7 }
 0xc11   :  { %4846 = vmatpush3.bf16.msra.mxu0 %v5694_v38  ;;  %4861 = vmatpush3.bf16.msra.mxu1 %v5628_v16 }
 0xc12   :  { %4847 = vmatprep.subr.bf16.mxu0 %v5382_v7  ;;  %4874 = vmatprep.subr.bf16.mxu1 %v5382_v7 }
 0xc15   :  { %4849 = vmatpush3.bf16.msra.mxu0 %v5699_v42 }
 0xc16   :  { %4862 = vmatprep.subr.bf16.mxu0 %v5382_v7 }
 0xcc7   :  { %v1486_v59 = vpop.f32.mrb[18].mxu1 }
 0xcc8   :  { %v1487_v63 = vadd.f32 %v5755_v1, %v1486_v59  ;;  %v4324_v0 = vpop.f32.mrb[19].mxu1 }
 0xcca   :  { %5127 = vtanh.f32 %v1487_v63  ;;  %v3794_v55 = vmul.f32 -1.442695, %v1487_v63 }
 0xcd3   :  { %v1591_v3 = vpop.f32.mrb[18].mxu0 }
 0xcd4   :  { %v5128_v5 = vpop.eup %5127  ;;  %v1592_v8 = vadd.f32 %v5662_v31, %v1591_v3  ;;  %v4343_v9 = vpop.f32.mrb[19].mxu0 }
 0xcd5   :  { %1499 = vrot.lane.b32.xlu1 %v5128_v5, %s5385_s1 }
 0xcd6   :  { %5129 = vtanh.f32 %v1592_v8 }
 0xcd7   :  { %v1696_v10 = vpop.f32.mrb[20].mxu1 }
 0xcd8   :  { %v1697_v13 = vadd.f32 %v5601_v29, %v1696_v10  ;;  %v4362_v19 = vpop.f32.mrb[21].mxu1  ;;  %v3796_v29 = vmul.f32 -1.442695, %v1592_v8 }
 0xcda   :  { %5131 = vtanh.f32 %v1697_v13  ;;  %v3798_v50 = vmul.f32 -1.442695, %v1697_v13 }
 0xcdb   :  { %v1792_v26 = vpop.f32.mrb[20].mxu0 }
 0xcdc   :  { %v1796_v28 = vadd.f32 %v1792_v26, %v325_v20  ;;  %v4373_v30 = vpop.f32.mrb[21].mxu0 }
 0xcde   :  { %5133 = vtanh.f32 %v1796_v28  ;;  %v3800_v36 = vmul.f32 -1.442695, %v1796_v28 }
 0xcdf   :  { %5135 = vpow2.f32 %v3794_v55 }
 0xce0   :  { %v5130_v34 = vpop.eup %5129  ;;  %5137 = vpow2.f32 %v3796_v29 }
 0xce1   :  { %1604 = vrot.lane.b32.xlu0 %v5130_v34, %s5385_s1  ;;  %5139 = vpow2.f32 %v3798_v50 }
 0xce4   :  { %v5132_v35 = vpop.eup %5131 }
 0xce5   :  { %1709 = vrot.lane.b32.xlu1 %v5132_v35, %s5385_s1 }
 0xce8   :  { %v5134_v54 = vpop.eup %5133 }
 0xce9   :  { %1806 = vrot.lane.b32.xlu0 %v5134_v54, %s5385_s1  ;;  %v5136_v27 = vpop.eup %5135 }
 0xcea   :  { %v1493_v58 = vadd.f32 1.0, %v5136_v27  ;;  %v5138_v37 = vpop.eup %5137 }
 0xceb   :  { %v1598_v39 = vadd.f32 1.0, %v5138_v37  ;;  %v5140_v24 = vpop.eup %5139 }
 0xcec   :  { %5141 = vrcp.f32 %v1493_v58  ;;  %v1703_v44 = vadd.f32 1.0, %v5140_v24 }
 0xced   :  { %5143 = vpow2.f32 %v3800_v36 }
 0xcee   :  { %5145 = vrcp.f32 %v1598_v39 }
 0xcef   :  { %5147 = vrcp.f32 %v1703_v44 }
 0xcf6   :  { %v5142_v40 = vpop.eup %5141 }
 0xcf7   :  { %v5144_v45 = vpop.eup %5143  ;;  %v1497_v0 = vmul.f32 %v5142_v40, %v5770_v15 }
 0xcf8   :  { %v1800_v46 = vadd.f32 1.0, %v5144_v45  ;;  %v5146_v47 = vpop.eup %5145 }
 0xcf9   :  { %v5148_v49 = vpop.eup %5147  ;;  %v1602_v8 = vmul.f32 %v5146_v47, %v5774_v25 }
 0xcfa   :  { %5149 = vrcp.f32 %v1800_v46  ;;  %v1707_v19 = vmul.f32 %v5148_v49, %v5783_v18 }
 0xd04   :  { %v5150_v53 = vpop.eup %5149 }
 0xd05   :  { %v1804_v15 = vmul.f32 %v5150_v53, %v5778_v32 }
 0xd47   :  { %v1500_v41 = vpop.permute.xlu1 %1499 }
 0xd48   :  { %v1502_v43 = vmul.f32 %v5142_v40, %v1500_v41 }
 0xd4a   :  { %1504 = vrot.lane.b32.xlu1 %v1502_v43, %s5386_s28 }
 0xd53   :  { %v1605_v56 = vpop.permute.xlu0 %1604 }
 0xd54   :  { %v1607_v48 = vmul.f32 %v5146_v47, %v1605_v56 }
 0xd56   :  { %1609 = vrot.lane.b32.xlu0 %v1607_v48, %s5386_s28 }
 0xd57   :  { %v1710_v51 = vpop.permute.xlu1 %1709 }
 0xd58   :  { %v1712_v52 = vmul.f32 %v5148_v49, %v1710_v51 }
 0xd5a   :  { %1714 = vrot.lane.b32.xlu1 %v1712_v52, %s5386_s28  ;;  %v5925_v52 = vld [vmem:[%s6293_s6] ss:$0 sm:$0xff] }
 0xd5b   :  { %v1807_v59 = vpop.permute.xlu0 %1806 }
 0xd5c   :  { %v1809_v63 = vmul.f32 %v5150_v53, %v1807_v59 }
 0xd5e   :  { %1811 = vrot.lane.b32.xlu0 %v1809_v63, %s5386_s28 }
 0xdbc   :  { %v1505_v3 = vpop.permute.xlu1 %1504 }
 0xdbd   :  { %v5852_v5 = vadd.f32 %v1505_v3, %v1497_v0 }
 0xdbf   :  { %5151 = vtanh.f32 %v5852_v5 }
 0xdc8   :  { %v1610_v9 = vpop.permute.xlu0 %1609 }
 0xdc9   :  { %v5152_v10 = vpop.eup %5151  ;;  %v5856_v13 = vadd.f32 %v1610_v9, %v1602_v8 }
 0xdca   :  { %1510 = vrot.lane.b32.xlu1 %v5152_v10, %s5385_s1 }
 0xdcb   :  { %5153 = vtanh.f32 %v5856_v13 }
 0xdcc   :  { %v1715_v20 = vpop.permute.xlu1 %1714 }
 0xdcd   :  { %v5861_v26 = vadd.f32 %v1715_v20, %v1707_v19 }
 0xdcf   :  { %5155 = vtanh.f32 %v5861_v26 }
 0xdd0   :  { %v1812_v28 = vpop.permute.xlu0 %1811 }
 0xdd1   :  { %v5865_v30 = vadd.f32 %v1812_v28, %v1804_v15 }
 0xdd3   :  { %5157 = vtanh.f32 %v5865_v30 }
 0xdd5   :  { %v5154_v25 = vpop.eup %5153 }
 0xdd6   :  { %1615 = vrot.lane.b32.xlu0 %v5154_v25, %s5385_s1 }
 0xdd9   :  { %v5156_v34 = vpop.eup %5155 }
 0xdda   :  { %1720 = vrot.lane.b32.xlu1 %v5156_v34, %s5385_s1 }
 0xddd   :  { %v5158_v35 = vpop.eup %5157 }
 0xdde   :  { %1817 = vrot.lane.b32.xlu0 %v5158_v35, %s5385_s1 }
 0xe3c   :  { %v1511_v18 = vpop.permute.xlu1 %1510 }
 0xe3d   :  { %v1513_v54 = vmul.f32 %v5142_v40, %v1511_v18 }
 0xe3f   :  { %1826 = vrot.lane.b32.xlu0 %v1513_v54, %s5385_s1 }
 0xe48   :  { %v1616_v55 = vpop.permute.xlu0 %1615 }
 0xe49   :  { %v1618_v32 = vmul.f32 %v5146_v47, %v1616_v55 }
 0xe4b   :  { %1931 = vrot.lane.b32.xlu0 %v1618_v32, %s5385_s1  ;;  %1822 = vrot.lane.b32.xlu1 %v1618_v32, %s5386_s28 }
 0xe4c   :  { %v1721_v29 = vpop.permute.xlu1 %1720 }
 0xe4d   :  { %v1723_v27 = vmul.f32 %v5148_v49, %v1721_v29 }
 0xe4f   :  { %2036 = vrot.lane.b32.xlu0 %v1723_v27, %s5385_s1  ;;  %1928 = vrot.lane.b32.xlu1 %v1723_v27, %s5386_s28 }
 0xe50   :  { %v1818_v50 = vpop.permute.xlu0 %1817 }
 0xe51   :  { %v1820_v58 = vmul.f32 %v5150_v53, %v1818_v50  ;;  %v330_v53 = vadd.f32 %v5925_v52, %v5550_v57 }
 0xe53   :  { %2033 = vrot.lane.b32.xlu1 %v1820_v58, %s5386_s28 }
 0xeb1   :  { %v1827_v36 = vpop.permute.xlu0 %1826 }
 0xebd   :  { %v1823_v37 = vpop.permute.xlu1 %1822  ;;  %v1932_v24 = vpop.permute.xlu0 %1931 }
 0xebe   :  { %v1829_v39 = vsel %vm213_vm3, %v1823_v37, %v1827_v36 }
 0xebf   :  { %4391 = vmatmul.mubr.msk.f32.vlgmr.msra.gmra.mrb[22].mxu0 %vm466_vm4, %v1829_v39 }
 0xec0   :  { %4864 = vmatpush3.bf16.msra.mxu0 %v5563_v12  ;;  %4428 = vmatprep.mubr.msk.f32.mxu0 %vm5383_vm2, %v5384_v22 }
 0xec1   :  { %v1929_v40 = vpop.permute.xlu1 %1928  ;;  %4865 = vmatprep.subr.bf16.mxu0 %v5382_v7  ;;  %v2037_v44 = vpop.permute.xlu0 %2036 }
 0xec2   :  { %v1934_v41 = vsel %vm213_vm3, %v1929_v40, %v1932_v24 }
 0xec3   :  { %4410 = vmatmul.mubr.msk.f32.vlgmr.msra.gmra.mrb[22].mxu1 %vm466_vm4, %v1934_v41 }
 0xec4   :  { %4867 = vmatpush3.bf16.msra.mxu0 %v5566_v14  ;;  %4876 = vmatpush3.bf16.msra.mxu1 %v5466_v6 }
 0xec5   :  { %4868 = vmatprep.subr.bf16.mxu0 %v5382_v7  ;;  %4877 = vmatprep.subr.bf16.mxu1 %v5382_v7  ;;  %v2034_v43 = vpop.permute.xlu1 %2033 }
 0xec6   :  { %4439 = vmatprep.mubr.msk.f32.mxu1 %vm5383_vm2, %v5384_v22  ;;  %v2039_v45 = vsel %vm213_vm3, %v2034_v43, %v2037_v44 }
 0xec8   :  { %4870 = vmatpush3.bf16.msra.mxu0 %v5570_v17  ;;  %4879 = vmatpush3.bf16.msra.mxu1 %v5511_v21 }
 0xec9   :  { %4871 = vmatprep.subr.bf16.mxu0 %v5382_v7  ;;  %4880 = vmatprep.subr.bf16.mxu1 %v5382_v7 }
 0xecb   :  { %4440 = vmatmul.mubr.msk.f32.vlgmr.msra.gmra.mrb[24].mxu1 %vm213_vm3, %v2034_v43 }
 0xecc   :  { %4873 = vmatpush3.bf16.msra.mxu0 %v5575_v23  ;;  %4882 = vmatpush3.bf16.msra.mxu1 %v5685_v33 }
 0xecd   :  { %4883 = vmatprep.subr.bf16.mxu1 %v5382_v7  ;;  %4892 = vmatprep.subr.bf16.mxu0 %v5382_v7 }
 0xece   :  { %4458 = vmatprep.mubr.msk.f32.mxu1 %vm5383_vm2, %v5384_v22 }
 0xecf   :  { %4429 = vmatmul.mubr.msk.f32.vlgmr.msra.gmra.mrb[24].mxu0 %vm466_vm4, %v2039_v45 }
 0xed0   :  { %4885 = vmatpush3.bf16.msra.mxu1 %v5689_v62  ;;  %4894 = vmatpush3.bf16.msra.mxu0 %v5615_v2 }
 0xed1   :  { %4886 = vmatprep.subr.bf16.mxu1 %v5382_v7  ;;  %4895 = vmatprep.subr.bf16.mxu0 %v5382_v7 }
 0xed2   :  { %4477 = vmatprep.mubr.msk.f32.mxu0 %vm5383_vm2, %v5384_v22 }
 0xed4   :  { %4888 = vmatpush3.bf16.msra.mxu1 %v5694_v38  ;;  %4897 = vmatpush3.bf16.msra.mxu0 %v5618_v4 }
 0xed5   :  { %4889 = vmatprep.subr.bf16.mxu1 %v5382_v7  ;;  %4898 = vmatprep.subr.bf16.mxu0 %v5382_v7 }
 0xed8   :  { %4891 = vmatpush3.bf16.msra.mxu1 %v5699_v42  ;;  %4900 = vmatpush3.bf16.msra.mxu0 %v5624_v11 }
 0xed9   :  { %4904 = vmatprep.subr.bf16.mxu1 %v5382_v7  ;;  %4901 = vmatprep.subr.bf16.mxu0 %v5382_v7 }
 0xedc   :  { %4903 = vmatpush3.bf16.msra.mxu0 %v5628_v16 }
 0xedd   :  { %4916 = vmatprep.subr.bf16.mxu0 %v5382_v7 }
 0xf92   :  { %v1899_v46 = vpop.f32.mrb[22].mxu0 }
 0xf93   :  { %v1900_v47 = vadd.f32 %v5755_v1, %v1899_v46  ;;  %v4392_v56 = vpop.f32.mrb[23].mxu0 }
 0xf95   :  { %5159 = vtanh.f32 %v1900_v47  ;;  %v3802_v15 = vmul.f32 -1.442695, %v1900_v47 }
 0xf96   :  { %v2004_v48 = vpop.f32.mrb[22].mxu1 }
 0xf97   :  { %v2005_v49 = vadd.f32 %v5662_v31, %v2004_v48  ;;  %v4411_v51 = vpop.f32.mrb[23].mxu1  ;;  %v5933_v31 = vld [vmem:[%s6293_s6 + $0x1] ss:$0 sm:$0xff] }
 0xf99   :  { %5161 = vtanh.f32 %v2005_v49  ;;  %v3804_v28 = vmul.f32 -1.442695, %v2005_v49 }
 0xf9e   :  { %v2205_v59 = vpop.f32.mrb[24].mxu1 }
 0xf9f   :  { %v5160_v63 = vpop.eup %5159  ;;  %v2209_v0 = vadd.f32 %v2205_v59, %v330_v53  ;;  %v4441_v3 = vpop.f32.mrb[25].mxu1 }
 0xfa0   :  { %1912 = vrot.lane.b32.xlu1 %v5160_v63, %s5385_s1 }
 0xfa1   :  { %5163 = vtanh.f32 %v2209_v0  ;;  %v3808_v25 = vmul.f32 -1.442695, %v2209_v0 }
 0xfa2   :  { %v2109_v8 = vpop.f32.mrb[24].mxu0 }
 0xfa3   :  { %v5162_v9 = vpop.eup %5161  ;;  %v2110_v10 = vadd.f32 %v5933_v31, %v2109_v8  ;;  %v4430_v19 = vpop.f32.mrb[25].mxu0 }
 0xfa4   :  { %2017 = vrot.lane.b32.xlu0 %v5162_v9, %s5385_s1 }
 0xfa5   :  { %5165 = vtanh.f32 %v2110_v10  ;;  %v3806_v35 = vmul.f32 -1.442695, %v2110_v10 }
 0xfa6   :  { %5167 = vpow2.f32 %v3802_v15 }
 0xfa7   :  { %5169 = vpow2.f32 %v3804_v28 }
 0xfa8   :  { %5171 = vpow2.f32 %v3808_v25 }
 0xfa9   :  { %5173 = vpow2.f32 %v3806_v35 }
 0xfab   :  { %v5164_v57 = vpop.eup %5163 }
 0xfac   :  { %2219 = vrot.lane.b32.xlu0 %v5164_v57, %s5385_s1 }
 0xfaf   :  { %v5166_v20 = vpop.eup %5165 }
 0xfb0   :  { %2122 = vrot.lane.b32.xlu1 %v5166_v20, %s5385_s1  ;;  %v5168_v34 = vpop.eup %5167 }
 0xfb1   :  { %v1906_v18 = vadd.f32 1.0, %v5168_v34  ;;  %v5170_v54 = vpop.eup %5169 }
 0xfb2   :  { %v2011_v55 = vadd.f32 1.0, %v5170_v54  ;;  %v5172_v32 = vpop.eup %5171 }
 0xfb3   :  { %5175 = vrcp.f32 %v1906_v18  ;;  %v2213_v29 = vadd.f32 1.0, %v5172_v32  ;;  %v5174_v27 = vpop.eup %5173 }
 0xfb4   :  { %5177 = vrcp.f32 %v2011_v55  ;;  %v2116_v37 = vadd.f32 1.0, %v5174_v27 }
 0xfb5   :  { %5179 = vrcp.f32 %v2213_v29 }
 0xfb6   :  { %5181 = vrcp.f32 %v2116_v37 }
 0xfbd   :  { %v5176_v50 = vpop.eup %5175 }
 0xfbe   :  { %v5178_v39 = vpop.eup %5177  ;;  %v1910_v56 = vmul.f32 %v5176_v50, %v5852_v5 }
 0xfbf   :  { %v5180_v41 = vpop.eup %5179  ;;  %v2015_v51 = vmul.f32 %v5178_v39, %v5856_v13 }
 0xfc0   :  { %v5182_v45 = vpop.eup %5181  ;;  %v2217_v63 = vmul.f32 %v5180_v41, %v5865_v30 }
 0xfc1   :  { %v2120_v5 = vmul.f32 %v5182_v45, %v5861_v26 }
0x1012   :  { %v1913_v58 = vpop.permute.xlu1 %1912 }
0x1013   :  { %v1915_v36 = vmul.f32 %v5176_v50, %v1913_v58 }
0x1015   :  { %1917 = vrot.lane.b32.xlu1 %v1915_v36, %s5386_s28 }
0x1016   :  { %v2018_v24 = vpop.permute.xlu0 %2017 }
0x1017   :  { %v2020_v40 = vmul.f32 %v5178_v39, %v2018_v24 }
0x1019   :  { %2022 = vrot.lane.b32.xlu0 %v2020_v40, %s5386_s28 }
0x101e   :  { %v2220_v43 = vpop.permute.xlu0 %2219 }
0x101f   :  { %v2222_v44 = vmul.f32 %v5180_v41, %v2220_v43  ;;  %v6016_v43 = vld [vmem:[%s6293_s6 + $0x2] ss:$0 sm:$0xff] }
0x1021   :  { %2224 = vrot.lane.b32.xlu0 %v2222_v44, %s5386_s28 }
0x1022   :  { %v2123_v46 = vpop.permute.xlu1 %2122 }
0x1023   :  { %v2125_v47 = vmul.f32 %v5182_v45, %v2123_v46 }
0x1025   :  { %2127 = vrot.lane.b32.xlu1 %v2125_v47, %s5386_s28 }
0x1087   :  { %v1918_v48 = vpop.permute.xlu1 %1917 }
0x1088   :  { %v5944_v49 = vadd.f32 %v1918_v48, %v1910_v56 }
0x108a   :  { %5183 = vtanh.f32 %v5944_v49 }
0x108b   :  { %v2023_v53 = vpop.permute.xlu0 %2022 }
0x108c   :  { %v5948_v59 = vadd.f32 %v2023_v53, %v2015_v51 }
0x108e   :  { %5185 = vtanh.f32 %v5948_v59 }
0x1093   :  { %v2225_v0 = vpop.permute.xlu0 %2224 }
0x1094   :  { %v5184_v3 = vpop.eup %5183  ;;  %v5952_v8 = vadd.f32 %v2225_v0, %v2217_v63 }
0x1095   :  { %1923 = vrot.lane.b32.xlu1 %v5184_v3, %s5385_s1 }
0x1096   :  { %5187 = vtanh.f32 %v5952_v8 }
0x1097   :  { %v2128_v9 = vpop.permute.xlu1 %2127 }
0x1098   :  { %v5186_v10 = vpop.eup %5185  ;;  %v5957_v13 = vadd.f32 %v2128_v9, %v2120_v5 }
0x1099   :  { %2028 = vrot.lane.b32.xlu0 %v5186_v10, %s5385_s1 }
0x109a   :  { %5189 = vtanh.f32 %v5957_v13 }
0x10a0   :  { %v5188_v19 = vpop.eup %5187 }
0x10a1   :  { %2230 = vrot.lane.b32.xlu0 %v5188_v19, %s5385_s1 }
0x10a4   :  { %v5190_v30 = vpop.eup %5189 }
0x10a5   :  { %2133 = vrot.lane.b32.xlu1 %v5190_v30, %s5385_s1 }
0x1107   :  { %v1924_v57 = vpop.permute.xlu1 %1923 }
0x1108   :  { %v1926_v20 = vmul.f32 %v5176_v50, %v1924_v57 }
0x110a   :  { %2239 = vrot.lane.b32.xlu0 %v1926_v20, %s5385_s1 }
0x110b   :  { %v2029_v15 = vpop.permute.xlu0 %2028 }
0x110c   :  { %v2031_v26 = vmul.f32 %v5178_v39, %v2029_v15 }
0x110e   :  { %2235 = vrot.lane.b32.xlu1 %v2031_v26, %s5386_s28  ;;  %2344 = vrot.lane.b32.xlu0 %v2031_v26, %s5385_s1 }
0x1113   :  { %v2231_v34 = vpop.permute.xlu0 %2230 }
0x1114   :  { %v2233_v35 = vmul.f32 %v5180_v41, %v2231_v34 }
0x1117   :  { %v2134_v28 = vpop.permute.xlu1 %2133 }
0x1118   :  { %v2136_v25 = vmul.f32 %v5182_v45, %v2134_v28 }
0x111a   :  { %2341 = vrot.lane.b32.xlu1 %v2136_v25, %s5386_s28  ;;  %2449 = vrot.lane.b32.xlu0 %v2136_v25, %s5385_s1 }
0x111e   :  { %2446 = vrot.lane.b32.xlu1 %v2233_v35, %s5386_s28 }
0x117c   :  { %v2240_v18 = vpop.permute.xlu0 %2239 }
0x1180   :  { %v2236_v54 = vpop.permute.xlu1 %2235  ;;  %v2345_v32 = vpop.permute.xlu0 %2344 }
0x1181   :  { %v2242_v55 = vsel %vm213_vm3, %v2236_v54, %v2240_v18 }
0x1182   :  { %4459 = vmatmul.mubr.msk.f32.vlgmr.msra.gmra.mrb[26].mxu1 %vm466_vm4, %v2242_v55 }
0x1183   :  { %4906 = vmatpush3.bf16.msra.mxu1 %v5563_v12  ;;  %4496 = vmatprep.mubr.msk.f32.mxu1 %vm5383_vm2, %v5384_v22 }
0x1184   :  { %4907 = vmatprep.subr.bf16.mxu1 %v5382_v7 }
0x1187   :  { %4909 = vmatpush3.bf16.msra.mxu1 %v5566_v14 }
0x1188   :  { %4910 = vmatprep.subr.bf16.mxu1 %v5382_v7 }
0x118b   :  { %4912 = vmatpush3.bf16.msra.mxu1 %v5570_v17 }
0x118c   :  { %v2342_v29 = vpop.permute.xlu1 %2341  ;;  %4913 = vmatprep.subr.bf16.mxu1 %v5382_v7  ;;  %v2450_v50 = vpop.permute.xlu0 %2449 }
0x118d   :  { %v2347_v27 = vsel %vm213_vm3, %v2342_v29, %v2345_v32 }
0x118e   :  { %4478 = vmatmul.mubr.msk.f32.vlgmr.msra.gmra.mrb[26].mxu0 %vm466_vm4, %v2347_v27 }
0x118f   :  { %4918 = vmatpush3.bf16.msra.mxu0 %v5466_v6  ;;  %4915 = vmatpush3.bf16.msra.mxu1 %v5575_v23 }
0x1190   :  { %v2447_v58 = vpop.permute.xlu1 %2446  ;;  %4919 = vmatprep.subr.bf16.mxu0 %v5382_v7  ;;  %4507 = vmatprep.mubr.msk.f32.mxu0 %vm5383_vm2, %v5384_v22 }
0x1191   :  { %v2452_v36 = vsel %vm213_vm3, %v2447_v58, %v2450_v50  ;;  %4934 = vmatprep.subr.bf16.mxu1 %v5382_v7 }
0x1192   :  { %4497 = vmatmul.mubr.msk.f32.vlgmr.msra.gmra.mrb[28].mxu1 %vm466_vm4, %v2452_v36 }
0x1193   :  { %4921 = vmatpush3.bf16.msra.mxu0 %v5511_v21  ;;  %4936 = vmatpush3.bf16.msra.mxu1 %v5615_v2 }
0x1194   :  { %4922 = vmatprep.subr.bf16.mxu0 %v5382_v7  ;;  %4937 = vmatprep.subr.bf16.mxu1 %v5382_v7 }
0x1195   :  { %4545 = vmatprep.mubr.msk.f32.mxu1 %vm5383_vm2, %v5384_v22 }
0x1196   :  { %4508 = vmatmul.mubr.msk.f32.vlgmr.msra.gmra.mrb[28].mxu0 %vm213_vm3, %v2447_v58 }
0x1197   :  { %4924 = vmatpush3.bf16.msra.mxu0 %v5685_v33  ;;  %4939 = vmatpush3.bf16.msra.mxu1 %v5618_v4 }
0x1198   :  { %4925 = vmatprep.subr.bf16.mxu0 %v5382_v7  ;;  %4940 = vmatprep.subr.bf16.mxu1 %v5382_v7 }
0x1199   :  { %4526 = vmatprep.mubr.msk.f32.mxu0 %vm5383_vm2, %v5384_v22 }
0x119b   :  { %4927 = vmatpush3.bf16.msra.mxu0 %v5689_v62  ;;  %4942 = vmatpush3.bf16.msra.mxu1 %v5624_v11 }
0x119c   :  { %4928 = vmatprep.subr.bf16.mxu0 %v5382_v7  ;;  %4943 = vmatprep.subr.bf16.mxu1 %v5382_v7 }
0x119f   :  { %4930 = vmatpush3.bf16.msra.mxu0 %v5694_v38  ;;  %4945 = vmatpush3.bf16.msra.mxu1 %v5628_v16 }
0x11a0   :  { %4931 = vmatprep.subr.bf16.mxu0 %v5382_v7  ;;  %4958 = vmatprep.subr.bf16.mxu1 %v5382_v7 }
0x11a3   :  { %4933 = vmatpush3.bf16.msra.mxu0 %v5699_v42 }
0x11a4   :  { %4946 = vmatprep.subr.bf16.mxu0 %v5382_v7 }
0x1255   :  { %v2312_v37 = vpop.f32.mrb[26].mxu1 }
0x1256   :  { %v2313_v39 = vadd.f32 %v5755_v1, %v2312_v37  ;;  %v4460_v24 = vpop.f32.mrb[27].mxu1  ;;  %v335_v1 = vadd.f32 %v5925_v52, %v5557_v61 }
0x1258   :  { %5191 = vtanh.f32 %v2313_v39  ;;  %v3810_v5 = vmul.f32 -1.442695, %v2313_v39 }
0x1261   :  { %v2417_v40 = vpop.f32.mrb[26].mxu0 }
0x1262   :  { %v5192_v41 = vpop.eup %5191  ;;  %v2418_v44 = vadd.f32 %v6016_v43, %v2417_v40  ;;  %v4479_v45 = vpop.f32.mrb[27].mxu0 }
0x1263   :  { %2325 = vrot.lane.b32.xlu1 %v5192_v41, %s5385_s1 }
0x1264   :  { %5193 = vtanh.f32 %v2418_v44  ;;  %v3812_v9 = vmul.f32 -1.442695, %v2418_v44 }
0x1265   :  { %v2522_v46 = vpop.f32.mrb[28].mxu1 }
0x1266   :  { %v2523_v47 = vadd.f32 %v5933_v31, %v2522_v46  ;;  %v4498_v56 = vpop.f32.mrb[29].mxu1 }
0x1268   :  { %5195 = vtanh.f32 %v2523_v47  ;;  %v3814_v61 = vmul.f32 -1.442695, %v2523_v47 }
0x1269   :  { %v2618_v48 = vpop.f32.mrb[28].mxu0 }
0x126a   :  { %v2622_v51 = vadd.f32 %v2618_v48, %v335_v1  ;;  %v4509_v53 = vpop.f32.mrb[29].mxu0 }
0x126c   :  { %5197 = vtanh.f32 %v2622_v51  ;;  %v3816_v30 = vmul.f32 -1.442695, %v2622_v51 }
0x126d   :  { %5199 = vpow2.f32 %v3810_v5 }
0x126e   :  { %v5194_v63 = vpop.eup %5193  ;;  %5201 = vpow2.f32 %v3812_v9 }
0x126f   :  { %2430 = vrot.lane.b32.xlu0 %v5194_v63, %s5385_s1  ;;  %5203 = vpow2.f32 %v3814_v61 }
0x1272   :  { %v5196_v0 = vpop.eup %5195 }
0x1273   :  { %2535 = vrot.lane.b32.xlu1 %v5196_v0, %s5385_s1 }
0x1276   :  { %v5198_v3 = vpop.eup %5197 }
0x1277   :  { %2632 = vrot.lane.b32.xlu0 %v5198_v3, %s5385_s1  ;;  %v5200_v10 = vpop.eup %5199 }
0x1278   :  { %v2319_v19 = vadd.f32 1.0, %v5200_v10  ;;  %v5202_v57 = vpop.eup %5201 }
0x1279   :  { %v2424_v20 = vadd.f32 1.0, %v5202_v57  ;;  %v5204_v15 = vpop.eup %5203 }
0x127a   :  { %5205 = vrcp.f32 %v2319_v19  ;;  %v2529_v34 = vadd.f32 1.0, %v5204_v15 }
0x127b   :  { %5207 = vpow2.f32 %v3816_v30 }
0x127c   :  { %5209 = vrcp.f32 %v2424_v20 }
0x127d   :  { %5211 = vrcp.f32 %v2529_v34  ;;  %v6102_v34 = vld [vmem:[%s6293_s6 + $0x3] ss:$0 sm:$0xff]  ;;  %s5387_s6 = smov 96  }
0x1284   :  { %v5206_v26 = vpop.eup %5205 }
0x1285   :  { %v5208_v35 = vpop.eup %5207  ;;  %v2323_v39 = vmul.f32 %v5206_v26, %v5944_v49 }
0x1286   :  { %v2626_v18 = vadd.f32 1.0, %v5208_v35  ;;  %v5210_v54 = vpop.eup %5209 }
0x1287   :  { %v5212_v29 = vpop.eup %5211  ;;  %v2428_v41 = vmul.f32 %v5210_v54, %v5948_v59 }
0x1288   :  { %5213 = vrcp.f32 %v2626_v18  ;;  %v2533_v47 = vmul.f32 %v5212_v29, %v5957_v13 }
0x1292   :  { %v5214_v58 = vpop.eup %5213 }
0x1293   :  { %v2630_v49 = vmul.f32 %v5214_v58, %v5952_v8 }
0x12d5   :  { %v2326_v28 = vpop.permute.xlu1 %2325 }
0x12d6   :  { %v2328_v25 = vmul.f32 %v5206_v26, %v2326_v28 }
0x12d8   :  { %2330 = vrot.lane.b32.xlu1 %v2328_v25, %s5386_s28 }
0x12e1   :  { %v2431_v55 = vpop.permute.xlu0 %2430 }
0x12e2   :  { %v2433_v32 = vmul.f32 %v5210_v54, %v2431_v55 }
0x12e4   :  { %2435 = vrot.lane.b32.xlu0 %v2433_v32, %s5386_s28 }
0x12e5   :  { %v2536_v27 = vpop.permute.xlu1 %2535 }
0x12e6   :  { %v2538_v50 = vmul.f32 %v5212_v29, %v2536_v27 }
0x12e8   :  { %2540 = vrot.lane.b32.xlu1 %v2538_v50, %s5386_s28 }
0x12e9   :  { %v2633_v36 = vpop.permute.xlu0 %2632 }
0x12ea   :  { %v2635_v37 = vmul.f32 %v5214_v58, %v2633_v36 }
0x12ec   :  { %2637 = vrot.lane.b32.xlu0 %v2635_v37, %s5386_s28 }
0x134a   :  { %v2331_v24 = vpop.permute.xlu1 %2330 }
0x134b   :  { %v6031_v40 = vadd.f32 %v2331_v24, %v2323_v39 }
0x134d   :  { %5215 = vtanh.f32 %v6031_v40 }
0x1356   :  { %v2436_v44 = vpop.permute.xlu0 %2435 }
0x1357   :  { %v5216_v45 = vpop.eup %5215  ;;  %v6035_v46 = vadd.f32 %v2436_v44, %v2428_v41 }
0x1358   :  { %2336 = vrot.lane.b32.xlu1 %v5216_v45, %s5385_s1 }
0x1359   :  { %5217 = vtanh.f32 %v6035_v46 }
0x135a   :  { %v2541_v56 = vpop.permute.xlu1 %2540 }
0x135b   :  { %v6040_v1 = vadd.f32 %v2541_v56, %v2533_v47 }
0x135d   :  { %5219 = vtanh.f32 %v6040_v1 }
0x135e   :  { %v2638_v48 = vpop.permute.xlu0 %2637 }
0x135f   :  { %v6044_v51 = vadd.f32 %v2638_v48, %v2630_v49 }
0x1361   :  { %5221 = vtanh.f32 %v6044_v51 }
0x1363   :  { %v5218_v59 = vpop.eup %5217 }
0x1364   :  { %2441 = vrot.lane.b32.xlu0 %v5218_v59, %s5385_s1 }
0x1367   :  { %v5220_v53 = vpop.eup %5219 }
0x1368   :  { %2546 = vrot.lane.b32.xlu1 %v5220_v53, %s5385_s1 }
0x136b   :  { %v5222_v63 = vpop.eup %5221 }
0x136c   :  { %2643 = vrot.lane.b32.xlu0 %v5222_v63, %s5385_s1 }
0x13ca   :  { %v2337_v13 = vpop.permute.xlu1 %2336 }
0x13cb   :  { %v2339_v0 = vmul.f32 %v5206_v26, %v2337_v13 }
0x13cd   :  { %2652 = vrot.lane.b32.xlu0 %v2339_v0, %s5385_s1 }
0x13d6   :  { %v2442_v3 = vpop.permute.xlu0 %2441 }
0x13d7   :  { %v2444_v8 = vmul.f32 %v5210_v54, %v2442_v3 }
0x13d9   :  { %2757 = vrot.lane.b32.xlu0 %v2444_v8, %s5385_s1  ;;  %2648 = vrot.lane.b32.xlu1 %v2444_v8, %s5386_s28 }
0x13da   :  { %v2547_v5 = vpop.permute.xlu1 %2546 }
0x13db   :  { %v2549_v9 = vmul.f32 %v5212_v29, %v2547_v5  ;;  %v340_v29 = vadd.f32 %v5925_v52, %v5555_v60 }
0x13dd   :  { %2862 = vrot.lane.b32.xlu0 %v2549_v9, %s5385_s1  ;;  %2754 = vrot.lane.b32.xlu1 %v2549_v9, %s5386_s28 }
0x13de   :  { %v2644_v10 = vpop.permute.xlu0 %2643 }
0x13df   :  { %v2646_v61 = vmul.f32 %v5214_v58, %v2644_v10 }
0x13e1   :  { %2859 = vrot.lane.b32.xlu1 %v2646_v61, %s5386_s28 }
0x143f   :  { %v2653_v19 = vpop.permute.xlu0 %2652 }
0x144b   :  { %v2649_v30 = vpop.permute.xlu1 %2648  ;;  %v2758_v20 = vpop.permute.xlu0 %2757 }
0x144c   :  { %v2655_v57 = vsel %vm213_vm3, %v2649_v30, %v2653_v19 }
0x144d   :  { %4527 = vmatmul.mubr.msk.f32.vlgmr.msra.gmra.mrb[30].mxu0 %vm466_vm4, %v2655_v57 }
0x144e   :  { %4948 = vmatpush3.bf16.msra.mxu0 %v5563_v12  ;;  %4564 = vmatprep.mubr.msk.f32.mxu0 %vm5383_vm2, %v5384_v22 }
0x144f   :  { %v2755_v15 = vpop.permute.xlu1 %2754  ;;  %4949 = vmatprep.subr.bf16.mxu0 %v5382_v7 }
0x1450   :  { %v2760_v26 = vsel %vm213_vm3, %v2755_v15, %v2758_v20 }
0x1451   :  { %4546 = vmatmul.mubr.msk.f32.vlgmr.msra.gmra.mrb[30].mxu1 %vm466_vm4, %v2760_v26 }
0x1452   :  { %4951 = vmatpush3.bf16.msra.mxu0 %v5566_v14  ;;  %4960 = vmatpush3.bf16.msra.mxu1 %v5466_v6  ;;  %v2863_v6 = vpop.permute.xlu0 %2862 }
0x1453   :  { %4952 = vmatprep.subr.bf16.mxu0 %v5382_v7  ;;  %4961 = vmatprep.subr.bf16.mxu1 %v5382_v7  ;;  %v2860_v28 = vpop.permute.xlu1 %2859 }
0x1454   :  { %4575 = vmatprep.mubr.msk.f32.mxu1 %vm5383_vm2, %v5384_v22  ;;  %v2865_v25 = vsel %vm213_vm3, %v2860_v28, %v2863_v6 }
0x1456   :  { %4954 = vmatpush3.bf16.msra.mxu0 %v5570_v17  ;;  %4963 = vmatpush3.bf16.msra.mxu1 %v5511_v21 }
0x1457   :  { %4955 = vmatprep.subr.bf16.mxu0 %v5382_v7  ;;  %4964 = vmatprep.subr.bf16.mxu1 %v5382_v7 }
0x1459   :  { %4576 = vmatmul.mubr.msk.f32.vlgmr.msra.gmra.mrb[32].mxu1 %vm213_vm3, %v2860_v28 }
0x145a   :  { %4957 = vmatpush3.bf16.msra.mxu0 %v5575_v23  ;;  %4966 = vmatpush3.bf16.msra.mxu1 %v5685_v33 }
0x145b   :  { %4967 = vmatprep.subr.bf16.mxu1 %v5382_v7  ;;  %4976 = vmatprep.subr.bf16.mxu0 %v5382_v7 }
0x145c   :  { %4594 = vmatprep.mubr.msk.f32.mxu1 %vm5383_vm2, %v5384_v22 }
0x145d   :  { %4565 = vmatmul.mubr.msk.f32.vlgmr.msra.gmra.mrb[32].mxu0 %vm466_vm4, %v2865_v25 }
0x145e   :  { %4969 = vmatpush3.bf16.msra.mxu1 %v5689_v62  ;;  %4978 = vmatpush3.bf16.msra.mxu0 %v5615_v2 }
0x145f   :  { %4970 = vmatprep.subr.bf16.mxu1 %v5382_v7  ;;  %4979 = vmatprep.subr.bf16.mxu0 %v5382_v7 }
0x1460   :  { %4613 = vmatprep.mubr.msk.f32.mxu0 %vm5383_vm2, %v5384_v22 }
0x1462   :  { %4972 = vmatpush3.bf16.msra.mxu1 %v5694_v38  ;;  %4981 = vmatpush3.bf16.msra.mxu0 %v5618_v4 }
0x1463   :  { %4973 = vmatprep.subr.bf16.mxu1 %v5382_v7  ;;  %4982 = vmatprep.subr.bf16.mxu0 %v5382_v7 }
0x1466   :  { %4975 = vmatpush3.bf16.msra.mxu1 %v5699_v42  ;;  %4984 = vmatpush3.bf16.msra.mxu0 %v5624_v11 }
0x1467   :  { %4988 = vmatprep.subr.bf16.mxu1 %v5382_v7  ;;  %4985 = vmatprep.subr.bf16.mxu0 %v5382_v7 }
0x146a   :  { %4987 = vmatpush3.bf16.msra.mxu0 %v5628_v16 }
0x146b   :  { %5000 = vmatprep.subr.bf16.mxu0 %v5382_v7 }
0x1520   :  { %v2725_v21 = vpop.f32.mrb[30].mxu0 }
0x1521   :  { %v2726_v35 = vadd.f32 %v6102_v34, %v2725_v21  ;;  %v4528_v18 = vpop.f32.mrb[31].mxu0 }
0x1523   :  { %5223 = vtanh.f32 %v2726_v35  ;;  %v3818_v60 = vmul.f32 -1.442695, %v2726_v35 }
0x1524   :  { %v2830_v54 = vpop.f32.mrb[30].mxu1 }
0x1525   :  { %v2831_v55 = vadd.f32 %v6016_v43, %v2830_v54  ;;  %v4547_v32 = vpop.f32.mrb[31].mxu1 }
0x1527   :  { %5225 = vtanh.f32 %v2831_v55  ;;  %v3820_v52 = vmul.f32 -1.442695, %v2831_v55 }
0x152c   :  { %v3031_v27 = vpop.f32.mrb[32].mxu1 }
0x152d   :  { %v5224_v50 = vpop.eup %5223  ;;  %v3035_v58 = vadd.f32 %v3031_v27, %v340_v29  ;;  %v4577_v36 = vpop.f32.mrb[33].mxu1 }
0x152e   :  { %2738 = vrot.lane.b32.xlu1 %v5224_v50, %s5385_s1 }
0x152f   :  { %5227 = vtanh.f32 %v3035_v58  ;;  %v3824_v47 = vmul.f32 -1.442695, %v3035_v58 }
0x1530   :  { %v2935_v37 = vpop.f32.mrb[32].mxu0 }
0x1531   :  { %v5226_v39 = vpop.eup %5225  ;;  %v2936_v24 = vadd.f32 %v5933_v31, %v2935_v37  ;;  %v4566_v41 = vpop.f32.mrb[33].mxu0 }
0x1532   :  { %2843 = vrot.lane.b32.xlu0 %v5226_v39, %s5385_s1 }
0x1533   :  { %5229 = vtanh.f32 %v2936_v24  ;;  %v3822_v49 = vmul.f32 -1.442695, %v2936_v24 }
0x1534   :  { %5231 = vpow2.f32 %v3818_v60 }
0x1535   :  { %5233 = vpow2.f32 %v3820_v52 }
0x1536   :  { %5235 = vpow2.f32 %v3824_v47 }
0x1537   :  { %5237 = vpow2.f32 %v3822_v49 }
0x1539   :  { %v5228_v44 = vpop.eup %5227 }
0x153a   :  { %3045 = vrot.lane.b32.xlu0 %v5228_v44, %s5385_s1 }
0x153d   :  { %v5230_v45 = vpop.eup %5229 }
0x153e   :  { %2948 = vrot.lane.b32.xlu1 %v5230_v45, %s5385_s1  ;;  %v5232_v56 = vpop.eup %5231 }
0x153f   :  { %v2732_v48 = vadd.f32 1.0, %v5232_v56  ;;  %v5234_v59 = vpop.eup %5233 }
0x1540   :  { %v2837_v53 = vadd.f32 1.0, %v5234_v59  ;;  %v5236_v63 = vpop.eup %5235 }
0x1541   :  { %5239 = vrcp.f32 %v2732_v48  ;;  %v3039_v13 = vadd.f32 1.0, %v5236_v63  ;;  %v5238_v0 = vpop.eup %5237 }
0x1542   :  { %5241 = vrcp.f32 %v2837_v53  ;;  %v2942_v9 = vadd.f32 1.0, %v5238_v0 }
0x1543   :  { %5243 = vrcp.f32 %v3039_v13 }
0x1544   :  { %5245 = vrcp.f32 %v2942_v9 }
0x154b   :  { %v5240_v3 = vpop.eup %5239 }
0x154c   :  { %v5242_v10 = vpop.eup %5241  ;;  %v2736_v6 = vmul.f32 %v5240_v3, %v6031_v40 }
0x154d   :  { %v5244_v30 = vpop.eup %5243  ;;  %v2841_v35 = vmul.f32 %v5242_v10, %v6035_v46 }
0x154e   :  { %v5246_v15 = vpop.eup %5245  ;;  %v3043_v55 = vmul.f32 %v5244_v30, %v6044_v51 }
0x154f   :  { %v2946_v40 = vmul.f32 %v5246_v15, %v6040_v1 }
0x15a0   :  { %v2739_v8 = vpop.permute.xlu1 %2738 }
0x15a1   :  { %v2741_v5 = vmul.f32 %v5240_v3, %v2739_v8 }
0x15a3   :  { %2743 = vrot.lane.b32.xlu1 %v2741_v5, %s5386_s28 }
0x15a4   :  { %v2844_v61 = vpop.permute.xlu0 %2843 }
0x15a5   :  { %v2846_v19 = vmul.f32 %v5242_v10, %v2844_v61 }
0x15a7   :  { %2848 = vrot.lane.b32.xlu0 %v2846_v19, %s5386_s28 }
0x15ac   :  { %v3046_v57 = vpop.permute.xlu0 %3045 }
0x15ad   :  { %v3048_v20 = vmul.f32 %v5244_v30, %v3046_v57 }
0x15af   :  { %3050 = vrot.lane.b32.xlu0 %v3048_v20, %s5386_s28 }
0x15b0   :  { %v2949_v26 = vpop.permute.xlu1 %2948 }
0x15b1   :  { %v2951_v28 = vmul.f32 %v5246_v15, %v2949_v26 }
0x15b3   :  { %2953 = vrot.lane.b32.xlu1 %v2951_v28, %s5386_s28 }
0x1615   :  { %v2744_v25 = vpop.permute.xlu1 %2743 }
0x1616   :  { %v6118_v21 = vadd.f32 %v2744_v25, %v2736_v6 }
0x1618   :  { %5247 = vtanh.f32 %v6118_v21 }
0x1619   :  { %v2849_v18 = vpop.permute.xlu0 %2848 }
0x161a   :  { %v6122_v54 = vadd.f32 %v2849_v18, %v2841_v35 }
0x161c   :  { %5249 = vtanh.f32 %v6122_v54 }
0x1621   :  { %v3051_v32 = vpop.permute.xlu0 %3050 }
0x1622   :  { %v5248_v29 = vpop.eup %5247  ;;  %v6126_v27 = vadd.f32 %v3051_v32, %v3043_v55 }
0x1623   :  { %2749 = vrot.lane.b32.xlu1 %v5248_v29, %s5385_s1 }
0x1624   :  { %5251 = vtanh.f32 %v6126_v27 }
0x1625   :  { %v2954_v50 = vpop.permute.xlu1 %2953 }
0x1626   :  { %v5250_v58 = vpop.eup %5249  ;;  %v6131_v46 = vadd.f32 %v2954_v50, %v2946_v40 }
0x1627   :  { %2854 = vrot.lane.b32.xlu0 %v5250_v58, %s5385_s1 }
0x1628   :  { %5253 = vtanh.f32 %v6131_v46 }
0x162e   :  { %v5252_v36 = vpop.eup %5251 }
0x162f   :  { %3056 = vrot.lane.b32.xlu0 %v5252_v36, %s5385_s1 }
0x1632   :  { %v5254_v51 = vpop.eup %5253 }
0x1633   :  { %2959 = vrot.lane.b32.xlu1 %v5254_v51, %s5385_s1 }
0x1695   :  { %v2750_v37 = vpop.permute.xlu1 %2749 }
0x1696   :  { %v2752_v39 = vmul.f32 %v5240_v3, %v2750_v37 }
0x1698   :  { %3065 = vrot.lane.b32.xlu0 %v2752_v39, %s5385_s1 }
0x1699   :  { %v2855_v24 = vpop.permute.xlu0 %2854 }
0x169a   :  { %v2857_v1 = vmul.f32 %v5242_v10, %v2855_v24 }
0x169c   :  { %3061 = vrot.lane.b32.xlu1 %v2857_v1, %s5386_s28  ;;  %3170 = vrot.lane.b32.xlu0 %v2857_v1, %s5385_s1 }
0x16a1   :  { %v3057_v45 = vpop.permute.xlu0 %3056 }
0x16a2   :  { %v3059_v60 = vmul.f32 %v5244_v30, %v3057_v45 }
0x16a5   :  { %v2960_v41 = vpop.permute.xlu1 %2959 }
0x16a6   :  { %v2962_v44 = vmul.f32 %v5246_v15, %v2960_v41 }
0x16a8   :  { %3167 = vrot.lane.b32.xlu1 %v2962_v44, %s5386_s28  ;;  %3275 = vrot.lane.b32.xlu0 %v2962_v44, %s5385_s1 }
0x16ac   :  { %3272 = vrot.lane.b32.xlu1 %v3059_v60, %s5386_s28 }
0x170a   :  { %v3066_v52 = vpop.permute.xlu0 %3065 }
0x170e   :  { %v3062_v47 = vpop.permute.xlu1 %3061  ;;  %v3171_v49 = vpop.permute.xlu0 %3170 }
0x170f   :  { %v3068_v56 = vsel %vm213_vm3, %v3062_v47, %v3066_v52 }
0x1710   :  { %4595 = vmatmul.mubr.msk.f32.vlgmr.msra.gmra.mrb[34].mxu1 %vm466_vm4, %v3068_v56 }
0x1711   :  { %4990 = vmatpush3.bf16.msra.mxu1 %v5563_v12  ;;  %4632 = vmatprep.mubr.msk.f32.mxu1 %vm5383_vm2, %v5384_v22 }
0x1712   :  { %4991 = vmatprep.subr.bf16.mxu1 %v5382_v7 }
0x1715   :  { %4993 = vmatpush3.bf16.msra.mxu1 %v5566_v14 }
0x1716   :  { %4994 = vmatprep.subr.bf16.mxu1 %v5382_v7 }
0x1719   :  { %4996 = vmatpush3.bf16.msra.mxu1 %v5570_v17 }
0x171a   :  { %v3168_v48 = vpop.permute.xlu1 %3167  ;;  %4997 = vmatprep.subr.bf16.mxu1 %v5382_v7  ;;  %v3276_v12 = vpop.permute.xlu0 %3275 }
0x171b   :  { %v3173_v59 = vsel %vm213_vm3, %v3168_v48, %v3171_v49 }
0x171c   :  { %4614 = vmatmul.mubr.msk.f32.vlgmr.msra.gmra.mrb[34].mxu0 %vm466_vm4, %v3173_v59 }
0x171d   :  { %4999 = vmatpush3.bf16.msra.mxu1 %v5575_v23  ;;  %5002 = vmatpush3.bf16.msra.mxu0 %v5685_v33 }
0x171e   :  { %v6157_v53 = vpop.permute.xlu1 %3272  ;;  %5003 = vmatprep.subr.bf16.mxu0 %v5382_v7  ;;  %5012 = vmatprep.subr.bf16.mxu1 %v5382_v7 }
0x171f   :  { %v3278_v14 = vsel %vm213_vm3, %v6157_v53, %v3276_v12  ;;  %4651 = vmatprep.mubr.msk.f32.mxu0 %vm5383_vm2, %v5384_v22 }
0x1720   :  { %4633 = vmatmul.mubr.msk.f32.vlgmr.msra.gmra.mrb[36].mxu1 %vm466_vm4, %v3278_v14 }
0x1721   :  { %5005 = vmatpush3.bf16.msra.mxu0 %v5689_v62  ;;  %5014 = vmatpush3.bf16.msra.mxu1 %v5615_v2 }
0x1722   :  { %5006 = vmatprep.subr.bf16.mxu0 %v5382_v7  ;;  %5015 = vmatprep.subr.bf16.mxu1 %v5382_v7 }
0x1723   :  { %4670 = vmatprep.mubr.msk.f32.mxu1 %vm5383_vm2, %v5384_v22 }
0x1725   :  { %5008 = vmatpush3.bf16.msra.mxu0 %v5694_v38  ;;  %5017 = vmatpush3.bf16.msra.mxu1 %v5618_v4 }
0x1726   :  { %5009 = vmatprep.subr.bf16.mxu0 %v5382_v7  ;;  %5018 = vmatprep.subr.bf16.mxu1 %v5382_v7 }
0x1729   :  { %5011 = vmatpush3.bf16.msra.mxu0 %v5699_v42  ;;  %5020 = vmatpush3.bf16.msra.mxu1 %v5624_v11 }
0x172a   :  { %5021 = vmatprep.subr.bf16.mxu1 %v5382_v7  ;;  %5024 = vmatprep.subr.bf16.mxu0 %v5382_v7 }
0x172d   :  { %5023 = vmatpush3.bf16.msra.mxu1 %v5628_v16 }
0x17e3   :  { %v3138_v17 = vpop.f32.mrb[34].mxu1 }
0x17e4   :  { %v3139_v23 = vadd.f32 %v6102_v34, %v3138_v17  ;;  %v4596_v2 = vpop.f32.mrb[35].mxu1 }
0x17e6   :  { %5255 = vtanh.f32 %v3139_v23  ;;  %v3826_v9 = vmul.f32 -1.442695, %v3139_v23 }
0x17ef   :  { %v3243_v4 = vpop.f32.mrb[34].mxu0 }
0x17f0   :  { %v5256_v63 = vpop.eup %5255  ;;  %v3244_v13 = vadd.f32 %v6016_v43, %v3243_v4  ;;  %v4615_v0 = vpop.f32.mrb[35].mxu0 }
0x17f1   :  { %3151 = vrot.lane.b32.xlu1 %v5256_v63, %s5385_s1 }
0x17f2   :  { %5257 = vtanh.f32 %v3244_v13  ;;  %v3828_v10 = vmul.f32 -1.442695, %v3244_v13 }
0x17f3   :  { %v3348_v11 = vpop.f32.mrb[36].mxu1 }
0x17f4   :  { %v3349_v3 = vadd.f32 %v5933_v31, %v3348_v11  ;;  %v4634_v8 = vpop.f32.mrb[37].mxu1 }
0x17f6   :  { %5259 = vtanh.f32 %v3349_v3  ;;  %v3830_v19 = vmul.f32 -1.442695, %v3349_v3 }
0x17f7   :  { %5261 = vpow2.f32 %v3826_v9 }
0x17f8   :  { %5263 = vpow2.f32 %v3828_v10 }
0x17f9   :  { %5265 = vpow2.f32 %v3830_v19 }
0x17fc   :  { %v5258_v5 = vpop.eup %5257 }
0x17fd   :  { %3256 = vrot.lane.b32.xlu0 %v5258_v5, %s5385_s1 }
0x1800   :  { %v5260_v16 = vpop.eup %5259 }
0x1801   :  { %3361 = vrot.lane.b32.xlu1 %v5260_v16, %s5385_s1  ;;  %v5262_v61 = vpop.eup %5261 }
0x1802   :  { %v3145_v30 = vadd.f32 1.0, %v5262_v61  ;;  %v5264_v57 = vpop.eup %5263 }
0x1803   :  { %v3250_v20 = vadd.f32 1.0, %v5264_v57  ;;  %v5266_v31 = vpop.eup %5265 }
0x1804   :  { %5267 = vrcp.f32 %v3145_v30  ;;  %v3355_v6 = vadd.f32 1.0, %v5266_v31 }
0x1805   :  { %5269 = vrcp.f32 %v3250_v20 }
0x1806   :  { %5271 = vrcp.f32 %v3355_v6 }
0x180e   :  { %v5268_v15 = vpop.eup %5267 }
0x180f   :  { %v5270_v25 = vpop.eup %5269  ;;  %v3149_v40 = vmul.f32 %v5268_v15, %v6118_v21 }
0x1810   :  { %v5272_v55 = vpop.eup %5271  ;;  %v3254_v36 = vmul.f32 %v5270_v25, %v6122_v54 }
0x1811   :  { %v3359_v24 = vmul.f32 %v5272_v55, %v6131_v46 }
0x1863   :  { %v3152_v26 = vpop.permute.xlu1 %3151 }
0x1864   :  { %v3154_v28 = vmul.f32 %v5268_v15, %v3152_v26 }
0x1866   :  { %3156 = vrot.lane.b32.xlu0 %v3154_v28, %s5386_s28 }
0x186f   :  { %v3257_v35 = vpop.permute.xlu0 %3256 }
0x1870   :  { %v3259_v18 = vmul.f32 %v5270_v25, %v3257_v35 }
0x1872   :  { %3261 = vrot.lane.b32.xlu1 %v3259_v18, %s5386_s28 }
0x1873   :  { %v3362_v32 = vpop.permute.xlu1 %3361 }
0x1874   :  { %v3364_v29 = vmul.f32 %v5272_v55, %v3362_v32 }
0x1876   :  { %3366 = vrot.lane.b32.xlu0 %v3364_v29, %s5386_s28 }
0x18d8   :  { %v3157_v50 = vpop.permute.xlu0 %3156 }
0x18d9   :  { %v6191_v58 = vadd.f32 %v3157_v50, %v3149_v40 }
0x18db   :  { %5273 = vtanh.f32 %v6191_v58 }
0x18e4   :  { %v3262_v51 = vpop.permute.xlu1 %3261 }
0x18e5   :  { %v5274_v37 = vpop.eup %5273  ;;  %v6195_v39 = vadd.f32 %v3262_v51, %v3254_v36 }
0x18e6   :  { %3162 = vrot.lane.b32.xlu1 %v5274_v37, %s5385_s1 }
0x18e7   :  { %5275 = vtanh.f32 %v6195_v39 }
0x18e8   :  { %v3367_v1 = vpop.permute.xlu0 %3366 }
0x18e9   :  { %v6200_v41 = vadd.f32 %v3367_v1, %v3359_v24 }
0x18eb   :  { %5277 = vtanh.f32 %v6200_v41 }
0x18f1   :  { %v5276_v21 = vpop.eup %5275 }
0x18f2   :  { %3267 = vrot.lane.b32.xlu0 %v5276_v21, %s5385_s1 }
0x18f5   :  { %v5278_v44 = vpop.eup %5277 }
0x18f6   :  { %3372 = vrot.lane.b32.xlu1 %v5278_v44, %s5385_s1 }
0x1958   :  { %v3163_v54 = vpop.permute.xlu1 %3162 }
0x1959   :  { %v3165_v45 = vmul.f32 %v5268_v15, %v3163_v54 }
0x195b   :  { %3381 = vrot.lane.b32.xlu1 %v3165_v45, %s5385_s1 }
0x1964   :  { %v3268_v60 = vpop.permute.xlu0 %3267 }
0x1965   :  { %v3270_v52 = vmul.f32 %v5270_v25, %v3268_v60 }
0x1967   :  { %3377 = vrot.lane.b32.xlu0 %v3270_v52, %s5386_s28  ;;  %3486 = vrot.lane.b32.xlu1 %v3270_v52, %s5385_s1 }
0x1968   :  { %v3373_v46 = vpop.permute.xlu1 %3372 }
0x1969   :  { %v6208_v47 = vmul.f32 %v5272_v55, %v3373_v46 }
0x196b   :  { %3483 = vrot.lane.b32.xlu0 %v6208_v47, %s5386_s28 }
0x19cd   :  { %v3382_v56 = vpop.permute.xlu1 %3381 }
0x19d9   :  { %v3378_v49 = vpop.permute.xlu0 %3377  ;;  %v3487_v59 = vpop.permute.xlu1 %3486 }
0x19da   :  { %v3384_v48 = vsel %vm213_vm3, %v3378_v49, %v3382_v56 }
0x19db   :  { %4652 = vmatmul.mubr.msk.f32.vlgmr.msra.gmra.mrb[36].mxu0 %vm466_vm4, %v3384_v48 }
0x19dc   :  { %5026 = vmatpush3.bf16.msra.mxu0 %v5685_v33  ;;  %4689 = vmatprep.mubr.msk.f32.mxu0 %vm5383_vm2, %v5384_v22 }
0x19dd   :  { %v3484_v12 = vpop.permute.xlu0 %3483  ;;  %5027 = vmatprep.subr.bf16.mxu0 %v5382_v7 }
0x19de   :  { %v3489_v14 = vsel %vm213_vm3, %v3484_v12, %v3487_v59 }
0x19df   :  { %4671 = vmatmul.mubr.msk.f32.vlgmr.msra.gmra.mrb[38].mxu1 %vm466_vm4, %v3489_v14 }
0x19e0   :  { %5029 = vmatpush3.bf16.msra.mxu0 %v5689_v62 }
0x19e1   :  { %5030 = vmatprep.subr.bf16.mxu0 %v5382_v7 }
0x19e4   :  { %5032 = vmatpush3.bf16.msra.mxu0 %v5694_v38 }
0x19e5   :  { %5033 = vmatprep.subr.bf16.mxu0 %v5382_v7 }
0x19e8   :  { %5035 = vmatpush3.bf16.msra.mxu0 %v5699_v42 }
0x1aae   :  { %v3454_v33 = vpop.f32.mrb[36].mxu0 }
0x1aaf   :  { %v3455_v22 = vadd.f32 %v6102_v34, %v3454_v33  ;;  %v4653_v17 = vpop.f32.mrb[37].mxu0 }
0x1ab1   :  { %5279 = vtanh.f32 %v3455_v22  ;;  %v3832_v38 = vmul.f32 -1.442695, %v3455_v22 }
0x1ab2   :  { %v3559_v23 = vpop.f32.mrb[38].mxu1 }
0x1ab3   :  { %v3560_v2 = vadd.f32 %v6016_v43, %v3559_v23  ;;  %v4672_v4 = vpop.f32.mrb[39].mxu1 }
0x1ab5   :  { %5281 = vtanh.f32 %v3560_v2  ;;  %v3834_v7 = vmul.f32 -1.442695, %v3560_v2 }
0x1ab6   :  { %5283 = vpow2.f32 %v3832_v38 }
0x1ab7   :  { %5285 = vpow2.f32 %v3834_v7 }
0x1abb   :  { %v5280_v63 = vpop.eup %5279 }
0x1abc   :  { %3467 = vrot.lane.b32.xlu0 %v5280_v63, %s5385_s1 }
0x1abf   :  { %v5282_v62 = vpop.eup %5281 }
0x1ac0   :  { %3572 = vrot.lane.b32.xlu1 %v5282_v62, %s5385_s1  ;;  %v5284_v42 = vpop.eup %5283 }
0x1ac1   :  { %v3461_v13 = vadd.f32 1.0, %v5284_v42  ;;  %v5286_v0 = vpop.eup %5285 }
0x1ac2   :  { %v3566_v11 = vadd.f32 1.0, %v5286_v0 }
0x1ac3   :  { %5287 = vrcp.f32 %v3461_v13 }
0x1ac4   :  { %5289 = vrcp.f32 %v3566_v11 }
0x1acd   :  { %v5288_v3 = vpop.eup %5287 }
0x1ace   :  { %v5290_v5 = vpop.eup %5289  ;;  %v3465_v10 = vmul.f32 %v5288_v3, %v6191_v58 }
0x1acf   :  { %v3570_v30 = vmul.f32 %v5290_v5, %v6195_v39 }
0x1b2e   :  { %v3468_v43 = vpop.permute.xlu0 %3467 }
0x1b2f   :  { %v3470_v8 = vmul.f32 %v5288_v3, %v3468_v43 }
0x1b31   :  { %3472 = vrot.lane.b32.xlu0 %v3470_v8, %s5386_s28 }
0x1b32   :  { %v3573_v16 = vpop.permute.xlu1 %3572 }
0x1b33   :  { %v3575_v9 = vmul.f32 %v5290_v5, %v3573_v16 }
0x1b35   :  { %3577 = vrot.lane.b32.xlu1 %v3575_v9, %s5386_s28 }
0x1ba3   :  { %v3473_v61 = vpop.permute.xlu0 %3472 }
0x1ba4   :  { %v3475_v19 = vadd.f32 %v3473_v61, %v3465_v10 }
0x1ba6   :  { %5291 = vtanh.f32 %v3475_v19 }
0x1ba7   :  { %v3578_v57 = vpop.permute.xlu1 %3577 }
0x1ba8   :  { %v3580_v20 = vadd.f32 %v3578_v57, %v3570_v30 }
0x1baa   :  { %5293 = vtanh.f32 %v3580_v20 }
0x1bb0   :  { %v5292_v31 = vpop.eup %5291 }
0x1bb1   :  { %3478 = vrot.lane.b32.xlu0 %v5292_v31, %s5385_s1 }
0x1bb4   :  { %v5294_v15 = vpop.eup %5293 }
0x1bb5   :  { %3583 = vrot.lane.b32.xlu1 %v5294_v15, %s5385_s1 }
0x1c23   :  { %v3479_v26 = vpop.permute.xlu0 %3478 }
0x1c24   :  { %v3481_v28 = vmul.f32 %v5288_v3, %v3479_v26 }
0x1c26   :  { %3592 = vrot.lane.b32.xlu1 %v3481_v28, %s5385_s1 }
0x1c27   :  { %v3584_v6 = vpop.permute.xlu1 %3583 }
0x1c28   :  { %v3586_v25 = vmul.f32 %v5290_v5, %v3584_v6 }
0x1c2a   :  { %3588 = vrot.lane.b32.xlu0 %v3586_v25, %s5386_s28 }
0x1c98   :  { %v3593_v35 = vpop.permute.xlu1 %3592 }
0x1c9c   :  { %v3589_v18 = vpop.permute.xlu0 %3588 }
0x1c9d   :  { %v3595_v55 = vsel %vm213_vm3, %v3589_v18, %v3593_v35 }
0x1c9e   :  { %4690 = vmatmul.mubr.msk.f32.vlgmr.msra.gmra.mrb[38].mxu0 %vm466_vm4, %v3595_v55 }
0x1d71   :  { %v3665_v32 = vpop.f32.mrb[38].mxu0 }
0x1d72   :  { %v3666_v29 = vadd.f32 %v6102_v34, %v3665_v32  ;;  %v4691_v40 = vpop.f32.mrb[39].mxu0 }
0x1d74   :  { %5295 = vtanh.f32 %v3666_v29  ;;  %v3836_v58 = vmul.f32 -1.442695, %v3666_v29 }
0x1d76   :  { %5297 = vpow2.f32 %v3836_v58 }
0x1d7e   :  { %v5296_v50 = vpop.eup %5295 }
0x1d7f   :  { %3678 = vrot.lane.b32.xlu0 %v5296_v50, %s5385_s1 }
0x1d80   :  { %v5298_v36 = vpop.eup %5297 }
0x1d81   :  { %v3672_v51 = vadd.f32 1.0, %v5298_v36 }
0x1d83   :  { %3705 = vrot.lane.b32.xlu0 %v6126_v27, %s5387_s6  ;;  %5299 = vrcp.f32 %v3672_v51 }
0x1d8d   :  { %v5300_v37 = vpop.eup %5299 }
0x1d8e   :  { %v3676_v34 = vmul.f32 %v5300_v37, %v3475_v19 }
0x1df1   :  { %v3679_v39 = vpop.permute.xlu0 %3678 }
0x1df2   :  { %v3681_v24 = vmul.f32 %v5300_v37, %v3679_v39 }
0x1df4   :  { %3683 = vrot.lane.b32.xlu1 %v3681_v24, %s5386_s28 }
0x1df5   :  { %v3706_v54 = vpop.permute.xlu0 %3705 }
0x1df6   :  { %v3716_v49 = vsel %vm213_vm3, %v3706_v54, %v6200_v41 }
0x1df8   :  { %3693 = vrot.lane.b32.xlu1 %v6208_v47, %s5385_s1 }
0x1dfc   :  { %3696 = vrot.lane.b32.xlu1 %v3586_v25, %s5387_s6 }
0x1e66   :  { %v3684_v1 = vpop.permute.xlu1 %3683 }
0x1e67   :  { %v3686_v21 = vadd.f32 %v3684_v1, %v3676_v34 }
0x1e69   :  { %5301 = vtanh.f32 %v3686_v21  ;;  %3713 = vrot.lane.b32.xlu1 %v3686_v21, %s5385_s1 }
0x1e6a   :  { %v3694_v44 = vpop.permute.xlu1 %3693 }
0x1e6b   :  { %v3699_v52 = vsel %vm213_vm3, %v6157_v53, %v3694_v44 }
0x1e6e   :  { %v3697_v45 = vpop.permute.xlu1 %3696 }
0x1e6f   :  { %v3700_v47 = vsel %vm466_vm4, %v3699_v52, %v3697_v45 }
0x1e73   :  { %v5302_v27 = vpop.eup %5301 }
0x1e74   :  { %3689 = vrot.lane.b32.xlu0 %v5302_v27, %s5385_s1 }
0x1e78   :  { %3709 = vrot.lane.b32.xlu0 %v3580_v20, %s5386_s28 }
0x1edb   :  { %v3714_v59 = vpop.permute.xlu1 %3713 }
0x1ee6   :  { %v3690_v60 = vpop.permute.xlu0 %3689 }
0x1ee7   :  { %v3692_v46 = vmul.f32 %v5300_v37, %v3690_v60 }
0x1ee9   :  { %v3702_v56 = vsel %vm3701_vm5, %v3700_v47, %v3692_v46 }
0x1eea   :  { %v3710_v48 = vpop.permute.xlu0 %3709  ;;  %3703 = vst [vmem:[#allocation5] sm:$0xff] %v3702_v56 }
0x1eeb   :  { %v3717_v12 = vsel %vm466_vm4, %v3716_v49, %v3710_v48 }
0x1eec   :  { %5340 = shalt.err (!%p5337_p12)
}
0x1eed   :  { %s5341_s27 = scalar_lea.hbm %s6294_s7, 128 }
0x1eee   :  { %p5342_p13 = scmp.ne.s32.totalorder %s6294_s7, %s5341_s27  ;;  %p5345_p0 = scmp.lt.u32.totalorder %s5341_s27, %s6294_s7 }
0x1ef0   :  { %p5347_p1 = pnand %p5345_p0, %p5342_p13 }
0x1ef2   :  { %5350 = shalt.err (!%p5347_p1)
}
0x1ef3   :  { %3729 = dma.vmem_to_hbm [thread:$0]  %s3727_s22, 128, %s6294_s7, [#allocation4]   ;;  %v3718_v53 = vsel %vm3701_vm5, %v3717_v12, %v3714_v59 }
0x1ef4   :  { %3719 = vst [vmem:[#allocation6] sm:$0xff] %v3718_v53  ;;  %s5351_s29 = scalar_lea.vmem %s6254_s24, 128  ;;  %p5356_p3 = scmp.lt.s32.totalorder %s6254_s24, %s6254_s24 }
0x1ef5   :  { %p5352_p2 = scmp.ne.s32.totalorder %s6254_s24, %s5351_s29  ;;  %p5357_p4 = scmp.lt.s32.totalorder %s5351_s29, %s5351_s29 }
0x1ef7   :  { %p5358_p5 = por %p5357_p4, %p5356_p3 }
0x1ef9   :  { %p5359_p6 = pnand %p5358_p5, %p5352_p2 }
0x1efb   :  { %5362 = shalt.err (!%p5359_p6)
}
0x1efc   :  { %s5363_s10 = scalar_lea.hbm %s6295_s8, 128 }
0x1efd   :  { %p5364_p7 = scmp.ne.s32.totalorder %s6295_s8, %s5363_s10  ;;  %p5367_p8 = scmp.lt.u32.totalorder %s5363_s10, %s6295_s8 }
0x1eff   :  { %p5369_p9 = pnand %p5367_p8, %p5364_p7 }
0x1f01   :  { %5372 = shalt.err (!%p5369_p9)
}
0x1f02   :  { %3739 = dma.vmem_to_hbm [thread:$0]  %s6254_s24, 128, %s6295_s8, [#allocation7]  }
0x1f03   :  { %5375 = dma.done.wait [#allocation4], 128  }
0x1f04   :  { %5376 = vsyncadd [#allocation4], 4294967168 }
0x1f05   :  { %5377 = dma.done.wait [#allocation7], 128  }
0x1f06   :  { %5378 = vsyncadd [#allocation7], 4294967168 }
0x1f07   :  { %3746 = vsyncpa [#allocation3], 1 }
0x1f08   :  { %3747 = vsyncpa [#allocation4], 1 }
0x1f09   :  { %3748 = vsyncpa [#allocation7], 1 }

</bundles_post_ra>
